<compile_context>
chip_gen: v7x
topology: tpu7x:2x2x1
jax: 0.10.0
libtpu: 0.0.40
codegen_flags: <defaults>
</compile_context>

<pallas_src>
import functools
import numpy as np

import jax
import jax.numpy as jnp
from jax import lax
from jax.experimental import pallas as pl
from jax.experimental.pallas import tpu as pltpu


_VMEM_SPEC = pl.BlockSpec(memory_space=pltpu.MemorySpace.VMEM)


# ----------------------------------------------------------------------------
# In-kernel coupling network (shared by both kernels)
# ----------------------------------------------------------------------------
def _coupling_net(x, w1a, w1b, w1c, b1, w2, b2, w3a, w3b, w3c, b3, L):
    """AffineCouplingNetwork on a (Cin, B*L) tile.

    Conv1d(k=3, padding=1): neighbours are produced with pltpu.roll along the
    lane axis; an iota mask zeroes the columns that would leak across the
    per-batch boundaries (equivalent to zero padding every batch element).
    """
    Cin, BL = x.shape
    F = w2.shape[0]
    dot = lambda w, v: jnp.dot(w, v, preferred_element_type=jnp.float32)

    lpos = lax.broadcasted_iota(jnp.int32, (Cin, BL), 1) % L
    xm1 = jnp.where(lpos == 0, 0.0, pltpu.roll(x, 1, axis=1))        # x[l-1]
    xp1 = jnp.where(lpos == L - 1, 0.0, pltpu.roll(x, BL - 1, axis=1))  # x[l+1]
    h1 = dot(w1a, xm1) + dot(w1b, x) + dot(w1c, xp1) + b1
    h1 = jnp.maximum(h1, 0.0)

    h2 = jnp.maximum(dot(w2, h1) + b2, 0.0)

    hpos = lax.broadcasted_iota(jnp.int32, (F, BL), 1) % L
    hm1 = jnp.where(hpos == 0, 0.0, pltpu.roll(h2, 1, axis=1))
    hp1 = jnp.where(hpos == L - 1, 0.0, pltpu.roll(h2, BL - 1, axis=1))
    o = dot(w3a, hm1) + dot(w3b, h2) + dot(w3c, hp1) + b3            # (2Cin, BL)

    log_s = o[:Cin]
    t = o[Cin:]
    s = jax.nn.sigmoid(log_s + 2.0)
    return s, t


# ----------------------------------------------------------------------------
# Fused FlowStep kernel: actnorm + inv 1x1 conv + affine coupling + log-det
# ----------------------------------------------------------------------------
def _flow_step_kernel(xa_ref, xb_ref, sa_ref, ba_ref, sb_ref, bb_ref,
                      waa_ref, wab_ref, wba_ref, wbb_ref,
                      w1a_ref, w1b_ref, w1c_ref, b1_ref,
                      w2_ref, b2_ref,
                      w3a_ref, w3b_ref, w3c_ref, b3_ref,
                      ya_ref, yb_ref, ldc_ref, *, L, swap):
    dot = lambda w, v: jnp.dot(w, v, preferred_element_type=jnp.float32)

    # Actnorm (scale/bias pre-tiled to (Ch, B*L)).
    a = sa_ref[...] * (xa_ref[...] + ba_ref[...])
    b = sb_ref[...] * (xb_ref[...] + bb_ref[...])

    # Invertible 1x1 conv expressed directly on the even/odd channel blocks:
    # y_even = W[::2, ::2] a + W[::2, 1::2] b ; y_odd analogous.
    ya = dot(waa_ref[...], a) + dot(wab_ref[...], b)
    yb = dot(wba_ref[...], a) + dot(wbb_ref[...], b)

    x_in = yb if swap else ya          # drives the coupling network
    x_tr = ya if swap else yb          # gets transformed

    s, t = _coupling_net(x_in,
                         w1a_ref[...], w1b_ref[...], w1c_ref[...], b1_ref[...],
                         w2_ref[...], b2_ref[...],
                         w3a_ref[...], w3b_ref[...], w3c_ref[...], b3_ref[...],
                         L)
    x_new = (x_tr + t) * s

    if swap:
        ya_ref[...] = x_new
        yb_ref[...] = x_in
    else:
        ya_ref[...] = x_in
        yb_ref[...] = x_new
    # channel-reduced log s; per-batch reduction (over L lanes) happens in XLA
    ldc_ref[...] = jnp.sum(jnp.log(s), axis=0, keepdims=True)


# ----------------------------------------------------------------------------
# Fused coupling-only kernel (scale-end coupling interpolation)
# ----------------------------------------------------------------------------
def _coupling_kernel(xa_ref, xb_ref,
                     w1a_ref, w1b_ref, w1c_ref, b1_ref,
                     w2_ref, b2_ref,
                     w3a_ref, w3b_ref, w3c_ref, b3_ref,
                     yb_ref, ldc_ref, *, L):
    s, t = _coupling_net(xa_ref[...],
                         w1a_ref[...], w1b_ref[...], w1c_ref[...], b1_ref[...],
                         w2_ref[...], b2_ref[...],
                         w3a_ref[...], w3b_ref[...], w3c_ref[...], b3_ref[...],
                         L)
    yb_ref[...] = (xb_ref[...] + t) * s
    ldc_ref[...] = jnp.sum(jnp.log(s), axis=0, keepdims=True)


# ----------------------------------------------------------------------------
# Wrappers (XLA glue is only reshapes/transposes/tiny stats on HBM-resident
# step inputs; all heavy per-step work is a single pallas_call)
# ----------------------------------------------------------------------------
def _prep_coupling(cp):
    w1, w3 = cp["w1"], cp["w3"]            # (F, Cin, 3), (2Cin, F, 3)
    F = w1.shape[0]
    return (w1[:, :, 0], w1[:, :, 1], w1[:, :, 2], cp["b1"].reshape(F, 1),
            cp["w2"], cp["b2"].reshape(F, 1),
            w3[:, :, 0], w3[:, :, 1], w3[:, :, 2], cp["b3"].reshape(-1, 1))


def _actnorm_stats(x, eps=1e-6):
    # x: (Ch, B, L); statistics over the batch axis, matching torch
    # (torch.std is unbiased, ddof=1).  Log-det = sum(log|scale|).
    mean = jnp.mean(x, axis=1)
    std = jnp.std(x, axis=1, ddof=1)
    scale = 1.0 / (std + eps)
    return scale, -mean, jnp.sum(jnp.log(jnp.abs(scale)))


def flow_step_forward(x_a, x_b, step):
    """One FlowStep on even/odd channel blocks x_a/x_b of shape (Ch, B, L)."""
    Ch, B, L = x_a.shape
    BL = B * L
    sa, ba, ld_a = _actnorm_stats(x_a)
    sb, bb, ld_b = _actnorm_stats(x_b)
    tile = lambda v: jnp.tile(v, (1, B))   # (Ch, L) -> (Ch, B*L), col = b*L+l

    w = step["invconv"]["w"]
    waa, wab = w[0::2, 0::2], w[0::2, 1::2]
    wba, wbb = w[1::2, 0::2], w[1::2, 1::2]
    cps = _prep_coupling(step["coupling"])

    ya, yb, ldc = pl.pallas_call(
        functools.partial(_flow_step_kernel, L=L, swap=step["swap"]),
        out_shape=(jax.ShapeDtypeStruct((Ch, BL), jnp.float32),
                   jax.ShapeDtypeStruct((Ch, BL), jnp.float32),
                   jax.ShapeDtypeStruct((1, BL), jnp.float32)),
        in_specs=[_VMEM_SPEC] * (10 + len(cps)),
        out_specs=(_VMEM_SPEC, _VMEM_SPEC, _VMEM_SPEC),
    )(x_a.reshape(Ch, BL), x_b.reshape(Ch, BL),
      tile(sa), tile(ba), tile(sb), tile(bb),
      waa, wab, wba, wbb, *cps)

    ld_coup = jnp.sum(ldc.reshape(B, L), axis=1)                     # (B,)
    ld_conv = L * jnp.sum(step["invconv"]["log_abs_s"])
    return (ya.reshape(Ch, B, L), yb.reshape(Ch, B, L),
            ld_coup + ld_conv + ld_a + ld_b)


def coupling_forward(x_a, x_b, cp):
    """AffineCoupling on blocks (Ch, B, L); returns transformed x_b + log_det."""
    Ch, B, L = x_a.shape
    BL = B * L
    cps = _prep_coupling(cp)
    yb, ldc = pl.pallas_call(
        functools.partial(_coupling_kernel, L=L),
        out_shape=(jax.ShapeDtypeStruct((Ch, BL), jnp.float32),
                   jax.ShapeDtypeStruct((1, BL), jnp.float32)),
        in_specs=[_VMEM_SPEC] * (2 + len(cps)),
        out_specs=(_VMEM_SPEC, _VMEM_SPEC),
    )(x_a.reshape(Ch, BL), x_b.reshape(Ch, BL), *cps)
    return yb.reshape(Ch, B, L), jnp.sum(ldc.reshape(B, L), axis=1)


def squeeze_jax(x):
    B, C, L = x.shape
    x = x.reshape(B, C, L // 2, 2)
    x = jnp.swapaxes(x, 2, 3)
    return x.reshape(B, 2 * C, L // 2)


def flow_scale_forward(x, sp, split=True):
    x = squeeze_jax(x)                                   # (B, C, L)
    B, C, L = x.shape
    Ch = C // 2
    # even / odd channel blocks, (Ch, B, L): channels -> sublanes,
    # batch*length -> lanes inside the kernels.
    x_a = jnp.transpose(x[:, 0::2, :], (1, 0, 2))
    x_b = jnp.transpose(x[:, 1::2, :], (1, 0, 2))
    ld_acc = jnp.zeros((B,), jnp.float32)
    for step in sp["steps"]:
        x_a, x_b, ld = flow_step_forward(x_a, x_b, step)
        ld_acc = ld_acc + ld
    if split:
        # x_new = even block (== x[:, ::2]), z = odd block (== x[:, 1::2])
        z, ld_coup = coupling_forward(x_a, x_b, sp["coupling_interp"])
        sc, bi, ld_act = _actnorm_stats(z)               # latent actnorm (tiny, XLA)
        z = sc[:, None, :] * (z + bi[:, None, :])
        ld_acc = ld_acc + ld_act + ld_coup
        x_new = squeeze_jax(jnp.transpose(x_a, (1, 0, 2)))   # (B, 2*Ch, L//2)
        z = jnp.transpose(z, (1, 0, 2))                      # (B, Ch, L)
        return x_new, z, ld_acc
    # merge even/odd blocks back into natural interleaved channel order (XLA)
    a_t = jnp.transpose(x_a, (1, 0, 2))
    b_t = jnp.transpose(x_b, (1, 0, 2))
    x_out = jnp.stack([a_t, b_t], axis=2).reshape(B, C, L)
    return x_out, ld_acc


def ecg_norm_flow_forward(x, params):
    B = x.shape[0]
    ld_acc = jnp.zeros((B,), jnp.float32)
    zs = []
    for sp in params[:-1]:
        x, z, ld = flow_scale_forward(x, sp, split=True)
        ld_acc = ld_acc + ld
        zs.append(z.reshape(B, -1))
    x, ld = flow_scale_forward(x, params[-1], split=False)
    ld_acc = ld_acc + ld
    zs.append(x.reshape(B, -1))
    return jnp.concatenate(zs, axis=1), ld_acc


# ----------------------------------------------------------------------------
# Deterministic parameter initialization (synthetic, not a checkpoint load)
# ----------------------------------------------------------------------------
def init_coupling_params(key, cin, nf):
    k1, k2, k3, k4, k5, k6 = jax.random.split(key, 6)
    return dict(
        w1=jax.random.normal(k1, (nf, cin, 3), jnp.float32) / np.sqrt(3 * cin),
        b1=jax.random.normal(k2, (nf,), jnp.float32) * 0.01,
        w2=jax.random.normal(k3, (nf, nf), jnp.float32) / np.sqrt(nf),
        b2=jax.random.normal(k4, (nf,), jnp.float32) * 0.01,
        w3=jax.random.normal(k5, (2 * cin, nf, 3), jnp.float32) / np.sqrt(3 * nf),
        b3=jax.random.normal(k6, (2 * cin,), jnp.float32) * 0.01,
    )


def init_invconv_params(key, c):
    # TODO(synk): torch init uses QR + scipy LU of a random matrix; here the
    # P/L/U factors are initialized directly (same reconstruction formula).
    kl, ku, ks, kg = jax.random.split(key, 4)
    l = jax.random.normal(kl, (c, c), jnp.float32) * 0.1
    u = jax.random.normal(ku, (c, c), jnp.float32) * 0.1
    log_abs_s = jax.random.normal(ks, (c,), jnp.float32) * 0.05
    s_sign = jnp.where(jax.random.normal(kg, (c,)) >= 0, 1.0, -1.0)
    l_mask = jnp.tril(jnp.ones((c, c), jnp.float32), -1)
    u_mask = l_mask.T
    eye = jnp.eye(c, dtype=jnp.float32)
    l_tri = l * l_mask + eye
    u_tri = u * u_mask + jnp.diag(s_sign * jnp.exp(log_abs_s))
    w = eye @ l_tri @ u_tri            # p = identity permutation
    return dict(w=w, log_abs_s=log_abs_s)


def init_params(key, in_channels, signal_len, n_scales, n_steps, n_filters):
    params = []
    for i in range(n_scales):
        C = (2 ** i) * in_channels
        C_sq = 2 * C
        steps = []
        for s in range(n_steps):
            key, k1, k2 = jax.random.split(key, 3)
            steps.append(dict(
                invconv=init_invconv_params(k1, C_sq),
                coupling=init_coupling_params(k2, C_sq // 2, n_filters),
                swap=(s % 2 == 1),
            ))
        key, k3 = jax.random.split(key)
        params.append(dict(
            steps=steps,
            coupling_interp=init_coupling_params(k3, C, n_filters),
        ))
    return params


# ----------------------------------------------------------------------------
if __name__ == "__main__":
    in_channels, signal_len = 2, 64
    n_scales, n_steps, n_filters = 2, 2, 32
    batch = 2

    key = jax.random.PRNGKey(0)
    kx, kp = jax.random.split(key)
    x = jax.random.normal(kx, (batch, in_channels, signal_len), dtype=jnp.float32)
    params = init_params(kp, in_channels, signal_len, n_scales, n_steps, n_filters)

    fwd = jax.jit(functools.partial(ecg_norm_flow_forward, params=params))
    z, log_det = fwd(x)
    jax.block_until_ready((z, log_det))

    assert z.shape == (batch, in_channels * signal_len), z.shape
    assert log_det.shape == (batch,), log_det.shape
    assert bool(jnp.all(jnp.isfinite(z))) and bool(jnp.all(jnp.isfinite(log_det)))
    print("KERNEL_OK")
</pallas_src>

<mosaic_0001>
module attributes {stable_mosaic.version = 11 : i64} {
  func.func @_coupling_kernel(%arg0: memref<2x64xf32, #tpu.memory_space<vmem>>, %arg1: memref<2x64xf32, #tpu.memory_space<vmem>>, %arg2: memref<32x2xf32, #tpu.memory_space<vmem>>, %arg3: memref<32x2xf32, #tpu.memory_space<vmem>>, %arg4: memref<32x2xf32, #tpu.memory_space<vmem>>, %arg5: memref<32x1xf32, #tpu.memory_space<vmem>>, %arg6: memref<32x32xf32, #tpu.memory_space<vmem>>, %arg7: memref<32x1xf32, #tpu.memory_space<vmem>>, %arg8: memref<4x32xf32, #tpu.memory_space<vmem>>, %arg9: memref<4x32xf32, #tpu.memory_space<vmem>>, %arg10: memref<4x32xf32, #tpu.memory_space<vmem>>, %arg11: memref<4x1xf32, #tpu.memory_space<vmem>>, %arg12: memref<2x64xf32, #tpu.memory_space<vmem>>, %arg13: memref<1x64xf32, #tpu.memory_space<vmem>>) attributes {dimension_semantics = [], scalar_prefetch = 0 : i64, scratch_operands = 0 : i64, tpu.core_type = #tpu.core_type<tc>} {
    %c0 = arith.constant 0 : index
    %c0_0 = arith.constant 0 : index
    %0 = vector.load %arg0[%c0, %c0_0] : memref<2x64xf32, #tpu.memory_space<vmem>>, vector<2x64xf32>
    %c0_1 = arith.constant 0 : index
    %c0_2 = arith.constant 0 : index
    %1 = vector.load %arg2[%c0_1, %c0_2] : memref<32x2xf32, #tpu.memory_space<vmem>>, vector<32x2xf32>
    %c0_3 = arith.constant 0 : index
    %c0_4 = arith.constant 0 : index
    %2 = vector.load %arg3[%c0_3, %c0_4] : memref<32x2xf32, #tpu.memory_space<vmem>>, vector<32x2xf32>
    %c0_5 = arith.constant 0 : index
    %c0_6 = arith.constant 0 : index
    %3 = vector.load %arg4[%c0_5, %c0_6] : memref<32x2xf32, #tpu.memory_space<vmem>>, vector<32x2xf32>
    %c0_7 = arith.constant 0 : index
    %c0_8 = arith.constant 0 : index
    %4 = vector.load %arg5[%c0_7, %c0_8] : memref<32x1xf32, #tpu.memory_space<vmem>>, vector<32x1xf32>
    %c0_9 = arith.constant 0 : index
    %c0_10 = arith.constant 0 : index
    %5 = vector.load %arg6[%c0_9, %c0_10] : memref<32x32xf32, #tpu.memory_space<vmem>>, vector<32x32xf32>
    %c0_11 = arith.constant 0 : index
    %c0_12 = arith.constant 0 : index
    %6 = vector.load %arg7[%c0_11, %c0_12] : memref<32x1xf32, #tpu.memory_space<vmem>>, vector<32x1xf32>
    %c0_13 = arith.constant 0 : index
    %c0_14 = arith.constant 0 : index
    %7 = vector.load %arg8[%c0_13, %c0_14] : memref<4x32xf32, #tpu.memory_space<vmem>>, vector<4x32xf32>
    %c0_15 = arith.constant 0 : index
    %c0_16 = arith.constant 0 : index
    %8 = vector.load %arg9[%c0_15, %c0_16] : memref<4x32xf32, #tpu.memory_space<vmem>>, vector<4x32xf32>
    %c0_17 = arith.constant 0 : index
    %c0_18 = arith.constant 0 : index
    %9 = vector.load %arg10[%c0_17, %c0_18] : memref<4x32xf32, #tpu.memory_space<vmem>>, vector<4x32xf32>
    %c0_19 = arith.constant 0 : index
    %c0_20 = arith.constant 0 : index
    %10 = vector.load %arg11[%c0_19, %c0_20] : memref<4x1xf32, #tpu.memory_space<vmem>>, vector<4x1xf32>
    %11 = tpu.iota {dimensions = array<i32: 1>} : vector<2x64xi32>
    %c32_i32 = arith.constant 32 : i32
    %c0_i32 = arith.constant 0 : i32
    %12 = arith.cmpi eq, %c32_i32, %c0_i32 : i32
    %c1_i32 = arith.constant 1 : i32
    %13 = arith.select %12, %c1_i32, %c32_i32 : i32
    %14 = vector.broadcast %13 : i32 to vector<2x64xi32>
    %15 = arith.remsi %11, %14 : vector<2x64xi32>
    %c0_i32_21 = arith.constant 0 : i32
    %16 = vector.broadcast %c0_i32_21 : i32 to vector<2x64xi32>
    %17 = arith.cmpi ne, %15, %16 : vector<2x64xi32>
    %c0_i32_22 = arith.constant 0 : i32
    %18 = vector.broadcast %c0_i32_22 : i32 to vector<2x64xi32>
    %19 = arith.cmpi slt, %15, %18 : vector<2x64xi32>
    %c0_i32_23 = arith.constant 0 : i32
    %20 = arith.cmpi slt, %13, %c0_i32_23 : i32
    %21 = vector.broadcast %20 : i1 to vector<2x64xi1>
    %22 = vector.broadcast %21 : vector<2x64xi1> to vector<2x64xi1>
    %23 = arith.xori %19, %22 : vector<2x64xi1>
    %24 = arith.andi %23, %17 : vector<2x64xi1>
    %25 = vector.broadcast %13 : i32 to vector<2x64xi32>
    %26 = arith.addi %15, %25 : vector<2x64xi32>
    %27 = arith.select %24, %26, %15 : vector<2x64xi1>, vector<2x64xi32>
    %c0_i32_24 = arith.constant 0 : i32
    %28 = vector.broadcast %c0_i32_24 : i32 to vector<2x64xi32>
    %29 = arith.cmpi eq, %27, %28 : vector<2x64xi32>
    %c1_i32_25 = arith.constant 1 : i32
    %30 = tpu.dynamic_rotate %0 by %c1_i32_25 dim 1 : vector<2x64xf32>, i32 -> vector<2x64xf32>
    %cst = arith.constant 0.000000e+00 : f32
    %31 = vector.broadcast %cst : f32 to vector<2x64xf32>
    %32 = arith.select %29, %31, %30 : vector<2x64xi1>, vector<2x64xf32>
    %c31_i32 = arith.constant 31 : i32
    %33 = vector.broadcast %c31_i32 : i32 to vector<2x64xi32>
    %34 = arith.cmpi eq, %27, %33 : vector<2x64xi32>
    %c63_i32 = arith.constant 63 : i32
    %35 = tpu.dynamic_rotate %0 by %c63_i32 dim 1 : vector<2x64xf32>, i32 -> vector<2x64xf32>
    %cst_26 = arith.constant 0.000000e+00 : f32
    %36 = vector.broadcast %cst_26 : f32 to vector<2x64xf32>
    %37 = arith.select %34, %36, %35 : vector<2x64xi1>, vector<2x64xf32>
    %cst_27 = arith.constant dense<0.000000e+00> : vector<32x64xf32>
    %38 = tpu.matmul %1, %32, %cst_27 {dimension_numbers = #tpu.dot_dimension_numbers<[1], [0], [0], [1], [0, 0, 1, 1], [], []>} : vector<32x2xf32>, vector<2x64xf32>, vector<32x64xf32> -> vector<32x64xf32>
    %cst_28 = arith.constant dense<0.000000e+00> : vector<32x64xf32>
    %39 = tpu.matmul %2, %0, %cst_28 {dimension_numbers = #tpu.dot_dimension_numbers<[1], [0], [0], [1], [0, 0, 1, 1], [], []>} : vector<32x2xf32>, vector<2x64xf32>, vector<32x64xf32> -> vector<32x64xf32>
    %40 = arith.addf %38, %39 : vector<32x64xf32>
    %cst_29 = arith.constant dense<0.000000e+00> : vector<32x64xf32>
    %41 = tpu.matmul %3, %37, %cst_29 {dimension_numbers = #tpu.dot_dimension_numbers<[1], [0], [0], [1], [0, 0, 1, 1], [], []>} : vector<32x2xf32>, vector<2x64xf32>, vector<32x64xf32> -> vector<32x64xf32>
    %42 = arith.addf %40, %41 : vector<32x64xf32>
    %43 = vector.broadcast %4 : vector<32x1xf32> to vector<32x64xf32>
    %44 = arith.addf %42, %43 : vector<32x64xf32>
    %cst_30 = arith.constant 0.000000e+00 : f32
    %45 = vector.broadcast %cst_30 : f32 to vector<32x64xf32>
    %46 = arith.maximumf %44, %45 : vector<32x64xf32>
    %cst_31 = arith.constant dense<0.000000e+00> : vector<32x64xf32>
    %47 = tpu.matmul %5, %46, %cst_31 {dimension_numbers = #tpu.dot_dimension_numbers<[1], [0], [0], [1], [0, 0, 1, 1], [], []>} : vector<32x32xf32>, vector<32x64xf32>, vector<32x64xf32> -> vector<32x64xf32>
    %48 = vector.broadcast %6 : vector<32x1xf32> to vector<32x64xf32>
    %49 = arith.addf %47, %48 : vector<32x64xf32>
    %cst_32 = arith.constant 0.000000e+00 : f32
    %50 = vector.broadcast %cst_32 : f32 to vector<32x64xf32>
    %51 = arith.maximumf %49, %50 : vector<32x64xf32>
    %52 = tpu.iota {dimensions = array<i32: 1>} : vector<32x64xi32>
    %c32_i32_33 = arith.constant 32 : i32
    %c0_i32_34 = arith.constant 0 : i32
    %53 = arith.cmpi eq, %c32_i32_33, %c0_i32_34 : i32
    %c1_i32_35 = arith.constant 1 : i32
    %54 = arith.select %53, %c1_i32_35, %c32_i32_33 : i32
    %55 = vector.broadcast %54 : i32 to vector<32x64xi32>
    %56 = arith.remsi %52, %55 : vector<32x64xi32>
    %c0_i32_36 = arith.constant 0 : i32
    %57 = vector.broadcast %c0_i32_36 : i32 to vector<32x64xi32>
    %58 = arith.cmpi ne, %56, %57 : vector<32x64xi32>
    %c0_i32_37 = arith.constant 0 : i32
    %59 = vector.broadcast %c0_i32_37 : i32 to vector<32x64xi32>
    %60 = arith.cmpi slt, %56, %59 : vector<32x64xi32>
    %c0_i32_38 = arith.constant 0 : i32
    %61 = arith.cmpi slt, %54, %c0_i32_38 : i32
    %62 = vector.broadcast %61 : i1 to vector<32x64xi1>
    %63 = vector.broadcast %62 : vector<32x64xi1> to vector<32x64xi1>
    %64 = arith.xori %60, %63 : vector<32x64xi1>
    %65 = arith.andi %64, %58 : vector<32x64xi1>
    %66 = vector.broadcast %54 : i32 to vector<32x64xi32>
    %67 = arith.addi %56, %66 : vector<32x64xi32>
    %68 = arith.select %65, %67, %56 : vector<32x64xi1>, vector<32x64xi32>
    %c0_i32_39 = arith.constant 0 : i32
    %69 = vector.broadcast %c0_i32_39 : i32 to vector<32x64xi32>
    %70 = arith.cmpi eq, %68, %69 : vector<32x64xi32>
    %c1_i32_40 = arith.constant 1 : i32
    %71 = tpu.dynamic_rotate %51 by %c1_i32_40 dim 1 : vector<32x64xf32>, i32 -> vector<32x64xf32>
    %cst_41 = arith.constant 0.000000e+00 : f32
    %72 = vector.broadcast %cst_41 : f32 to vector<32x64xf32>
    %73 = arith.select %70, %72, %71 : vector<32x64xi1>, vector<32x64xf32>
    %c31_i32_42 = arith.constant 31 : i32
    %74 = vector.broadcast %c31_i32_42 : i32 to vector<32x64xi32>
    %75 = arith.cmpi eq, %68, %74 : vector<32x64xi32>
    %c63_i32_43 = arith.constant 63 : i32
    %76 = tpu.dynamic_rotate %51 by %c63_i32_43 dim 1 : vector<32x64xf32>, i32 -> vector<32x64xf32>
    %cst_44 = arith.constant 0.000000e+00 : f32
    %77 = vector.broadcast %cst_44 : f32 to vector<32x64xf32>
    %78 = arith.select %75, %77, %76 : vector<32x64xi1>, vector<32x64xf32>
    %cst_45 = arith.constant dense<0.000000e+00> : vector<4x64xf32>
    %79 = tpu.matmul %7, %73, %cst_45 {dimension_numbers = #tpu.dot_dimension_numbers<[1], [0], [0], [1], [0, 0, 1, 1], [], []>} : vector<4x32xf32>, vector<32x64xf32>, vector<4x64xf32> -> vector<4x64xf32>
    %cst_46 = arith.constant dense<0.000000e+00> : vector<4x64xf32>
    %80 = tpu.matmul %8, %51, %cst_46 {dimension_numbers = #tpu.dot_dimension_numbers<[1], [0], [0], [1], [0, 0, 1, 1], [], []>} : vector<4x32xf32>, vector<32x64xf32>, vector<4x64xf32> -> vector<4x64xf32>
    %81 = arith.addf %79, %80 : vector<4x64xf32>
    %cst_47 = arith.constant dense<0.000000e+00> : vector<4x64xf32>
    %82 = tpu.matmul %9, %78, %cst_47 {dimension_numbers = #tpu.dot_dimension_numbers<[1], [0], [0], [1], [0, 0, 1, 1], [], []>} : vector<4x32xf32>, vector<32x64xf32>, vector<4x64xf32> -> vector<4x64xf32>
    %83 = arith.addf %81, %82 : vector<4x64xf32>
    %84 = vector.broadcast %10 : vector<4x1xf32> to vector<4x64xf32>
    %85 = arith.addf %83, %84 : vector<4x64xf32>
    %86 = vector.extract_strided_slice %85 {offsets = [0, 0], sizes = [2, 64], strides = [1, 1]} : vector<4x64xf32> to vector<2x64xf32>
    %87 = vector.extract_strided_slice %85 {offsets = [2, 0], sizes = [2, 64], strides = [1, 1]} : vector<4x64xf32> to vector<2x64xf32>
    %cst_48 = arith.constant 2.000000e+00 : f32
    %88 = vector.broadcast %cst_48 : f32 to vector<2x64xf32>
    %89 = arith.addf %86, %88 : vector<2x64xf32>
    %90 = arith.negf %89 : vector<2x64xf32>
    %91 = math.exp %90 : vector<2x64xf32>
    %cst_49 = arith.constant 1.000000e+00 : f32
    %92 = vector.broadcast %cst_49 : f32 to vector<2x64xf32>
    %93 = arith.addf %92, %91 : vector<2x64xf32>
    %94 = arith.divf %92, %93 : vector<2x64xf32>
    %c0_50 = arith.constant 0 : index
    %c0_51 = arith.constant 0 : index
    %95 = vector.load %arg1[%c0_50, %c0_51] : memref<2x64xf32, #tpu.memory_space<vmem>>, vector<2x64xf32>
    %96 = arith.addf %95, %87 : vector<2x64xf32>
    %97 = arith.mulf %96, %94 : vector<2x64xf32>
    %c0_52 = arith.constant 0 : index
    %c0_53 = arith.constant 0 : index
    %98 = vector.load %arg12[%c0_52, %c0_53] : memref<2x64xf32, #tpu.memory_space<vmem>>, vector<2x64xf32>
    tpu.vector_store %arg12[%c0_52, %c0_53], %97 {strides = array<i32>} : memref<2x64xf32, #tpu.memory_space<vmem>>, vector<2x64xf32>,
    %99 = math.log %94 : vector<2x64xf32>
    %cst_54 = arith.constant dense<0.000000e+00> : vector<64xf32>
    %100 = vector.multi_reduction <add>, %99, %cst_54 [0] : vector<2x64xf32> to vector<64xf32>
    %101 = vector.shape_cast %100 : vector<64xf32> to vector<1x64xf32>
    %c0_55 = arith.constant 0 : index
    %c0_56 = arith.constant 0 : index
    %102 = vector.load %arg13[%c0_55, %c0_56] : memref<1x64xf32, #tpu.memory_space<vmem>>, vector<1x64xf32>
    tpu.vector_store %arg13[%c0_55, %c0_56], %101 {strides = array<i32>} : memref<1x64xf32, #tpu.memory_space<vmem>>, vector<1x64xf32>,
    return
  }
}

module attributes {stable_mosaic.version = 11 : i64} {
  func.func @_flow_step_kernel(%arg0: memref<2x64xf32, #tpu.memory_space<vmem>>, %arg1: memref<2x64xf32, #tpu.memory_space<vmem>>, %arg2: memref<2x64xf32, #tpu.memory_space<vmem>>, %arg3: memref<2x64xf32, #tpu.memory_space<vmem>>, %arg4: memref<2x64xf32, #tpu.memory_space<vmem>>, %arg5: memref<2x64xf32, #tpu.memory_space<vmem>>, %arg6: memref<2x2xf32, #tpu.memory_space<vmem>>, %arg7: memref<2x2xf32, #tpu.memory_space<vmem>>, %arg8: memref<2x2xf32, #tpu.memory_space<vmem>>, %arg9: memref<2x2xf32, #tpu.memory_space<vmem>>, %arg10: memref<32x2xf32, #tpu.memory_space<vmem>>, %arg11: memref<32x2xf32, #tpu.memory_space<vmem>>, %arg12: memref<32x2xf32, #tpu.memory_space<vmem>>, %arg13: memref<32x1xf32, #tpu.memory_space<vmem>>, %arg14: memref<32x32xf32, #tpu.memory_space<vmem>>, %arg15: memref<32x1xf32, #tpu.memory_space<vmem>>, %arg16: memref<4x32xf32, #tpu.memory_space<vmem>>, %arg17: memref<4x32xf32, #tpu.memory_space<vmem>>, %arg18: memref<4x32xf32, #tpu.memory_space<vmem>>, %arg19: memref<4x1xf32, #tpu.memory_space<vmem>>, %arg20: memref<2x64xf32, #tpu.memory_space<vmem>>, %arg21: memref<2x64xf32, #tpu.memory_space<vmem>>, %arg22: memref<1x64xf32, #tpu.memory_space<vmem>>) attributes {dimension_semantics = [], scalar_prefetch = 0 : i64, scratch_operands = 0 : i64, tpu.core_type = #tpu.core_type<tc>} {
    %c0 = arith.constant 0 : index
    %c0_0 = arith.constant 0 : index
    %0 = vector.load %arg2[%c0, %c0_0] : memref<2x64xf32, #tpu.memory_space<vmem>>, vector<2x64xf32>
    %c0_1 = arith.constant 0 : index
    %c0_2 = arith.constant 0 : index
    %1 = vector.load %arg0[%c0_1, %c0_2] : memref<2x64xf32, #tpu.memory_space<vmem>>, vector<2x64xf32>
    %c0_3 = arith.constant 0 : index
    %c0_4 = arith.constant 0 : index
    %2 = vector.load %arg3[%c0_3, %c0_4] : memref<2x64xf32, #tpu.memory_space<vmem>>, vector<2x64xf32>
    %3 = arith.addf %1, %2 : vector<2x64xf32>
    %4 = arith.mulf %0, %3 : vector<2x64xf32>
    %c0_5 = arith.constant 0 : index
    %c0_6 = arith.constant 0 : index
    %5 = vector.load %arg4[%c0_5, %c0_6] : memref<2x64xf32, #tpu.memory_space<vmem>>, vector<2x64xf32>
    %c0_7 = arith.constant 0 : index
    %c0_8 = arith.constant 0 : index
    %6 = vector.load %arg1[%c0_7, %c0_8] : memref<2x64xf32, #tpu.memory_space<vmem>>, vector<2x64xf32>
    %c0_9 = arith.constant 0 : index
    %c0_10 = arith.constant 0 : index
    %7 = vector.load %arg5[%c0_9, %c0_10] : memref<2x64xf32, #tpu.memory_space<vmem>>, vector<2x64xf32>
    %8 = arith.addf %6, %7 : vector<2x64xf32>
    %9 = arith.mulf %5, %8 : vector<2x64xf32>
    %c0_11 = arith.constant 0 : index
    %c0_12 = arith.constant 0 : index
    %10 = vector.load %arg6[%c0_11, %c0_12] : memref<2x2xf32, #tpu.memory_space<vmem>>, vector<2x2xf32>
    %cst = arith.constant dense<0.000000e+00> : vector<2x64xf32>
    %11 = tpu.matmul %10, %4, %cst {dimension_numbers = #tpu.dot_dimension_numbers<[1], [0], [0], [1], [0, 0, 1, 1], [], []>} : vector<2x2xf32>, vector<2x64xf32>, vector<2x64xf32> -> vector<2x64xf32>
    %c0_13 = arith.constant 0 : index
    %c0_14 = arith.constant 0 : index
    %12 = vector.load %arg7[%c0_13, %c0_14] : memref<2x2xf32, #tpu.memory_space<vmem>>, vector<2x2xf32>
    %cst_15 = arith.constant dense<0.000000e+00> : vector<2x64xf32>
    %13 = tpu.matmul %12, %9, %cst_15 {dimension_numbers = #tpu.dot_dimension_numbers<[1], [0], [0], [1], [0, 0, 1, 1], [], []>} : vector<2x2xf32>, vector<2x64xf32>, vector<2x64xf32> -> vector<2x64xf32>
    %14 = arith.addf %11, %13 : vector<2x64xf32>
    %c0_16 = arith.constant 0 : index
    %c0_17 = arith.constant 0 : index
    %15 = vector.load %arg8[%c0_16, %c0_17] : memref<2x2xf32, #tpu.memory_space<vmem>>, vector<2x2xf32>
    %cst_18 = arith.constant dense<0.000000e+00> : vector<2x64xf32>
    %16 = tpu.matmul %15, %4, %cst_18 {dimension_numbers = #tpu.dot_dimension_numbers<[1], [0], [0], [1], [0, 0, 1, 1], [], []>} : vector<2x2xf32>, vector<2x64xf32>, vector<2x64xf32> -> vector<2x64xf32>
    %c0_19 = arith.constant 0 : index
    %c0_20 = arith.constant 0 : index
    %17 = vector.load %arg9[%c0_19, %c0_20] : memref<2x2xf32, #tpu.memory_space<vmem>>, vector<2x2xf32>
    %cst_21 = arith.constant dense<0.000000e+00> : vector<2x64xf32>
    %18 = tpu.matmul %17, %9, %cst_21 {dimension_numbers = #tpu.dot_dimension_numbers<[1], [0], [0], [1], [0, 0, 1, 1], [], []>} : vector<2x2xf32>, vector<2x64xf32>, vector<2x64xf32> -> vector<2x64xf32>
    %19 = arith.addf %16, %18 : vector<2x64xf32>
    %c0_22 = arith.constant 0 : index
    %c0_23 = arith.constant 0 : index
    %20 = vector.load %arg10[%c0_22, %c0_23] : memref<32x2xf32, #tpu.memory_space<vmem>>, vector<32x2xf32>
    %c0_24 = arith.constant 0 : index
    %c0_25 = arith.constant 0 : index
    %21 = vector.load %arg11[%c0_24, %c0_25] : memref<32x2xf32, #tpu.memory_space<vmem>>, vector<32x2xf32>
    %c0_26 = arith.constant 0 : index
    %c0_27 = arith.constant 0 : index
    %22 = vector.load %arg12[%c0_26, %c0_27] : memref<32x2xf32, #tpu.memory_space<vmem>>, vector<32x2xf32>
    %c0_28 = arith.constant 0 : index
    %c0_29 = arith.constant 0 : index
    %23 = vector.load %arg13[%c0_28, %c0_29] : memref<32x1xf32, #tpu.memory_space<vmem>>, vector<32x1xf32>
    %c0_30 = arith.constant 0 : index
    %c0_31 = arith.constant 0 : index
    %24 = vector.load %arg14[%c0_30, %c0_31] : memref<32x32xf32, #tpu.memory_space<vmem>>, vector<32x32xf32>
    %c0_32 = arith.constant 0 : index
    %c0_33 = arith.constant 0 : index
    %25 = vector.load %arg15[%c0_32, %c0_33] : memref<32x1xf32, #tpu.memory_space<vmem>>, vector<32x1xf32>
    %c0_34 = arith.constant 0 : index
    %c0_35 = arith.constant 0 : index
    %26 = vector.load %arg16[%c0_34, %c0_35] : memref<4x32xf32, #tpu.memory_space<vmem>>, vector<4x32xf32>
    %c0_36 = arith.constant 0 : index
    %c0_37 = arith.constant 0 : index
    %27 = vector.load %arg17[%c0_36, %c0_37] : memref<4x32xf32, #tpu.memory_space<vmem>>, vector<4x32xf32>
    %c0_38 = arith.constant 0 : index
    %c0_39 = arith.constant 0 : index
    %28 = vector.load %arg18[%c0_38, %c0_39] : memref<4x32xf32, #tpu.memory_space<vmem>>, vector<4x32xf32>
    %c0_40 = arith.constant 0 : index
    %c0_41 = arith.constant 0 : index
    %29 = vector.load %arg19[%c0_40, %c0_41] : memref<4x1xf32, #tpu.memory_space<vmem>>, vector<4x1xf32>
    %30 = tpu.iota {dimensions = array<i32: 1>} : vector<2x64xi32>
    %c32_i32 = arith.constant 32 : i32
    %c0_i32 = arith.constant 0 : i32
    %31 = arith.cmpi eq, %c32_i32, %c0_i32 : i32
    %c1_i32 = arith.constant 1 : i32
    %32 = arith.select %31, %c1_i32, %c32_i32 : i32
    %33 = vector.broadcast %32 : i32 to vector<2x64xi32>
    %34 = arith.remsi %30, %33 : vector<2x64xi32>
    %c0_i32_42 = arith.constant 0 : i32
    %35 = vector.broadcast %c0_i32_42 : i32 to vector<2x64xi32>
    %36 = arith.cmpi ne, %34, %35 : vector<2x64xi32>
    %c0_i32_43 = arith.constant 0 : i32
    %37 = vector.broadcast %c0_i32_43 : i32 to vector<2x64xi32>
    %38 = arith.cmpi slt, %34, %37 : vector<2x64xi32>
    %c0_i32_44 = arith.constant 0 : i32
    %39 = arith.cmpi slt, %32, %c0_i32_44 : i32
    %40 = vector.broadcast %39 : i1 to vector<2x64xi1>
    %41 = vector.broadcast %40 : vector<2x64xi1> to vector<2x64xi1>
    %42 = arith.xori %38, %41 : vector<2x64xi1>
    %43 = arith.andi %42, %36 : vector<2x64xi1>
    %44 = vector.broadcast %32 : i32 to vector<2x64xi32>
    %45 = arith.addi %34, %44 : vector<2x64xi32>
    %46 = arith.select %43, %45, %34 : vector<2x64xi1>, vector<2x64xi32>
    %c0_i32_45 = arith.constant 0 : i32
    %47 = vector.broadcast %c0_i32_45 : i32 to vector<2x64xi32>
    %48 = arith.cmpi eq, %46, %47 : vector<2x64xi32>
    %c1_i32_46 = arith.constant 1 : i32
    %49 = tpu.dynamic_rotate %14 by %c1_i32_46 dim 1 : vector<2x64xf32>, i32 -> vector<2x64xf32>
    %cst_47 = arith.constant 0.000000e+00 : f32
    %50 = vector.broadcast %cst_47 : f32 to vector<2x64xf32>
    %51 = arith.select %48, %50, %49 : vector<2x64xi1>, vector<2x64xf32>
    %c31_i32 = arith.constant 31 : i32
    %52 = vector.broadcast %c31_i32 : i32 to vector<2x64xi32>
    %53 = arith.cmpi eq, %46, %52 : vector<2x64xi32>
    %c63_i32 = arith.constant 63 : i32
    %54 = tpu.dynamic_rotate %14 by %c63_i32 dim 1 : vector<2x64xf32>, i32 -> vector<2x64xf32>
    %cst_48 = arith.constant 0.000000e+00 : f32
    %55 = vector.broadcast %cst_48 : f32 to vector<2x64xf32>
    %56 = arith.select %53, %55, %54 : vector<2x64xi1>, vector<2x64xf32>
    %cst_49 = arith.constant dense<0.000000e+00> : vector<32x64xf32>
    %57 = tpu.matmul %20, %51, %cst_49 {dimension_numbers = #tpu.dot_dimension_numbers<[1], [0], [0], [1], [0, 0, 1, 1], [], []>} : vector<32x2xf32>, vector<2x64xf32>, vector<32x64xf32> -> vector<32x64xf32>
    %cst_50 = arith.constant dense<0.000000e+00> : vector<32x64xf32>
    %58 = tpu.matmul %21, %14, %cst_50 {dimension_numbers = #tpu.dot_dimension_numbers<[1], [0], [0], [1], [0, 0, 1, 1], [], []>} : vector<32x2xf32>, vector<2x64xf32>, vector<32x64xf32> -> vector<32x64xf32>
    %59 = arith.addf %57, %58 : vector<32x64xf32>
    %cst_51 = arith.constant dense<0.000000e+00> : vector<32x64xf32>
    %60 = tpu.matmul %22, %56, %cst_51 {dimension_numbers = #tpu.dot_dimension_numbers<[1], [0], [0], [1], [0, 0, 1, 1], [], []>} : vector<32x2xf32>, vector<2x64xf32>, vector<32x64xf32> -> vector<32x64xf32>
    %61 = arith.addf %59, %60 : vector<32x64xf32>
    %62 = vector.broadcast %23 : vector<32x1xf32> to vector<32x64xf32>
    %63 = arith.addf %61, %62 : vector<32x64xf32>
    %cst_52 = arith.constant 0.000000e+00 : f32
    %64 = vector.broadcast %cst_52 : f32 to vector<32x64xf32>
    %65 = arith.maximumf %63, %64 : vector<32x64xf32>
    %cst_53 = arith.constant dense<0.000000e+00> : vector<32x64xf32>
    %66 = tpu.matmul %24, %65, %cst_53 {dimension_numbers = #tpu.dot_dimension_numbers<[1], [0], [0], [1], [0, 0, 1, 1], [], []>} : vector<32x32xf32>, vector<32x64xf32>, vector<32x64xf32> -> vector<32x64xf32>
    %67 = vector.broadcast %25 : vector<32x1xf32> to vector<32x64xf32>
    %68 = arith.addf %66, %67 : vector<32x64xf32>
    %cst_54 = arith.constant 0.000000e+00 : f32
    %69 = vector.broadcast %cst_54 : f32 to vector<32x64xf32>
    %70 = arith.maximumf %68, %69 : vector<32x64xf32>
    %71 = tpu.iota {dimensions = array<i32: 1>} : vector<32x64xi32>
    %c32_i32_55 = arith.constant 32 : i32
    %c0_i32_56 = arith.constant 0 : i32
    %72 = arith.cmpi eq, %c32_i32_55, %c0_i32_56 : i32
    %c1_i32_57 = arith.constant 1 : i32
    %73 = arith.select %72, %c1_i32_57, %c32_i32_55 : i32
    %74 = vector.broadcast %73 : i32 to vector<32x64xi32>
    %75 = arith.remsi %71, %74 : vector<32x64xi32>
    %c0_i32_58 = arith.constant 0 : i32
    %76 = vector.broadcast %c0_i32_58 : i32 to vector<32x64xi32>
    %77 = arith.cmpi ne, %75, %76 : vector<32x64xi32>
    %c0_i32_59 = arith.constant 0 : i32
    %78 = vector.broadcast %c0_i32_59 : i32 to vector<32x64xi32>
    %79 = arith.cmpi slt, %75, %78 : vector<32x64xi32>
    %c0_i32_60 = arith.constant 0 : i32
    %80 = arith.cmpi slt, %73, %c0_i32_60 : i32
    %81 = vector.broadcast %80 : i1 to vector<32x64xi1>
    %82 = vector.broadcast %81 : vector<32x64xi1> to vector<32x64xi1>
    %83 = arith.xori %79, %82 : vector<32x64xi1>
    %84 = arith.andi %83, %77 : vector<32x64xi1>
    %85 = vector.broadcast %73 : i32 to vector<32x64xi32>
    %86 = arith.addi %75, %85 : vector<32x64xi32>
    %87 = arith.select %84, %86, %75 : vector<32x64xi1>, vector<32x64xi32>
    %c0_i32_61 = arith.constant 0 : i32
    %88 = vector.broadcast %c0_i32_61 : i32 to vector<32x64xi32>
    %89 = arith.cmpi eq, %87, %88 : vector<32x64xi32>
    %c1_i32_62 = arith.constant 1 : i32
    %90 = tpu.dynamic_rotate %70 by %c1_i32_62 dim 1 : vector<32x64xf32>, i32 -> vector<32x64xf32>
    %cst_63 = arith.constant 0.000000e+00 : f32
    %91 = vector.broadcast %cst_63 : f32 to vector<32x64xf32>
    %92 = arith.select %89, %91, %90 : vector<32x64xi1>, vector<32x64xf32>
    %c31_i32_64 = arith.constant 31 : i32
    %93 = vector.broadcast %c31_i32_64 : i32 to vector<32x64xi32>
    %94 = arith.cmpi eq, %87, %93 : vector<32x64xi32>
    %c63_i32_65 = arith.constant 63 : i32
    %95 = tpu.dynamic_rotate %70 by %c63_i32_65 dim 1 : vector<32x64xf32>, i32 -> vector<32x64xf32>
    %cst_66 = arith.constant 0.000000e+00 : f32
    %96 = vector.broadcast %cst_66 : f32 to vector<32x64xf32>
    %97 = arith.select %94, %96, %95 : vector<32x64xi1>, vector<32x64xf32>
    %cst_67 = arith.constant dense<0.000000e+00> : vector<4x64xf32>
    %98 = tpu.matmul %26, %92, %cst_67 {dimension_numbers = #tpu.dot_dimension_numbers<[1], [0], [0], [1], [0, 0, 1, 1], [], []>} : vector<4x32xf32>, vector<32x64xf32>, vector<4x64xf32> -> vector<4x64xf32>
    %cst_68 = arith.constant dense<0.000000e+00> : vector<4x64xf32>
    %99 = tpu.matmul %27, %70, %cst_68 {dimension_numbers = #tpu.dot_dimension_numbers<[1], [0], [0], [1], [0, 0, 1, 1], [], []>} : vector<4x32xf32>, vector<32x64xf32>, vector<4x64xf32> -> vector<4x64xf32>
    %100 = arith.addf %98, %99 : vector<4x64xf32>
    %cst_69 = arith.constant dense<0.000000e+00> : vector<4x64xf32>
    %101 = tpu.matmul %28, %97, %cst_69 {dimension_numbers = #tpu.dot_dimension_numbers<[1], [0], [0], [1], [0, 0, 1, 1], [], []>} : vector<4x32xf32>, vector<32x64xf32>, vector<4x64xf32> -> vector<4x64xf32>
    %102 = arith.addf %100, %101 : vector<4x64xf32>
    %103 = vector.broadcast %29 : vector<4x1xf32> to vector<4x64xf32>
    %104 = arith.addf %102, %103 : vector<4x64xf32>
    %105 = vector.extract_strided_slice %104 {offsets = [0, 0], sizes = [2, 64], strides = [1, 1]} : vector<4x64xf32> to vector<2x64xf32>
    %106 = vector.extract_strided_slice %104 {offsets = [2, 0], sizes = [2, 64], strides = [1, 1]} : vector<4x64xf32> to vector<2x64xf32>
    %cst_70 = arith.constant 2.000000e+00 : f32
    %107 = vector.broadcast %cst_70 : f32 to vector<2x64xf32>
    %108 = arith.addf %105, %107 : vector<2x64xf32>
    %109 = arith.negf %108 : vector<2x64xf32>
    %110 = math.exp %109 : vector<2x64xf32>
    %cst_71 = arith.constant 1.000000e+00 : f32
    %111 = vector.broadcast %cst_71 : f32 to vector<2x64xf32>
    %112 = arith.addf %111, %110 : vector<2x64xf32>
    %113 = arith.divf %111, %112 : vector<2x64xf32>
    %114 = arith.addf %19, %106 : vector<2x64xf32>
    %115 = arith.mulf %114, %113 : vector<2x64xf32>
    %c0_72 = arith.constant 0 : index
    %c0_73 = arith.constant 0 : index
    %116 = vector.load %arg20[%c0_72, %c0_73] : memref<2x64xf32, #tpu.memory_space<vmem>>, vector<2x64xf32>
    tpu.vector_store %arg20[%c0_72, %c0_73], %14 {strides = array<i32>} : memref<2x64xf32, #tpu.memory_space<vmem>>, vector<2x64xf32>,
    %c0_74 = arith.constant 0 : index
    %c0_75 = arith.constant 0 : index
    %117 = vector.load %arg21[%c0_74, %c0_75] : memref<2x64xf32, #tpu.memory_space<vmem>>, vector<2x64xf32>
    tpu.vector_store %arg21[%c0_74, %c0_75], %115 {strides = array<i32>} : memref<2x64xf32, #tpu.memory_space<vmem>>, vector<2x64xf32>,
    %118 = math.log %113 : vector<2x64xf32>
    %cst_76 = arith.constant dense<0.000000e+00> : vector<64xf32>
    %119 = vector.multi_reduction <add>, %118, %cst_76 [0] : vector<2x64xf32> to vector<64xf32>
    %120 = vector.shape_cast %119 : vector<64xf32> to vector<1x64xf32>
    %c0_77 = arith.constant 0 : index
    %c0_78 = arith.constant 0 : index
    %121 = vector.load %arg22[%c0_77, %c0_78] : memref<1x64xf32, #tpu.memory_space<vmem>>, vector<1x64xf32>
    tpu.vector_store %arg22[%c0_77, %c0_78], %120 {strides = array<i32>} : memref<1x64xf32, #tpu.memory_space<vmem>>, vector<1x64xf32>,
    return
  }
}

module attributes {stable_mosaic.version = 11 : i64} {
  func.func @_flow_step_kernel(%arg0: memref<2x64xf32, #tpu.memory_space<vmem>>, %arg1: memref<2x64xf32, #tpu.memory_space<vmem>>, %arg2: memref<2x64xf32, #tpu.memory_space<vmem>>, %arg3: memref<2x64xf32, #tpu.memory_space<vmem>>, %arg4: memref<2x64xf32, #tpu.memory_space<vmem>>, %arg5: memref<2x64xf32, #tpu.memory_space<vmem>>, %arg6: memref<2x2xf32, #tpu.memory_space<vmem>>, %arg7: memref<2x2xf32, #tpu.memory_space<vmem>>, %arg8: memref<2x2xf32, #tpu.memory_space<vmem>>, %arg9: memref<2x2xf32, #tpu.memory_space<vmem>>, %arg10: memref<32x2xf32, #tpu.memory_space<vmem>>, %arg11: memref<32x2xf32, #tpu.memory_space<vmem>>, %arg12: memref<32x2xf32, #tpu.memory_space<vmem>>, %arg13: memref<32x1xf32, #tpu.memory_space<vmem>>, %arg14: memref<32x32xf32, #tpu.memory_space<vmem>>, %arg15: memref<32x1xf32, #tpu.memory_space<vmem>>, %arg16: memref<4x32xf32, #tpu.memory_space<vmem>>, %arg17: memref<4x32xf32, #tpu.memory_space<vmem>>, %arg18: memref<4x32xf32, #tpu.memory_space<vmem>>, %arg19: memref<4x1xf32, #tpu.memory_space<vmem>>, %arg20: memref<2x64xf32, #tpu.memory_space<vmem>>, %arg21: memref<2x64xf32, #tpu.memory_space<vmem>>, %arg22: memref<1x64xf32, #tpu.memory_space<vmem>>) attributes {dimension_semantics = [], scalar_prefetch = 0 : i64, scratch_operands = 0 : i64, tpu.core_type = #tpu.core_type<tc>} {
    %c0 = arith.constant 0 : index
    %c0_0 = arith.constant 0 : index
    %0 = vector.load %arg2[%c0, %c0_0] : memref<2x64xf32, #tpu.memory_space<vmem>>, vector<2x64xf32>
    %c0_1 = arith.constant 0 : index
    %c0_2 = arith.constant 0 : index
    %1 = vector.load %arg0[%c0_1, %c0_2] : memref<2x64xf32, #tpu.memory_space<vmem>>, vector<2x64xf32>
    %c0_3 = arith.constant 0 : index
    %c0_4 = arith.constant 0 : index
    %2 = vector.load %arg3[%c0_3, %c0_4] : memref<2x64xf32, #tpu.memory_space<vmem>>, vector<2x64xf32>
    %3 = arith.addf %1, %2 : vector<2x64xf32>
    %4 = arith.mulf %0, %3 : vector<2x64xf32>
    %c0_5 = arith.constant 0 : index
    %c0_6 = arith.constant 0 : index
    %5 = vector.load %arg4[%c0_5, %c0_6] : memref<2x64xf32, #tpu.memory_space<vmem>>, vector<2x64xf32>
    %c0_7 = arith.constant 0 : index
    %c0_8 = arith.constant 0 : index
    %6 = vector.load %arg1[%c0_7, %c0_8] : memref<2x64xf32, #tpu.memory_space<vmem>>, vector<2x64xf32>
    %c0_9 = arith.constant 0 : index
    %c0_10 = arith.constant 0 : index
    %7 = vector.load %arg5[%c0_9, %c0_10] : memref<2x64xf32, #tpu.memory_space<vmem>>, vector<2x64xf32>
    %8 = arith.addf %6, %7 : vector<2x64xf32>
    %9 = arith.mulf %5, %8 : vector<2x64xf32>
    %c0_11 = arith.constant 0 : index
    %c0_12 = arith.constant 0 : index
    %10 = vector.load %arg6[%c0_11, %c0_12] : memref<2x2xf32, #tpu.memory_space<vmem>>, vector<2x2xf32>
    %cst = arith.constant dense<0.000000e+00> : vector<2x64xf32>
    %11 = tpu.matmul %10, %4, %cst {dimension_numbers = #tpu.dot_dimension_numbers<[1], [0], [0], [1], [0, 0, 1, 1], [], []>} : vector<2x2xf32>, vector<2x64xf32>, vector<2x64xf32> -> vector<2x64xf32>
    %c0_13 = arith.constant 0 : index
    %c0_14 = arith.constant 0 : index
    %12 = vector.load %arg7[%c0_13, %c0_14] : memref<2x2xf32, #tpu.memory_space<vmem>>, vector<2x2xf32>
    %cst_15 = arith.constant dense<0.000000e+00> : vector<2x64xf32>
    %13 = tpu.matmul %12, %9, %cst_15 {dimension_numbers = #tpu.dot_dimension_numbers<[1], [0], [0], [1], [0, 0, 1, 1], [], []>} : vector<2x2xf32>, vector<2x64xf32>, vector<2x64xf32> -> vector<2x64xf32>
    %14 = arith.addf %11, %13 : vector<2x64xf32>
    %c0_16 = arith.constant 0 : index
    %c0_17 = arith.constant 0 : index
    %15 = vector.load %arg8[%c0_16, %c0_17] : memref<2x2xf32, #tpu.memory_space<vmem>>, vector<2x2xf32>
    %cst_18 = arith.constant dense<0.000000e+00> : vector<2x64xf32>
    %16 = tpu.matmul %15, %4, %cst_18 {dimension_numbers = #tpu.dot_dimension_numbers<[1], [0], [0], [1], [0, 0, 1, 1], [], []>} : vector<2x2xf32>, vector<2x64xf32>, vector<2x64xf32> -> vector<2x64xf32>
    %c0_19 = arith.constant 0 : index
    %c0_20 = arith.constant 0 : index
    %17 = vector.load %arg9[%c0_19, %c0_20] : memref<2x2xf32, #tpu.memory_space<vmem>>, vector<2x2xf32>
    %cst_21 = arith.constant dense<0.000000e+00> : vector<2x64xf32>
    %18 = tpu.matmul %17, %9, %cst_21 {dimension_numbers = #tpu.dot_dimension_numbers<[1], [0], [0], [1], [0, 0, 1, 1], [], []>} : vector<2x2xf32>, vector<2x64xf32>, vector<2x64xf32> -> vector<2x64xf32>
    %19 = arith.addf %16, %18 : vector<2x64xf32>
    %c0_22 = arith.constant 0 : index
    %c0_23 = arith.constant 0 : index
    %20 = vector.load %arg10[%c0_22, %c0_23] : memref<32x2xf32, #tpu.memory_space<vmem>>, vector<32x2xf32>
    %c0_24 = arith.constant 0 : index
    %c0_25 = arith.constant 0 : index
    %21 = vector.load %arg11[%c0_24, %c0_25] : memref<32x2xf32, #tpu.memory_space<vmem>>, vector<32x2xf32>
    %c0_26 = arith.constant 0 : index
    %c0_27 = arith.constant 0 : index
    %22 = vector.load %arg12[%c0_26, %c0_27] : memref<32x2xf32, #tpu.memory_space<vmem>>, vector<32x2xf32>
    %c0_28 = arith.constant 0 : index
    %c0_29 = arith.constant 0 : index
    %23 = vector.load %arg13[%c0_28, %c0_29] : memref<32x1xf32, #tpu.memory_space<vmem>>, vector<32x1xf32>
    %c0_30 = arith.constant 0 : index
    %c0_31 = arith.constant 0 : index
    %24 = vector.load %arg14[%c0_30, %c0_31] : memref<32x32xf32, #tpu.memory_space<vmem>>, vector<32x32xf32>
    %c0_32 = arith.constant 0 : index
    %c0_33 = arith.constant 0 : index
    %25 = vector.load %arg15[%c0_32, %c0_33] : memref<32x1xf32, #tpu.memory_space<vmem>>, vector<32x1xf32>
    %c0_34 = arith.constant 0 : index
    %c0_35 = arith.constant 0 : index
    %26 = vector.load %arg16[%c0_34, %c0_35] : memref<4x32xf32, #tpu.memory_space<vmem>>, vector<4x32xf32>
    %c0_36 = arith.constant 0 : index
    %c0_37 = arith.constant 0 : index
    %27 = vector.load %arg17[%c0_36, %c0_37] : memref<4x32xf32, #tpu.memory_space<vmem>>, vector<4x32xf32>
    %c0_38 = arith.constant 0 : index
    %c0_39 = arith.constant 0 : index
    %28 = vector.load %arg18[%c0_38, %c0_39] : memref<4x32xf32, #tpu.memory_space<vmem>>, vector<4x32xf32>
    %c0_40 = arith.constant 0 : index
    %c0_41 = arith.constant 0 : index
    %29 = vector.load %arg19[%c0_40, %c0_41] : memref<4x1xf32, #tpu.memory_space<vmem>>, vector<4x1xf32>
    %30 = tpu.iota {dimensions = array<i32: 1>} : vector<2x64xi32>
    %c32_i32 = arith.constant 32 : i32
    %c0_i32 = arith.constant 0 : i32
    %31 = arith.cmpi eq, %c32_i32, %c0_i32 : i32
    %c1_i32 = arith.constant 1 : i32
    %32 = arith.select %31, %c1_i32, %c32_i32 : i32
    %33 = vector.broadcast %32 : i32 to vector<2x64xi32>
    %34 = arith.remsi %30, %33 : vector<2x64xi32>
    %c0_i32_42 = arith.constant 0 : i32
    %35 = vector.broadcast %c0_i32_42 : i32 to vector<2x64xi32>
    %36 = arith.cmpi ne, %34, %35 : vector<2x64xi32>
    %c0_i32_43 = arith.constant 0 : i32
    %37 = vector.broadcast %c0_i32_43 : i32 to vector<2x64xi32>
    %38 = arith.cmpi slt, %34, %37 : vector<2x64xi32>
    %c0_i32_44 = arith.constant 0 : i32
    %39 = arith.cmpi slt, %32, %c0_i32_44 : i32
    %40 = vector.broadcast %39 : i1 to vector<2x64xi1>
    %41 = vector.broadcast %40 : vector<2x64xi1> to vector<2x64xi1>
    %42 = arith.xori %38, %41 : vector<2x64xi1>
    %43 = arith.andi %42, %36 : vector<2x64xi1>
    %44 = vector.broadcast %32 : i32 to vector<2x64xi32>
    %45 = arith.addi %34, %44 : vector<2x64xi32>
    %46 = arith.select %43, %45, %34 : vector<2x64xi1>, vector<2x64xi32>
    %c0_i32_45 = arith.constant 0 : i32
    %47 = vector.broadcast %c0_i32_45 : i32 to vector<2x64xi32>
    %48 = arith.cmpi eq, %46, %47 : vector<2x64xi32>
    %c1_i32_46 = arith.constant 1 : i32
    %49 = tpu.dynamic_rotate %19 by %c1_i32_46 dim 1 : vector<2x64xf32>, i32 -> vector<2x64xf32>
    %cst_47 = arith.constant 0.000000e+00 : f32
    %50 = vector.broadcast %cst_47 : f32 to vector<2x64xf32>
    %51 = arith.select %48, %50, %49 : vector<2x64xi1>, vector<2x64xf32>
    %c31_i32 = arith.constant 31 : i32
    %52 = vector.broadcast %c31_i32 : i32 to vector<2x64xi32>
    %53 = arith.cmpi eq, %46, %52 : vector<2x64xi32>
    %c63_i32 = arith.constant 63 : i32
    %54 = tpu.dynamic_rotate %19 by %c63_i32 dim 1 : vector<2x64xf32>, i32 -> vector<2x64xf32>
    %cst_48 = arith.constant 0.000000e+00 : f32
    %55 = vector.broadcast %cst_48 : f32 to vector<2x64xf32>
    %56 = arith.select %53, %55, %54 : vector<2x64xi1>, vector<2x64xf32>
    %cst_49 = arith.constant dense<0.000000e+00> : vector<32x64xf32>
    %57 = tpu.matmul %20, %51, %cst_49 {dimension_numbers = #tpu.dot_dimension_numbers<[1], [0], [0], [1], [0, 0, 1, 1], [], []>} : vector<32x2xf32>, vector<2x64xf32>, vector<32x64xf32> -> vector<32x64xf32>
    %cst_50 = arith.constant dense<0.000000e+00> : vector<32x64xf32>
    %58 = tpu.matmul %21, %19, %cst_50 {dimension_numbers = #tpu.dot_dimension_numbers<[1], [0], [0], [1], [0, 0, 1, 1], [], []>} : vector<32x2xf32>, vector<2x64xf32>, vector<32x64xf32> -> vector<32x64xf32>
    %59 = arith.addf %57, %58 : vector<32x64xf32>
    %cst_51 = arith.constant dense<0.000000e+00> : vector<32x64xf32>
    %60 = tpu.matmul %22, %56, %cst_51 {dimension_numbers = #tpu.dot_dimension_numbers<[1], [0], [0], [1], [0, 0, 1, 1], [], []>} : vector<32x2xf32>, vector<2x64xf32>, vector<32x64xf32> -> vector<32x64xf32>
    %61 = arith.addf %59, %60 : vector<32x64xf32>
    %62 = vector.broadcast %23 : vector<32x1xf32> to vector<32x64xf32>
    %63 = arith.addf %61, %62 : vector<32x64xf32>
    %cst_52 = arith.constant 0.000000e+00 : f32
    %64 = vector.broadcast %cst_52 : f32 to vector<32x64xf32>
    %65 = arith.maximumf %63, %64 : vector<32x64xf32>
    %cst_53 = arith.constant dense<0.000000e+00> : vector<32x64xf32>
    %66 = tpu.matmul %24, %65, %cst_53 {dimension_numbers = #tpu.dot_dimension_numbers<[1], [0], [0], [1], [0, 0, 1, 1], [], []>} : vector<32x32xf32>, vector<32x64xf32>, vector<32x64xf32> -> vector<32x64xf32>
    %67 = vector.broadcast %25 : vector<32x1xf32> to vector<32x64xf32>
    %68 = arith.addf %66, %67 : vector<32x64xf32>
    %cst_54 = arith.constant 0.000000e+00 : f32
    %69 = vector.broadcast %cst_54 : f32 to vector<32x64xf32>
    %70 = arith.maximumf %68, %69 : vector<32x64xf32>
    %71 = tpu.iota {dimensions = array<i32: 1>} : vector<32x64xi32>
    %c32_i32_55 = arith.constant 32 : i32
    %c0_i32_56 = arith.constant 0 : i32
    %72 = arith.cmpi eq, %c32_i32_55, %c0_i32_56 : i32
    %c1_i32_57 = arith.constant 1 : i32
    %73 = arith.select %72, %c1_i32_57, %c32_i32_55 : i32
    %74 = vector.broadcast %73 : i32 to vector<32x64xi32>
    %75 = arith.remsi %71, %74 : vector<32x64xi32>
    %c0_i32_58 = arith.constant 0 : i32
    %76 = vector.broadcast %c0_i32_58 : i32 to vector<32x64xi32>
    %77 = arith.cmpi ne, %75, %76 : vector<32x64xi32>
    %c0_i32_59 = arith.constant 0 : i32
    %78 = vector.broadcast %c0_i32_59 : i32 to vector<32x64xi32>
    %79 = arith.cmpi slt, %75, %78 : vector<32x64xi32>
    %c0_i32_60 = arith.constant 0 : i32
    %80 = arith.cmpi slt, %73, %c0_i32_60 : i32
    %81 = vector.broadcast %80 : i1 to vector<32x64xi1>
    %82 = vector.broadcast %81 : vector<32x64xi1> to vector<32x64xi1>
    %83 = arith.xori %79, %82 : vector<32x64xi1>
    %84 = arith.andi %83, %77 : vector<32x64xi1>
    %85 = vector.broadcast %73 : i32 to vector<32x64xi32>
    %86 = arith.addi %75, %85 : vector<32x64xi32>
    %87 = arith.select %84, %86, %75 : vector<32x64xi1>, vector<32x64xi32>
    %c0_i32_61 = arith.constant 0 : i32
    %88 = vector.broadcast %c0_i32_61 : i32 to vector<32x64xi32>
    %89 = arith.cmpi eq, %87, %88 : vector<32x64xi32>
    %c1_i32_62 = arith.constant 1 : i32
    %90 = tpu.dynamic_rotate %70 by %c1_i32_62 dim 1 : vector<32x64xf32>, i32 -> vector<32x64xf32>
    %cst_63 = arith.constant 0.000000e+00 : f32
    %91 = vector.broadcast %cst_63 : f32 to vector<32x64xf32>
    %92 = arith.select %89, %91, %90 : vector<32x64xi1>, vector<32x64xf32>
    %c31_i32_64 = arith.constant 31 : i32
    %93 = vector.broadcast %c31_i32_64 : i32 to vector<32x64xi32>
    %94 = arith.cmpi eq, %87, %93 : vector<32x64xi32>
    %c63_i32_65 = arith.constant 63 : i32
    %95 = tpu.dynamic_rotate %70 by %c63_i32_65 dim 1 : vector<32x64xf32>, i32 -> vector<32x64xf32>
    %cst_66 = arith.constant 0.000000e+00 : f32
    %96 = vector.broadcast %cst_66 : f32 to vector<32x64xf32>
    %97 = arith.select %94, %96, %95 : vector<32x64xi1>, vector<32x64xf32>
    %cst_67 = arith.constant dense<0.000000e+00> : vector<4x64xf32>
    %98 = tpu.matmul %26, %92, %cst_67 {dimension_numbers = #tpu.dot_dimension_numbers<[1], [0], [0], [1], [0, 0, 1, 1], [], []>} : vector<4x32xf32>, vector<32x64xf32>, vector<4x64xf32> -> vector<4x64xf32>
    %cst_68 = arith.constant dense<0.000000e+00> : vector<4x64xf32>
    %99 = tpu.matmul %27, %70, %cst_68 {dimension_numbers = #tpu.dot_dimension_numbers<[1], [0], [0], [1], [0, 0, 1, 1], [], []>} : vector<4x32xf32>, vector<32x64xf32>, vector<4x64xf32> -> vector<4x64xf32>
    %100 = arith.addf %98, %99 : vector<4x64xf32>
    %cst_69 = arith.constant dense<0.000000e+00> : vector<4x64xf32>
    %101 = tpu.matmul %28, %97, %cst_69 {dimension_numbers = #tpu.dot_dimension_numbers<[1], [0], [0], [1], [0, 0, 1, 1], [], []>} : vector<4x32xf32>, vector<32x64xf32>, vector<4x64xf32> -> vector<4x64xf32>
    %102 = arith.addf %100, %101 : vector<4x64xf32>
    %103 = vector.broadcast %29 : vector<4x1xf32> to vector<4x64xf32>
    %104 = arith.addf %102, %103 : vector<4x64xf32>
    %105 = vector.extract_strided_slice %104 {offsets = [0, 0], sizes = [2, 64], strides = [1, 1]} : vector<4x64xf32> to vector<2x64xf32>
    %106 = vector.extract_strided_slice %104 {offsets = [2, 0], sizes = [2, 64], strides = [1, 1]} : vector<4x64xf32> to vector<2x64xf32>
    %cst_70 = arith.constant 2.000000e+00 : f32
    %107 = vector.broadcast %cst_70 : f32 to vector<2x64xf32>
    %108 = arith.addf %105, %107 : vector<2x64xf32>
    %109 = arith.negf %108 : vector<2x64xf32>
    %110 = math.exp %109 : vector<2x64xf32>
    %cst_71 = arith.constant 1.000000e+00 : f32
    %111 = vector.broadcast %cst_71 : f32 to vector<2x64xf32>
    %112 = arith.addf %111, %110 : vector<2x64xf32>
    %113 = arith.divf %111, %112 : vector<2x64xf32>
    %114 = arith.addf %14, %106 : vector<2x64xf32>
    %115 = arith.mulf %114, %113 : vector<2x64xf32>
    %c0_72 = arith.constant 0 : index
    %c0_73 = arith.constant 0 : index
    %116 = vector.load %arg20[%c0_72, %c0_73] : memref<2x64xf32, #tpu.memory_space<vmem>>, vector<2x64xf32>
    tpu.vector_store %arg20[%c0_72, %c0_73], %115 {strides = array<i32>} : memref<2x64xf32, #tpu.memory_space<vmem>>, vector<2x64xf32>,
    %c0_74 = arith.constant 0 : index
    %c0_75 = arith.constant 0 : index
    %117 = vector.load %arg21[%c0_74, %c0_75] : memref<2x64xf32, #tpu.memory_space<vmem>>, vector<2x64xf32>
    tpu.vector_store %arg21[%c0_74, %c0_75], %19 {strides = array<i32>} : memref<2x64xf32, #tpu.memory_space<vmem>>, vector<2x64xf32>,
    %118 = math.log %113 : vector<2x64xf32>
    %cst_76 = arith.constant dense<0.000000e+00> : vector<64xf32>
    %119 = vector.multi_reduction <add>, %118, %cst_76 [0] : vector<2x64xf32> to vector<64xf32>
    %120 = vector.shape_cast %119 : vector<64xf32> to vector<1x64xf32>
    %c0_77 = arith.constant 0 : index
    %c0_78 = arith.constant 0 : index
    %121 = vector.load %arg22[%c0_77, %c0_78] : memref<1x64xf32, #tpu.memory_space<vmem>>, vector<1x64xf32>
    tpu.vector_store %arg22[%c0_77, %c0_78], %120 {strides = array<i32>} : memref<1x64xf32, #tpu.memory_space<vmem>>, vector<1x64xf32>,
    return
  }
}

module attributes {stable_mosaic.version = 11 : i64} {
  func.func @_flow_step_kernel(%arg0: memref<4x16xf32, #tpu.memory_space<vmem>>, %arg1: memref<4x16xf32, #tpu.memory_space<vmem>>, %arg2: memref<4x16xf32, #tpu.memory_space<vmem>>, %arg3: memref<4x16xf32, #tpu.memory_space<vmem>>, %arg4: memref<4x16xf32, #tpu.memory_space<vmem>>, %arg5: memref<4x16xf32, #tpu.memory_space<vmem>>, %arg6: memref<4x4xf32, #tpu.memory_space<vmem>>, %arg7: memref<4x4xf32, #tpu.memory_space<vmem>>, %arg8: memref<4x4xf32, #tpu.memory_space<vmem>>, %arg9: memref<4x4xf32, #tpu.memory_space<vmem>>, %arg10: memref<32x4xf32, #tpu.memory_space<vmem>>, %arg11: memref<32x4xf32, #tpu.memory_space<vmem>>, %arg12: memref<32x4xf32, #tpu.memory_space<vmem>>, %arg13: memref<32x1xf32, #tpu.memory_space<vmem>>, %arg14: memref<32x32xf32, #tpu.memory_space<vmem>>, %arg15: memref<32x1xf32, #tpu.memory_space<vmem>>, %arg16: memref<8x32xf32, #tpu.memory_space<vmem>>, %arg17: memref<8x32xf32, #tpu.memory_space<vmem>>, %arg18: memref<8x32xf32, #tpu.memory_space<vmem>>, %arg19: memref<8x1xf32, #tpu.memory_space<vmem>>, %arg20: memref<4x16xf32, #tpu.memory_space<vmem>>, %arg21: memref<4x16xf32, #tpu.memory_space<vmem>>, %arg22: memref<1x16xf32, #tpu.memory_space<vmem>>) attributes {dimension_semantics = [], scalar_prefetch = 0 : i64, scratch_operands = 0 : i64, tpu.core_type = #tpu.core_type<tc>} {
    %c0 = arith.constant 0 : index
    %c0_0 = arith.constant 0 : index
    %0 = vector.load %arg2[%c0, %c0_0] : memref<4x16xf32, #tpu.memory_space<vmem>>, vector<4x16xf32>
    %c0_1 = arith.constant 0 : index
    %c0_2 = arith.constant 0 : index
    %1 = vector.load %arg0[%c0_1, %c0_2] : memref<4x16xf32, #tpu.memory_space<vmem>>, vector<4x16xf32>
    %c0_3 = arith.constant 0 : index
    %c0_4 = arith.constant 0 : index
    %2 = vector.load %arg3[%c0_3, %c0_4] : memref<4x16xf32, #tpu.memory_space<vmem>>, vector<4x16xf32>
    %3 = arith.addf %1, %2 : vector<4x16xf32>
    %4 = arith.mulf %0, %3 : vector<4x16xf32>
    %c0_5 = arith.constant 0 : index
    %c0_6 = arith.constant 0 : index
    %5 = vector.load %arg4[%c0_5, %c0_6] : memref<4x16xf32, #tpu.memory_space<vmem>>, vector<4x16xf32>
    %c0_7 = arith.constant 0 : index
    %c0_8 = arith.constant 0 : index
    %6 = vector.load %arg1[%c0_7, %c0_8] : memref<4x16xf32, #tpu.memory_space<vmem>>, vector<4x16xf32>
    %c0_9 = arith.constant 0 : index
    %c0_10 = arith.constant 0 : index
    %7 = vector.load %arg5[%c0_9, %c0_10] : memref<4x16xf32, #tpu.memory_space<vmem>>, vector<4x16xf32>
    %8 = arith.addf %6, %7 : vector<4x16xf32>
    %9 = arith.mulf %5, %8 : vector<4x16xf32>
    %c0_11 = arith.constant 0 : index
    %c0_12 = arith.constant 0 : index
    %10 = vector.load %arg6[%c0_11, %c0_12] : memref<4x4xf32, #tpu.memory_space<vmem>>, vector<4x4xf32>
    %cst = arith.constant dense<0.000000e+00> : vector<4x16xf32>
    %11 = tpu.matmul %10, %4, %cst {dimension_numbers = #tpu.dot_dimension_numbers<[1], [0], [0], [1], [0, 0, 1, 1], [], []>} : vector<4x4xf32>, vector<4x16xf32>, vector<4x16xf32> -> vector<4x16xf32>
    %c0_13 = arith.constant 0 : index
    %c0_14 = arith.constant 0 : index
    %12 = vector.load %arg7[%c0_13, %c0_14] : memref<4x4xf32, #tpu.memory_space<vmem>>, vector<4x4xf32>
    %cst_15 = arith.constant dense<0.000000e+00> : vector<4x16xf32>
    %13 = tpu.matmul %12, %9, %cst_15 {dimension_numbers = #tpu.dot_dimension_numbers<[1], [0], [0], [1], [0, 0, 1, 1], [], []>} : vector<4x4xf32>, vector<4x16xf32>, vector<4x16xf32> -> vector<4x16xf32>
    %14 = arith.addf %11, %13 : vector<4x16xf32>
    %c0_16 = arith.constant 0 : index
    %c0_17 = arith.constant 0 : index
    %15 = vector.load %arg8[%c0_16, %c0_17] : memref<4x4xf32, #tpu.memory_space<vmem>>, vector<4x4xf32>
    %cst_18 = arith.constant dense<0.000000e+00> : vector<4x16xf32>
    %16 = tpu.matmul %15, %4, %cst_18 {dimension_numbers = #tpu.dot_dimension_numbers<[1], [0], [0], [1], [0, 0, 1, 1], [], []>} : vector<4x4xf32>, vector<4x16xf32>, vector<4x16xf32> -> vector<4x16xf32>
    %c0_19 = arith.constant 0 : index
    %c0_20 = arith.constant 0 : index
    %17 = vector.load %arg9[%c0_19, %c0_20] : memref<4x4xf32, #tpu.memory_space<vmem>>, vector<4x4xf32>
    %cst_21 = arith.constant dense<0.000000e+00> : vector<4x16xf32>
    %18 = tpu.matmul %17, %9, %cst_21 {dimension_numbers = #tpu.dot_dimension_numbers<[1], [0], [0], [1], [0, 0, 1, 1], [], []>} : vector<4x4xf32>, vector<4x16xf32>, vector<4x16xf32> -> vector<4x16xf32>
    %19 = arith.addf %16, %18 : vector<4x16xf32>
    %c0_22 = arith.constant 0 : index
    %c0_23 = arith.constant 0 : index
    %20 = vector.load %arg10[%c0_22, %c0_23] : memref<32x4xf32, #tpu.memory_space<vmem>>, vector<32x4xf32>
    %c0_24 = arith.constant 0 : index
    %c0_25 = arith.constant 0 : index
    %21 = vector.load %arg11[%c0_24, %c0_25] : memref<32x4xf32, #tpu.memory_space<vmem>>, vector<32x4xf32>
    %c0_26 = arith.constant 0 : index
    %c0_27 = arith.constant 0 : index
    %22 = vector.load %arg12[%c0_26, %c0_27] : memref<32x4xf32, #tpu.memory_space<vmem>>, vector<32x4xf32>
    %c0_28 = arith.constant 0 : index
    %c0_29 = arith.constant 0 : index
    %23 = vector.load %arg13[%c0_28, %c0_29] : memref<32x1xf32, #tpu.memory_space<vmem>>, vector<32x1xf32>
    %c0_30 = arith.constant 0 : index
    %c0_31 = arith.constant 0 : index
    %24 = vector.load %arg14[%c0_30, %c0_31] : memref<32x32xf32, #tpu.memory_space<vmem>>, vector<32x32xf32>
    %c0_32 = arith.constant 0 : index
    %c0_33 = arith.constant 0 : index
    %25 = vector.load %arg15[%c0_32, %c0_33] : memref<32x1xf32, #tpu.memory_space<vmem>>, vector<32x1xf32>
    %c0_34 = arith.constant 0 : index
    %c0_35 = arith.constant 0 : index
    %26 = vector.load %arg16[%c0_34, %c0_35] : memref<8x32xf32, #tpu.memory_space<vmem>>, vector<8x32xf32>
    %c0_36 = arith.constant 0 : index
    %c0_37 = arith.constant 0 : index
    %27 = vector.load %arg17[%c0_36, %c0_37] : memref<8x32xf32, #tpu.memory_space<vmem>>, vector<8x32xf32>
    %c0_38 = arith.constant 0 : index
    %c0_39 = arith.constant 0 : index
    %28 = vector.load %arg18[%c0_38, %c0_39] : memref<8x32xf32, #tpu.memory_space<vmem>>, vector<8x32xf32>
    %c0_40 = arith.constant 0 : index
    %c0_41 = arith.constant 0 : index
    %29 = vector.load %arg19[%c0_40, %c0_41] : memref<8x1xf32, #tpu.memory_space<vmem>>, vector<8x1xf32>
    %30 = tpu.iota {dimensions = array<i32: 1>} : vector<4x16xi32>
    %c8_i32 = arith.constant 8 : i32
    %c0_i32 = arith.constant 0 : i32
    %31 = arith.cmpi eq, %c8_i32, %c0_i32 : i32
    %c1_i32 = arith.constant 1 : i32
    %32 = arith.select %31, %c1_i32, %c8_i32 : i32
    %33 = vector.broadcast %32 : i32 to vector<4x16xi32>
    %34 = arith.remsi %30, %33 : vector<4x16xi32>
    %c0_i32_42 = arith.constant 0 : i32
    %35 = vector.broadcast %c0_i32_42 : i32 to vector<4x16xi32>
    %36 = arith.cmpi ne, %34, %35 : vector<4x16xi32>
    %c0_i32_43 = arith.constant 0 : i32
    %37 = vector.broadcast %c0_i32_43 : i32 to vector<4x16xi32>
    %38 = arith.cmpi slt, %34, %37 : vector<4x16xi32>
    %c0_i32_44 = arith.constant 0 : i32
    %39 = arith.cmpi slt, %32, %c0_i32_44 : i32
    %40 = vector.broadcast %39 : i1 to vector<4x16xi1>
    %41 = vector.broadcast %40 : vector<4x16xi1> to vector<4x16xi1>
    %42 = arith.xori %38, %41 : vector<4x16xi1>
    %43 = arith.andi %42, %36 : vector<4x16xi1>
    %44 = vector.broadcast %32 : i32 to vector<4x16xi32>
    %45 = arith.addi %34, %44 : vector<4x16xi32>
    %46 = arith.select %43, %45, %34 : vector<4x16xi1>, vector<4x16xi32>
    %c0_i32_45 = arith.constant 0 : i32
    %47 = vector.broadcast %c0_i32_45 : i32 to vector<4x16xi32>
    %48 = arith.cmpi eq, %46, %47 : vector<4x16xi32>
    %c1_i32_46 = arith.constant 1 : i32
    %49 = tpu.dynamic_rotate %14 by %c1_i32_46 dim 1 : vector<4x16xf32>, i32 -> vector<4x16xf32>
    %cst_47 = arith.constant 0.000000e+00 : f32
    %50 = vector.broadcast %cst_47 : f32 to vector<4x16xf32>
    %51 = arith.select %48, %50, %49 : vector<4x16xi1>, vector<4x16xf32>
    %c7_i32 = arith.constant 7 : i32
    %52 = vector.broadcast %c7_i32 : i32 to vector<4x16xi32>
    %53 = arith.cmpi eq, %46, %52 : vector<4x16xi32>
    %c15_i32 = arith.constant 15 : i32
    %54 = tpu.dynamic_rotate %14 by %c15_i32 dim 1 : vector<4x16xf32>, i32 -> vector<4x16xf32>
    %cst_48 = arith.constant 0.000000e+00 : f32
    %55 = vector.broadcast %cst_48 : f32 to vector<4x16xf32>
    %56 = arith.select %53, %55, %54 : vector<4x16xi1>, vector<4x16xf32>
    %cst_49 = arith.constant dense<0.000000e+00> : vector<32x16xf32>
    %57 = tpu.matmul %20, %51, %cst_49 {dimension_numbers = #tpu.dot_dimension_numbers<[1], [0], [0], [1], [0, 0, 1, 1], [], []>} : vector<32x4xf32>, vector<4x16xf32>, vector<32x16xf32> -> vector<32x16xf32>
    %cst_50 = arith.constant dense<0.000000e+00> : vector<32x16xf32>
    %58 = tpu.matmul %21, %14, %cst_50 {dimension_numbers = #tpu.dot_dimension_numbers<[1], [0], [0], [1], [0, 0, 1, 1], [], []>} : vector<32x4xf32>, vector<4x16xf32>, vector<32x16xf32> -> vector<32x16xf32>
    %59 = arith.addf %57, %58 : vector<32x16xf32>
    %cst_51 = arith.constant dense<0.000000e+00> : vector<32x16xf32>
    %60 = tpu.matmul %22, %56, %cst_51 {dimension_numbers = #tpu.dot_dimension_numbers<[1], [0], [0], [1], [0, 0, 1, 1], [], []>} : vector<32x4xf32>, vector<4x16xf32>, vector<32x16xf32> -> vector<32x16xf32>
    %61 = arith.addf %59, %60 : vector<32x16xf32>
    %62 = vector.broadcast %23 : vector<32x1xf32> to vector<32x16xf32>
    %63 = arith.addf %61, %62 : vector<32x16xf32>
    %cst_52 = arith.constant 0.000000e+00 : f32
    %64 = vector.broadcast %cst_52 : f32 to vector<32x16xf32>
    %65 = arith.maximumf %63, %64 : vector<32x16xf32>
    %cst_53 = arith.constant dense<0.000000e+00> : vector<32x16xf32>
    %66 = tpu.matmul %24, %65, %cst_53 {dimension_numbers = #tpu.dot_dimension_numbers<[1], [0], [0], [1], [0, 0, 1, 1], [], []>} : vector<32x32xf32>, vector<32x16xf32>, vector<32x16xf32> -> vector<32x16xf32>
    %67 = vector.broadcast %25 : vector<32x1xf32> to vector<32x16xf32>
    %68 = arith.addf %66, %67 : vector<32x16xf32>
    %cst_54 = arith.constant 0.000000e+00 : f32
    %69 = vector.broadcast %cst_54 : f32 to vector<32x16xf32>
    %70 = arith.maximumf %68, %69 : vector<32x16xf32>
    %71 = tpu.iota {dimensions = array<i32: 1>} : vector<32x16xi32>
    %c8_i32_55 = arith.constant 8 : i32
    %c0_i32_56 = arith.constant 0 : i32
    %72 = arith.cmpi eq, %c8_i32_55, %c0_i32_56 : i32
    %c1_i32_57 = arith.constant 1 : i32
    %73 = arith.select %72, %c1_i32_57, %c8_i32_55 : i32
    %74 = vector.broadcast %73 : i32 to vector<32x16xi32>
    %75 = arith.remsi %71, %74 : vector<32x16xi32>
    %c0_i32_58 = arith.constant 0 : i32
    %76 = vector.broadcast %c0_i32_58 : i32 to vector<32x16xi32>
    %77 = arith.cmpi ne, %75, %76 : vector<32x16xi32>
    %c0_i32_59 = arith.constant 0 : i32
    %78 = vector.broadcast %c0_i32_59 : i32 to vector<32x16xi32>
    %79 = arith.cmpi slt, %75, %78 : vector<32x16xi32>
    %c0_i32_60 = arith.constant 0 : i32
    %80 = arith.cmpi slt, %73, %c0_i32_60 : i32
    %81 = vector.broadcast %80 : i1 to vector<32x16xi1>
    %82 = vector.broadcast %81 : vector<32x16xi1> to vector<32x16xi1>
    %83 = arith.xori %79, %82 : vector<32x16xi1>
    %84 = arith.andi %83, %77 : vector<32x16xi1>
    %85 = vector.broadcast %73 : i32 to vector<32x16xi32>
    %86 = arith.addi %75, %85 : vector<32x16xi32>
    %87 = arith.select %84, %86, %75 : vector<32x16xi1>, vector<32x16xi32>
    %c0_i32_61 = arith.constant 0 : i32
    %88 = vector.broadcast %c0_i32_61 : i32 to vector<32x16xi32>
    %89 = arith.cmpi eq, %87, %88 : vector<32x16xi32>
    %c1_i32_62 = arith.constant 1 : i32
    %90 = tpu.dynamic_rotate %70 by %c1_i32_62 dim 1 : vector<32x16xf32>, i32 -> vector<32x16xf32>
    %cst_63 = arith.constant 0.000000e+00 : f32
    %91 = vector.broadcast %cst_63 : f32 to vector<32x16xf32>
    %92 = arith.select %89, %91, %90 : vector<32x16xi1>, vector<32x16xf32>
    %c7_i32_64 = arith.constant 7 : i32
    %93 = vector.broadcast %c7_i32_64 : i32 to vector<32x16xi32>
    %94 = arith.cmpi eq, %87, %93 : vector<32x16xi32>
    %c15_i32_65 = arith.constant 15 : i32
    %95 = tpu.dynamic_rotate %70 by %c15_i32_65 dim 1 : vector<32x16xf32>, i32 -> vector<32x16xf32>
    %cst_66 = arith.constant 0.000000e+00 : f32
    %96 = vector.broadcast %cst_66 : f32 to vector<32x16xf32>
    %97 = arith.select %94, %96, %95 : vector<32x16xi1>, vector<32x16xf32>
    %cst_67 = arith.constant dense<0.000000e+00> : vector<8x16xf32>
    %98 = tpu.matmul %26, %92, %cst_67 {dimension_numbers = #tpu.dot_dimension_numbers<[1], [0], [0], [1], [0, 0, 1, 1], [], []>} : vector<8x32xf32>, vector<32x16xf32>, vector<8x16xf32> -> vector<8x16xf32>
    %cst_68 = arith.constant dense<0.000000e+00> : vector<8x16xf32>
    %99 = tpu.matmul %27, %70, %cst_68 {dimension_numbers = #tpu.dot_dimension_numbers<[1], [0], [0], [1], [0, 0, 1, 1], [], []>} : vector<8x32xf32>, vector<32x16xf32>, vector<8x16xf32> -> vector<8x16xf32>
    %100 = arith.addf %98, %99 : vector<8x16xf32>
    %cst_69 = arith.constant dense<0.000000e+00> : vector<8x16xf32>
    %101 = tpu.matmul %28, %97, %cst_69 {dimension_numbers = #tpu.dot_dimension_numbers<[1], [0], [0], [1], [0, 0, 1, 1], [], []>} : vector<8x32xf32>, vector<32x16xf32>, vector<8x16xf32> -> vector<8x16xf32>
    %102 = arith.addf %100, %101 : vector<8x16xf32>
    %103 = vector.broadcast %29 : vector<8x1xf32> to vector<8x16xf32>
    %104 = arith.addf %102, %103 : vector<8x16xf32>
    %105 = vector.extract_strided_slice %104 {offsets = [0, 0], sizes = [4, 16], strides = [1, 1]} : vector<8x16xf32> to vector<4x16xf32>
    %106 = vector.extract_strided_slice %104 {offsets = [4, 0], sizes = [4, 16], strides = [1, 1]} : vector<8x16xf32> to vector<4x16xf32>
    %cst_70 = arith.constant 2.000000e+00 : f32
    %107 = vector.broadcast %cst_70 : f32 to vector<4x16xf32>
    %108 = arith.addf %105, %107 : vector<4x16xf32>
    %109 = arith.negf %108 : vector<4x16xf32>
    %110 = math.exp %109 : vector<4x16xf32>
    %cst_71 = arith.constant 1.000000e+00 : f32
    %111 = vector.broadcast %cst_71 : f32 to vector<4x16xf32>
    %112 = arith.addf %111, %110 : vector<4x16xf32>
    %113 = arith.divf %111, %112 : vector<4x16xf32>
    %114 = arith.addf %19, %106 : vector<4x16xf32>
    %115 = arith.mulf %114, %113 : vector<4x16xf32>
    %c0_72 = arith.constant 0 : index
    %c0_73 = arith.constant 0 : index
    %116 = vector.load %arg20[%c0_72, %c0_73] : memref<4x16xf32, #tpu.memory_space<vmem>>, vector<4x16xf32>
    tpu.vector_store %arg20[%c0_72, %c0_73], %14 {strides = array<i32>} : memref<4x16xf32, #tpu.memory_space<vmem>>, vector<4x16xf32>,
    %c0_74 = arith.constant 0 : index
    %c0_75 = arith.constant 0 : index
    %117 = vector.load %arg21[%c0_74, %c0_75] : memref<4x16xf32, #tpu.memory_space<vmem>>, vector<4x16xf32>
    tpu.vector_store %arg21[%c0_74, %c0_75], %115 {strides = array<i32>} : memref<4x16xf32, #tpu.memory_space<vmem>>, vector<4x16xf32>,
    %118 = math.log %113 : vector<4x16xf32>
    %cst_76 = arith.constant dense<0.000000e+00> : vector<16xf32>
    %119 = vector.multi_reduction <add>, %118, %cst_76 [0] : vector<4x16xf32> to vector<16xf32>
    %120 = vector.shape_cast %119 : vector<16xf32> to vector<1x16xf32>
    %c0_77 = arith.constant 0 : index
    %c0_78 = arith.constant 0 : index
    %121 = vector.load %arg22[%c0_77, %c0_78] : memref<1x16xf32, #tpu.memory_space<vmem>>, vector<1x16xf32>
    tpu.vector_store %arg22[%c0_77, %c0_78], %120 {strides = array<i32>} : memref<1x16xf32, #tpu.memory_space<vmem>>, vector<1x16xf32>,
    return
  }
}

module attributes {stable_mosaic.version = 11 : i64} {
  func.func @_flow_step_kernel(%arg0: memref<4x16xf32, #tpu.memory_space<vmem>>, %arg1: memref<4x16xf32, #tpu.memory_space<vmem>>, %arg2: memref<4x16xf32, #tpu.memory_space<vmem>>, %arg3: memref<4x16xf32, #tpu.memory_space<vmem>>, %arg4: memref<4x16xf32, #tpu.memory_space<vmem>>, %arg5: memref<4x16xf32, #tpu.memory_space<vmem>>, %arg6: memref<4x4xf32, #tpu.memory_space<vmem>>, %arg7: memref<4x4xf32, #tpu.memory_space<vmem>>, %arg8: memref<4x4xf32, #tpu.memory_space<vmem>>, %arg9: memref<4x4xf32, #tpu.memory_space<vmem>>, %arg10: memref<32x4xf32, #tpu.memory_space<vmem>>, %arg11: memref<32x4xf32, #tpu.memory_space<vmem>>, %arg12: memref<32x4xf32, #tpu.memory_space<vmem>>, %arg13: memref<32x1xf32, #tpu.memory_space<vmem>>, %arg14: memref<32x32xf32, #tpu.memory_space<vmem>>, %arg15: memref<32x1xf32, #tpu.memory_space<vmem>>, %arg16: memref<8x32xf32, #tpu.memory_space<vmem>>, %arg17: memref<8x32xf32, #tpu.memory_space<vmem>>, %arg18: memref<8x32xf32, #tpu.memory_space<vmem>>, %arg19: memref<8x1xf32, #tpu.memory_space<vmem>>, %arg20: memref<4x16xf32, #tpu.memory_space<vmem>>, %arg21: memref<4x16xf32, #tpu.memory_space<vmem>>, %arg22: memref<1x16xf32, #tpu.memory_space<vmem>>) attributes {dimension_semantics = [], scalar_prefetch = 0 : i64, scratch_operands = 0 : i64, tpu.core_type = #tpu.core_type<tc>} {
    %c0 = arith.constant 0 : index
    %c0_0 = arith.constant 0 : index
    %0 = vector.load %arg2[%c0, %c0_0] : memref<4x16xf32, #tpu.memory_space<vmem>>, vector<4x16xf32>
    %c0_1 = arith.constant 0 : index
    %c0_2 = arith.constant 0 : index
    %1 = vector.load %arg0[%c0_1, %c0_2] : memref<4x16xf32, #tpu.memory_space<vmem>>, vector<4x16xf32>
    %c0_3 = arith.constant 0 : index
    %c0_4 = arith.constant 0 : index
    %2 = vector.load %arg3[%c0_3, %c0_4] : memref<4x16xf32, #tpu.memory_space<vmem>>, vector<4x16xf32>
    %3 = arith.addf %1, %2 : vector<4x16xf32>
    %4 = arith.mulf %0, %3 : vector<4x16xf32>
    %c0_5 = arith.constant 0 : index
    %c0_6 = arith.constant 0 : index
    %5 = vector.load %arg4[%c0_5, %c0_6] : memref<4x16xf32, #tpu.memory_space<vmem>>, vector<4x16xf32>
    %c0_7 = arith.constant 0 : index
    %c0_8 = arith.constant 0 : index
    %6 = vector.load %arg1[%c0_7, %c0_8] : memref<4x16xf32, #tpu.memory_space<vmem>>, vector<4x16xf32>
    %c0_9 = arith.constant 0 : index
    %c0_10 = arith.constant 0 : index
    %7 = vector.load %arg5[%c0_9, %c0_10] : memref<4x16xf32, #tpu.memory_space<vmem>>, vector<4x16xf32>
    %8 = arith.addf %6, %7 : vector<4x16xf32>
    %9 = arith.mulf %5, %8 : vector<4x16xf32>
    %c0_11 = arith.constant 0 : index
    %c0_12 = arith.constant 0 : index
    %10 = vector.load %arg6[%c0_11, %c0_12] : memref<4x4xf32, #tpu.memory_space<vmem>>, vector<4x4xf32>
    %cst = arith.constant dense<0.000000e+00> : vector<4x16xf32>
    %11 = tpu.matmul %10, %4, %cst {dimension_numbers = #tpu.dot_dimension_numbers<[1], [0], [0], [1], [0, 0, 1, 1], [], []>} : vector<4x4xf32>, vector<4x16xf32>, vector<4x16xf32> -> vector<4x16xf32>
    %c0_13 = arith.constant 0 : index
    %c0_14 = arith.constant 0 : index
    %12 = vector.load %arg7[%c0_13, %c0_14] : memref<4x4xf32, #tpu.memory_space<vmem>>, vector<4x4xf32>
    %cst_15 = arith.constant dense<0.000000e+00> : vector<4x16xf32>
    %13 = tpu.matmul %12, %9, %cst_15 {dimension_numbers = #tpu.dot_dimension_numbers<[1], [0], [0], [1], [0, 0, 1, 1], [], []>} : vector<4x4xf32>, vector<4x16xf32>, vector<4x16xf32> -> vector<4x16xf32>
    %14 = arith.addf %11, %13 : vector<4x16xf32>
    %c0_16 = arith.constant 0 : index
    %c0_17 = arith.constant 0 : index
    %15 = vector.load %arg8[%c0_16, %c0_17] : memref<4x4xf32, #tpu.memory_space<vmem>>, vector<4x4xf32>
    %cst_18 = arith.constant dense<0.000000e+00> : vector<4x16xf32>
    %16 = tpu.matmul %15, %4, %cst_18 {dimension_numbers = #tpu.dot_dimension_numbers<[1], [0], [0], [1], [0, 0, 1, 1], [], []>} : vector<4x4xf32>, vector<4x16xf32>, vector<4x16xf32> -> vector<4x16xf32>
    %c0_19 = arith.constant 0 : index
    %c0_20 = arith.constant 0 : index
    %17 = vector.load %arg9[%c0_19, %c0_20] : memref<4x4xf32, #tpu.memory_space<vmem>>, vector<4x4xf32>
    %cst_21 = arith.constant dense<0.000000e+00> : vector<4x16xf32>
    %18 = tpu.matmul %17, %9, %cst_21 {dimension_numbers = #tpu.dot_dimension_numbers<[1], [0], [0], [1], [0, 0, 1, 1], [], []>} : vector<4x4xf32>, vector<4x16xf32>, vector<4x16xf32> -> vector<4x16xf32>
    %19 = arith.addf %16, %18 : vector<4x16xf32>
    %c0_22 = arith.constant 0 : index
    %c0_23 = arith.constant 0 : index
    %20 = vector.load %arg10[%c0_22, %c0_23] : memref<32x4xf32, #tpu.memory_space<vmem>>, vector<32x4xf32>
    %c0_24 = arith.constant 0 : index
    %c0_25 = arith.constant 0 : index
    %21 = vector.load %arg11[%c0_24, %c0_25] : memref<32x4xf32, #tpu.memory_space<vmem>>, vector<32x4xf32>
    %c0_26 = arith.constant 0 : index
    %c0_27 = arith.constant 0 : index
    %22 = vector.load %arg12[%c0_26, %c0_27] : memref<32x4xf32, #tpu.memory_space<vmem>>, vector<32x4xf32>
    %c0_28 = arith.constant 0 : index
    %c0_29 = arith.constant 0 : index
    %23 = vector.load %arg13[%c0_28, %c0_29] : memref<32x1xf32, #tpu.memory_space<vmem>>, vector<32x1xf32>
    %c0_30 = arith.constant 0 : index
    %c0_31 = arith.constant 0 : index
    %24 = vector.load %arg14[%c0_30, %c0_31] : memref<32x32xf32, #tpu.memory_space<vmem>>, vector<32x32xf32>
    %c0_32 = arith.constant 0 : index
    %c0_33 = arith.constant 0 : index
    %25 = vector.load %arg15[%c0_32, %c0_33] : memref<32x1xf32, #tpu.memory_space<vmem>>, vector<32x1xf32>
    %c0_34 = arith.constant 0 : index
    %c0_35 = arith.constant 0 : index
    %26 = vector.load %arg16[%c0_34, %c0_35] : memref<8x32xf32, #tpu.memory_space<vmem>>, vector<8x32xf32>
    %c0_36 = arith.constant 0 : index
    %c0_37 = arith.constant 0 : index
    %27 = vector.load %arg17[%c0_36, %c0_37] : memref<8x32xf32, #tpu.memory_space<vmem>>, vector<8x32xf32>
    %c0_38 = arith.constant 0 : index
    %c0_39 = arith.constant 0 : index
    %28 = vector.load %arg18[%c0_38, %c0_39] : memref<8x32xf32, #tpu.memory_space<vmem>>, vector<8x32xf32>
    %c0_40 = arith.constant 0 : index
    %c0_41 = arith.constant 0 : index
    %29 = vector.load %arg19[%c0_40, %c0_41] : memref<8x1xf32, #tpu.memory_space<vmem>>, vector<8x1xf32>
    %30 = tpu.iota {dimensions = array<i32: 1>} : vector<4x16xi32>
    %c8_i32 = arith.constant 8 : i32
    %c0_i32 = arith.constant 0 : i32
    %31 = arith.cmpi eq, %c8_i32, %c0_i32 : i32
    %c1_i32 = arith.constant 1 : i32
    %32 = arith.select %31, %c1_i32, %c8_i32 : i32
    %33 = vector.broadcast %32 : i32 to vector<4x16xi32>
    %34 = arith.remsi %30, %33 : vector<4x16xi32>
    %c0_i32_42 = arith.constant 0 : i32
    %35 = vector.broadcast %c0_i32_42 : i32 to vector<4x16xi32>
    %36 = arith.cmpi ne, %34, %35 : vector<4x16xi32>
    %c0_i32_43 = arith.constant 0 : i32
    %37 = vector.broadcast %c0_i32_43 : i32 to vector<4x16xi32>
    %38 = arith.cmpi slt, %34, %37 : vector<4x16xi32>
    %c0_i32_44 = arith.constant 0 : i32
    %39 = arith.cmpi slt, %32, %c0_i32_44 : i32
    %40 = vector.broadcast %39 : i1 to vector<4x16xi1>
    %41 = vector.broadcast %40 : vector<4x16xi1> to vector<4x16xi1>
    %42 = arith.xori %38, %41 : vector<4x16xi1>
    %43 = arith.andi %42, %36 : vector<4x16xi1>
    %44 = vector.broadcast %32 : i32 to vector<4x16xi32>
    %45 = arith.addi %34, %44 : vector<4x16xi32>
    %46 = arith.select %43, %45, %34 : vector<4x16xi1>, vector<4x16xi32>
    %c0_i32_45 = arith.constant 0 : i32
    %47 = vector.broadcast %c0_i32_45 : i32 to vector<4x16xi32>
    %48 = arith.cmpi eq, %46, %47 : vector<4x16xi32>
    %c1_i32_46 = arith.constant 1 : i32
    %49 = tpu.dynamic_rotate %19 by %c1_i32_46 dim 1 : vector<4x16xf32>, i32 -> vector<4x16xf32>
    %cst_47 = arith.constant 0.000000e+00 : f32
    %50 = vector.broadcast %cst_47 : f32 to vector<4x16xf32>
    %51 = arith.select %48, %50, %49 : vector<4x16xi1>, vector<4x16xf32>
    %c7_i32 = arith.constant 7 : i32
    %52 = vector.broadcast %c7_i32 : i32 to vector<4x16xi32>
    %53 = arith.cmpi eq, %46, %52 : vector<4x16xi32>
    %c15_i32 = arith.constant 15 : i32
    %54 = tpu.dynamic_rotate %19 by %c15_i32 dim 1 : vector<4x16xf32>, i32 -> vector<4x16xf32>
    %cst_48 = arith.constant 0.000000e+00 : f32
    %55 = vector.broadcast %cst_48 : f32 to vector<4x16xf32>
    %56 = arith.select %53, %55, %54 : vector<4x16xi1>, vector<4x16xf32>
    %cst_49 = arith.constant dense<0.000000e+00> : vector<32x16xf32>
    %57 = tpu.matmul %20, %51, %cst_49 {dimension_numbers = #tpu.dot_dimension_numbers<[1], [0], [0], [1], [0, 0, 1, 1], [], []>} : vector<32x4xf32>, vector<4x16xf32>, vector<32x16xf32> -> vector<32x16xf32>
    %cst_50 = arith.constant dense<0.000000e+00> : vector<32x16xf32>
    %58 = tpu.matmul %21, %19, %cst_50 {dimension_numbers = #tpu.dot_dimension_numbers<[1], [0], [0], [1], [0, 0, 1, 1], [], []>} : vector<32x4xf32>, vector<4x16xf32>, vector<32x16xf32> -> vector<32x16xf32>
    %59 = arith.addf %57, %58 : vector<32x16xf32>
    %cst_51 = arith.constant dense<0.000000e+00> : vector<32x16xf32>
    %60 = tpu.matmul %22, %56, %cst_51 {dimension_numbers = #tpu.dot_dimension_numbers<[1], [0], [0], [1], [0, 0, 1, 1], [], []>} : vector<32x4xf32>, vector<4x16xf32>, vector<32x16xf32> -> vector<32x16xf32>
    %61 = arith.addf %59, %60 : vector<32x16xf32>
    %62 = vector.broadcast %23 : vector<32x1xf32> to vector<32x16xf32>
    %63 = arith.addf %61, %62 : vector<32x16xf32>
    %cst_52 = arith.constant 0.000000e+00 : f32
    %64 = vector.broadcast %cst_52 : f32 to vector<32x16xf32>
    %65 = arith.maximumf %63, %64 : vector<32x16xf32>
    %cst_53 = arith.constant dense<0.000000e+00> : vector<32x16xf32>
    %66 = tpu.matmul %24, %65, %cst_53 {dimension_numbers = #tpu.dot_dimension_numbers<[1], [0], [0], [1], [0, 0, 1, 1], [], []>} : vector<32x32xf32>, vector<32x16xf32>, vector<32x16xf32> -> vector<32x16xf32>
    %67 = vector.broadcast %25 : vector<32x1xf32> to vector<32x16xf32>
    %68 = arith.addf %66, %67 : vector<32x16xf32>
    %cst_54 = arith.constant 0.000000e+00 : f32
    %69 = vector.broadcast %cst_54 : f32 to vector<32x16xf32>
    %70 = arith.maximumf %68, %69 : vector<32x16xf32>
    %71 = tpu.iota {dimensions = array<i32: 1>} : vector<32x16xi32>
    %c8_i32_55 = arith.constant 8 : i32
    %c0_i32_56 = arith.constant 0 : i32
    %72 = arith.cmpi eq, %c8_i32_55, %c0_i32_56 : i32
    %c1_i32_57 = arith.constant 1 : i32
    %73 = arith.select %72, %c1_i32_57, %c8_i32_55 : i32
    %74 = vector.broadcast %73 : i32 to vector<32x16xi32>
    %75 = arith.remsi %71, %74 : vector<32x16xi32>
    %c0_i32_58 = arith.constant 0 : i32
    %76 = vector.broadcast %c0_i32_58 : i32 to vector<32x16xi32>
    %77 = arith.cmpi ne, %75, %76 : vector<32x16xi32>
    %c0_i32_59 = arith.constant 0 : i32
    %78 = vector.broadcast %c0_i32_59 : i32 to vector<32x16xi32>
    %79 = arith.cmpi slt, %75, %78 : vector<32x16xi32>
    %c0_i32_60 = arith.constant 0 : i32
    %80 = arith.cmpi slt, %73, %c0_i32_60 : i32
    %81 = vector.broadcast %80 : i1 to vector<32x16xi1>
    %82 = vector.broadcast %81 : vector<32x16xi1> to vector<32x16xi1>
    %83 = arith.xori %79, %82 : vector<32x16xi1>
    %84 = arith.andi %83, %77 : vector<32x16xi1>
    %85 = vector.broadcast %73 : i32 to vector<32x16xi32>
    %86 = arith.addi %75, %85 : vector<32x16xi32>
    %87 = arith.select %84, %86, %75 : vector<32x16xi1>, vector<32x16xi32>
    %c0_i32_61 = arith.constant 0 : i32
    %88 = vector.broadcast %c0_i32_61 : i32 to vector<32x16xi32>
    %89 = arith.cmpi eq, %87, %88 : vector<32x16xi32>
    %c1_i32_62 = arith.constant 1 : i32
    %90 = tpu.dynamic_rotate %70 by %c1_i32_62 dim 1 : vector<32x16xf32>, i32 -> vector<32x16xf32>
    %cst_63 = arith.constant 0.000000e+00 : f32
    %91 = vector.broadcast %cst_63 : f32 to vector<32x16xf32>
    %92 = arith.select %89, %91, %90 : vector<32x16xi1>, vector<32x16xf32>
    %c7_i32_64 = arith.constant 7 : i32
    %93 = vector.broadcast %c7_i32_64 : i32 to vector<32x16xi32>
    %94 = arith.cmpi eq, %87, %93 : vector<32x16xi32>
    %c15_i32_65 = arith.constant 15 : i32
    %95 = tpu.dynamic_rotate %70 by %c15_i32_65 dim 1 : vector<32x16xf32>, i32 -> vector<32x16xf32>
    %cst_66 = arith.constant 0.000000e+00 : f32
    %96 = vector.broadcast %cst_66 : f32 to vector<32x16xf32>
    %97 = arith.select %94, %96, %95 : vector<32x16xi1>, vector<32x16xf32>
    %cst_67 = arith.constant dense<0.000000e+00> : vector<8x16xf32>
    %98 = tpu.matmul %26, %92, %cst_67 {dimension_numbers = #tpu.dot_dimension_numbers<[1], [0], [0], [1], [0, 0, 1, 1], [], []>} : vector<8x32xf32>, vector<32x16xf32>, vector<8x16xf32> -> vector<8x16xf32>
    %cst_68 = arith.constant dense<0.000000e+00> : vector<8x16xf32>
    %99 = tpu.matmul %27, %70, %cst_68 {dimension_numbers = #tpu.dot_dimension_numbers<[1], [0], [0], [1], [0, 0, 1, 1], [], []>} : vector<8x32xf32>, vector<32x16xf32>, vector<8x16xf32> -> vector<8x16xf32>
    %100 = arith.addf %98, %99 : vector<8x16xf32>
    %cst_69 = arith.constant dense<0.000000e+00> : vector<8x16xf32>
    %101 = tpu.matmul %28, %97, %cst_69 {dimension_numbers = #tpu.dot_dimension_numbers<[1], [0], [0], [1], [0, 0, 1, 1], [], []>} : vector<8x32xf32>, vector<32x16xf32>, vector<8x16xf32> -> vector<8x16xf32>
    %102 = arith.addf %100, %101 : vector<8x16xf32>
    %103 = vector.broadcast %29 : vector<8x1xf32> to vector<8x16xf32>
    %104 = arith.addf %102, %103 : vector<8x16xf32>
    %105 = vector.extract_strided_slice %104 {offsets = [0, 0], sizes = [4, 16], strides = [1, 1]} : vector<8x16xf32> to vector<4x16xf32>
    %106 = vector.extract_strided_slice %104 {offsets = [4, 0], sizes = [4, 16], strides = [1, 1]} : vector<8x16xf32> to vector<4x16xf32>
    %cst_70 = arith.constant 2.000000e+00 : f32
    %107 = vector.broadcast %cst_70 : f32 to vector<4x16xf32>
    %108 = arith.addf %105, %107 : vector<4x16xf32>
    %109 = arith.negf %108 : vector<4x16xf32>
    %110 = math.exp %109 : vector<4x16xf32>
    %cst_71 = arith.constant 1.000000e+00 : f32
    %111 = vector.broadcast %cst_71 : f32 to vector<4x16xf32>
    %112 = arith.addf %111, %110 : vector<4x16xf32>
    %113 = arith.divf %111, %112 : vector<4x16xf32>
    %114 = arith.addf %14, %106 : vector<4x16xf32>
    %115 = arith.mulf %114, %113 : vector<4x16xf32>
    %c0_72 = arith.constant 0 : index
    %c0_73 = arith.constant 0 : index
    %116 = vector.load %arg20[%c0_72, %c0_73] : memref<4x16xf32, #tpu.memory_space<vmem>>, vector<4x16xf32>
    tpu.vector_store %arg20[%c0_72, %c0_73], %115 {strides = array<i32>} : memref<4x16xf32, #tpu.memory_space<vmem>>, vector<4x16xf32>,
    %c0_74 = arith.constant 0 : index
    %c0_75 = arith.constant 0 : index
    %117 = vector.load %arg21[%c0_74, %c0_75] : memref<4x16xf32, #tpu.memory_space<vmem>>, vector<4x16xf32>
    tpu.vector_store %arg21[%c0_74, %c0_75], %19 {strides = array<i32>} : memref<4x16xf32, #tpu.memory_space<vmem>>, vector<4x16xf32>,
    %118 = math.log %113 : vector<4x16xf32>
    %cst_76 = arith.constant dense<0.000000e+00> : vector<16xf32>
    %119 = vector.multi_reduction <add>, %118, %cst_76 [0] : vector<4x16xf32> to vector<16xf32>
    %120 = vector.shape_cast %119 : vector<16xf32> to vector<1x16xf32>
    %c0_77 = arith.constant 0 : index
    %c0_78 = arith.constant 0 : index
    %121 = vector.load %arg22[%c0_77, %c0_78] : memref<1x16xf32, #tpu.memory_space<vmem>>, vector<1x16xf32>
    tpu.vector_store %arg22[%c0_77, %c0_78], %120 {strides = array<i32>} : memref<1x16xf32, #tpu.memory_space<vmem>>, vector<1x16xf32>,
    return
  }
}

</mosaic_0001>

<bundles_post_ra>
// kernel: tile.94
= control target key start
LH: loop header
LB: loop body
LE: loop exit
PB: predicated region body
PF: predicated region fallthrough
CT: control target
= control target key end

     0   :  { %s10_s10 = smov 3  ;;  %vm12_vm0 = vcmask 261120   ;;  %s29_s11 = smov 32   ;;  %vm19_vm1 = vcmask 523520   ;;  %s49_s0 = inlined_call_operand.vmem [shape: f32[2,2,32], index: 0, kind: input, shape index: {}]   ;;  %s50_s1 = inlined_call_operand.vmem [shape: f32[2,64], index: 1, kind: output, shape index: {}]  }
   0x1   :  { %v27_v0 = vld [vmem:[%s49_s0 + $0x2] sm:$0x3]  ;;  %v8_v1 = vld [vmem:[%s49_s0] sm:$0x3]  ;;  %s15_s0 = smov 3 }
   0x2   :  { %7 = vst [vmem:[#allocation1 + $0x8] sm:$0x3] %v27_v0  ;;  %9 = vst [vmem:[#allocation1] sm:$0x3] %v8_v1 }
   0x9   :  { %v16_v2 = vld [vmem:[#allocation1 + $0x1] ss:$8 sm:%s15_s0]   ;;  %v11_v3 = vld [vmem:[#allocation1] ss:$8 sm:%s10_s10]  }
   0xa   :  { %17 = vrot.lane.b32.xlu0 %v16_v2, %s29_s11  ;;  %13 = vst.msk [vmem:[#allocation0] sm:$0x3] %vm12_vm0, %v11_v3  }
  0x7c   :  { %v18_v4 = vpop.permute.xlu0 %17  }
  0x7d   :  { %20 = vst.msk [vmem:[#allocation0] sm:$0x3] %vm19_vm1, %v18_v4  }
  0x84   :  { %v24_v5 = vld [vmem:[#allocation0] sm:$0x3] }
  0x85   :  { %26 = vst [vmem:[%s50_s1] sm:$0x3] %v24_v5 }

// kernel: tile.134
= control target key start
LH: loop header
LB: loop body
LE: loop exit
PB: predicated region body
PF: predicated region fallthrough
CT: control target
= control target key end

     0   :  { %vm21_vm0 = vcmask 64512   ;;  %vm27_vm1 = vcmask 130112   ;;  %s67_s0 = inlined_call_operand.vmem [shape: f32[4,2,8], index: 0, kind: input, shape index: {}]   ;;  %s68_s1 = inlined_call_operand.vmem [shape: f32[4,16], index: 1, kind: output, shape index: {}]  }
   0x1   :  { %v37_v0 = vld [vmem:[%s67_s0 + $0x6] sm:$0x3]  ;;  %v38_v1 = vld [vmem:[%s67_s0 + $0x4] sm:$0x3]  ;;  %v39_v2 = vld [vmem:[%s67_s0 + $0x2] sm:$0x3] }
   0x2   :  { %8 = vst [vmem:[#allocation1 + $0x18] sm:$0x3] %v37_v0  ;;  %13 = vst [vmem:[#allocation1 + $0x10] sm:$0x3] %v38_v1  ;;  %v18_v3 = vld [vmem:[%s67_s0] sm:$0x3] }
   0x3   :  { %17 = vst [vmem:[#allocation1 + $0x8] sm:$0x3] %v39_v2  ;;  %19 = vst [vmem:[#allocation1] sm:$0x3] %v18_v3  ;;  %s41_s0 = smov 8  }
   0xa   :  { %v24_v4 = vld [vmem:[#allocation1 + $0x1] ss:$8 sm:$0xf]   ;;  %v20_v5 = vld [vmem:[#allocation1] ss:$8 sm:$0xf]  }
   0xb   :  { %25 = vrot.lane.b32.xlu0 %v24_v4, %s41_s0  ;;  %22 = vst.msk [vmem:[#allocation0] sm:$0xf] %vm21_vm0, %v20_v5  }
  0x7d   :  { %v26_v6 = vpop.permute.xlu0 %25  }
  0x7e   :  { %28 = vst.msk [vmem:[#allocation0] sm:$0xf] %vm27_vm1, %v26_v6  }
  0x85   :  { %v32_v7 = vld [vmem:[#allocation0] sm:$0xf] }
  0x86   :  { %34 = vst [vmem:[%s68_s1] sm:$0xf] %v32_v7 }

// kernel: ecg_norm_flow_forward.7
= control target key start
LH: loop header
LB: loop body
LE: loop exit
PB: predicated region body
PF: predicated region fallthrough
CT: control target
= control target key end

     0   :  { %s1121_s27 = smov 64   ;;  %vm117_vm0 = vcmask 1041408   ;;  %vm104_vm1 = vcmask 15360   ;;  %vm87_vm2 = vcmask 1048064   ;;  %s1122_s20 = smov 65   ;;  %v1123_v10 = vmov 0   ;;  %s1379_s0 = inlined_call_operand.vmem [shape: f32[2,64], index: 0, kind: input, shape index: {}]   ;;  %s1380_s3 = inlined_call_operand.vmem [shape: f32[32,2], index: 3, kind: input, shape index: {}]   ;;  %s1381_s2 = inlined_call_operand.vmem [shape: f32[32,2], index: 2, kind: input, shape index: {}]   ;;  %s1382_s5 = inlined_call_operand.vmem [shape: f32[32,1], index: 5, kind: input, shape index: {}]   ;;  %s1383_s7 = inlined_call_operand.vmem [shape: f32[32,1], index: 7, kind: input, shape index: {}]   ;;  %s1384_s4 = inlined_call_operand.vmem [shape: f32[32,2], index: 4, kind: input, shape index: {}]   ;;  %s1385_s6 = inlined_call_operand.vmem [shape: f32[32,32], index: 6, kind: input, shape index: {}]   ;;  %s1386_s9 = inlined_call_operand.vmem [shape: f32[4,32], index: 9, kind: input, shape index: {}]   ;;  %s1387_s11 = inlined_call_operand.vmem [shape: f32[4,1], index: 11, kind: input, shape index: {}]   ;;  %s1388_s8 = inlined_call_operand.vmem [shape: f32[4,32], index: 8, kind: input, shape index: {}]   ;;  %s1389_s10 = inlined_call_operand.vmem [shape: f32[4,32], index: 10, kind: input, shape index: {}]   ;;  %s1390_s1 = inlined_call_operand.vmem [shape: f32[2,64], index: 1, kind: input, shape index: {}]   ;;  %s1391_s12 = inlined_call_operand.vmem [shape: f32[2,64], index: 12, kind: output, shape index: {0}]   ;;  %s1392_s13 = inlined_call_operand.vmem [shape: f32[1,64], index: 13, kind: output, shape index: {1}]  }
   0x1   :  { %v43_v0 = vld [vmem:[%s1379_s0] sm:$0x3]  ;;  %v49_v2 = vld [vmem:[%s1380_s3 + $0x8] sm:$0xff]  ;;  %v50_v3 = vld [vmem:[%s1380_s3 + $0x10] sm:$0xff]  ;;  %1074 = vset.pattern.permute.xlu1 %v1123_v10  ;;  %1073 = vset.pattern.permute.xlu0 %v1123_v10  ;;  %v72_v19 = vlaneseq  ;;  %vm458_vm5 = vcmask 261120   ;;  %v1125_v57 = vmov 0.0|0.0  }
   0x2   :  { %88 = vrot.lane.b32.xlu0 %v43_v0, %s1121_s27  ;;  %957 = vmatprep.subr.msk.mxu0 %vm117_vm0, %v43_v0  ;;  %v48_v1 = vld [vmem:[%s1380_s3] sm:$0xff]  ;;  %v51_v6 = vld [vmem:[%s1380_s3 + $0x18] sm:$0xff]  ;;  %s1124_s3 = smov 127   ;;  %v57_v12 = vld [vmem:[%s1382_s5 + $0x8] sm:$0xff]  ;;  %vm1126_vm6 = vmmov 0   ;;  %vm859_vm11 = vcmask 517120  }
   0x3   :  { %958 = vmatpush3.msk.msra.mxu0 %vm117_vm0, %v43_v0  ;;  %959 = vmatprep.mubr.msk.f32.mxu0 %vm104_vm1, %v48_v1  ;;  %v44_v7 = vld [vmem:[%s1381_s2] sm:$0xff]  ;;  %v59_v13 = vld [vmem:[%s1382_s5 + $0x18] sm:$0xff]  ;;  %v58_v14 = vld [vmem:[%s1382_s5 + $0x10] sm:$0xff]  ;;  %v73_v20 = vand.u32 127, %v72_v19  ;;  %vm870_vm12 = vcmask 516096  }
   0x4   :  { %960 = vmatmul.mubr.msk.f32.vlgmr.msra.gmra.mrb[0].mxu0 %vm104_vm1, %v49_v2  ;;  %v56_v11 = vld [vmem:[%s1382_s5] sm:$0xff]  ;;  %v65_v15 = vld [vmem:[%s1383_s7 + $0x8] sm:$0xff]  ;;  %v67_v17 = vld [vmem:[%s1383_s7 + $0x18] sm:$0xff] }
   0x5   :  { %962 = vmatprep.mubr.msk.f32.mxu0 %vm104_vm1, %v50_v3  ;;  %v64_v16 = vld [vmem:[%s1383_s7] sm:$0xff]  ;;  %v66_v18 = vld [vmem:[%s1383_s7 + $0x10] sm:$0xff]  ;;  %v78_v21 = vand.u32 31, %v73_v20  ;;  %v45_v25 = vld [vmem:[%s1381_s2 + $0x8] sm:$0xff] }
   0x6   :  { %v46_v27 = vld [vmem:[%s1381_s2 + $0x10] sm:$0xff]  ;;  %v47_v30 = vld [vmem:[%s1381_s2 + $0x18] sm:$0xff]  ;;  %v52_v31 = vld [vmem:[%s1384_s4] sm:$0xff] }
   0x7   :  { %vm1253_vm3 = vcmp.eq.s32.totalorder %v78_v21, 0  ;;  %vm1263_vm4 = vcmp.eq.s32.totalorder %v78_v21, 31  ;;  %v53_v32 = vld [vmem:[%s1384_s4 + $0x8] sm:$0xff]  ;;  %v54_v33 = vld [vmem:[%s1384_s4 + $0x10] sm:$0xff]  ;;  %v55_v34 = vld [vmem:[%s1384_s4 + $0x18] sm:$0xff] }
   0x8   :  { %963 = vmatmul.mubr.msk.f32.gmra.mrb[2].mxu0 %vm104_vm1, %v51_v6  ;;  %v60_v35 = vld [vmem:[%s1385_s6] sm:$0xff]  ;;  %v61_v54 = vld [vmem:[%s1385_s6 + $0x8] sm:$0xff]  ;;  %v62_v55 = vld [vmem:[%s1385_s6 + $0x10] sm:$0xff] }
   0x9   :  { %967 = vmatprep.mubr.msk.f32.mxu0 %vm104_vm1, %v44_v7  ;;  %989 = vmatprep.mubr.msk.f32.mxu1 %vm458_vm5, %v60_v35  ;;  %v63_v56 = vld [vmem:[%s1385_s6 + $0x18] sm:$0xff]  ;;  %vm900_vm7 = vmneg %vm1253_vm3 }
   0xa   :  { %vm909_vm8 = vmneg %vm1263_vm4 }
   0xb   :  { %vm1344_vm9 = vmpackc.low %vm900_vm7, %vm900_vm7 }
   0xc   :  { %vm1348_vm10 = vmpackc.low %vm909_vm8, %vm909_vm8 }
  0x74   :  { %v89_v4 = vpop.permute.xlu0 %88 }
  0x75   :  { %v90_v5 = vsel %vm87_vm2, %v89_v4, %v43_v0 }
  0x76   :  { %91 = vrot.lane.b32.xlu0 %v90_v5, %s1121_s27 }
  0x7a   :  { %412 = vperm.xlu0 %1073, %v56_v11  }
  0x7e   :  { %427 = vperm.xlu0 %1073, %v59_v13  }
  0x82   :  { %445 = vperm.xlu0 %1073, %v65_v15  }
  0x86   :  { %455 = vperm.xlu0 %1073, %v67_v17  }
  0xe8   :  { %v92_v8 = vpop.permute.xlu0 %91 }
  0xe9   :  { %v93_v9 = vsel %vm87_vm2, %v92_v8, %v43_v0 }
  0xea   :  { %95 = vrot.lane.b32.xlu1 %v93_v9, %s1122_s20 }
  0xee   :  { %100 = vrot.lane.b32.xlu1 %v93_v9, %s1124_s3 }
  0xf2   :  { %417 = vperm.xlu1 %1074, %v57_v12  }
  0xf6   :  { %422 = vperm.xlu1 %1074, %v58_v14  }
  0xf9   :  { %v413_v36 = vpop.permute.xlu0 %412 }
  0xfa   :  { %440 = vperm.xlu1 %1074, %v64_v16  }
  0xfd   :  { %v428_v43 = vpop.permute.xlu0 %427 }
  0xfe   :  { %450 = vperm.xlu1 %1074, %v66_v18  }
 0x101   :  { %v446_v58 = vpop.permute.xlu0 %445 }
 0x105   :  { %v456_v1 = vpop.permute.xlu0 %455 }
 0x15c   :  { %v96_v23 = vpop.permute.xlu1 %95 }
 0x15d   :  { %v98_v24 = vsel %vm1253_vm3, 0.0, %v96_v23 }
 0x15e   :  { %965 = vmatprep.subr.msk.mxu0 %vm117_vm0, %v98_v24 }
 0x15f   :  { %966 = vmatpush3.msk.msra.mxu0 %vm117_vm0, %v98_v24 }
 0x160   :  { %v101_v28 = vpop.permute.xlu1 %100  ;;  %968 = vmatmul.mubr.msk.f32.vlgmr.msra.gmra.mrb[0].mxu0 %vm104_vm1, %v45_v25 }
 0x161   :  { %v103_v29 = vsel %vm1263_vm4, 0.0, %v101_v28  ;;  %970 = vmatprep.mubr.msk.f32.mxu0 %vm104_vm1, %v46_v27  ;;  %v1127_v28 = vmov 0.0  }
 0x162   :  { %973 = vmatprep.subr.msk.mxu0 %vm117_vm0, %v103_v29 }
 0x163   :  { %974 = vmatpush3.msk.msra.mxu0 %vm117_vm0, %v103_v29  ;;  %v69_v29 = vld [vmem:[%s1386_s9] sm:$0xf] }
 0x164   :  { %971 = vmatmul.mubr.msk.f32.gmra.mrb[2].mxu0 %vm104_vm1, %v47_v30  ;;  %1050 = vmatprep.subr.bf16.mxu0 %v1125_v57 }
 0x165   :  { %975 = vmatprep.mubr.msk.f32.mxu0 %vm104_vm1, %v52_v31 }
 0x168   :  { %976 = vmatmul.mubr.msk.f32.vlgmr.msra.gmra.mrb[0].mxu0 %vm104_vm1, %v53_v32 }
 0x169   :  { %978 = vmatprep.mubr.msk.f32.mxu0 %vm104_vm1, %v54_v33 }
 0x16c   :  { %979 = vmatmul.mubr.msk.f32.gmra.mrb[2].mxu0 %vm104_vm1, %v55_v34 }
 0x16d   :  { %1025 = vmatprep.mubr.msk.f32.mxu0 %vm1126_vm6, %v1127_v28 }
 0x171   :  { %v418_v37 = vpop.permute.xlu1 %417 }
 0x175   :  { %v423_v46 = vpop.permute.xlu1 %422 }
 0x179   :  { %v441_v59 = vpop.permute.xlu1 %440 }
 0x17d   :  { %v451_v4 = vpop.permute.xlu1 %450 }
 0x23b   :  { %v977_v38 = vpop.f32.mrb[0].mxu0 }
 0x23c   :  { %v431_v39 = vadd.f32 %v977_v38, %v418_v37  ;;  %v387_v40 = vpop.f32.mrb[1].mxu0 }
 0x23d   :  { %v430_v41 = vadd.f32 %v413_v36, %v387_v40 }
 0x23e   :  { %v435_v42 = vmax.f32 %v431_v39, 0.0 }
 0x23f   :  { %v434_v44 = vmax.f32 %v430_v41, 0.0  ;;  %v980_v45 = vpop.f32.mrb[2].mxu0 }
 0x240   :  { %v433_v47 = vadd.f32 %v980_v45, %v428_v43  ;;  %v397_v48 = vpop.f32.mrb[3].mxu0 }
 0x241   :  { %v432_v49 = vadd.f32 %v423_v46, %v397_v48  ;;  %v1028_v50 = vpack.c.bf16 %v435_v42, %v434_v44  ;;  %v71_v42 = vld [vmem:[%s1387_s11] sm:$0xf] }
 0x242   :  { %v437_v51 = vmax.f32 %v433_v47, 0.0 }
 0x243   :  { %v436_v52 = vmax.f32 %v432_v49, 0.0  ;;  %1029 = vmatprep.subr.bf16.mxu1 %v1028_v50 }
 0x244   :  { %1031 = vmatpush3.bf16.msra.mxu1 %v1028_v50 }
 0x245   :  { %v1032_v53 = vpack.c.bf16 %v437_v51, %v436_v52 }
 0x247   :  { %1033 = vmatprep.subr.bf16.mxu1 %v1032_v53 }
 0x248   :  { %1035 = vmatpush3.bf16.msra.mxu1 %v1032_v53 }
 0x249   :  { %1036 = vmatprep.subr.bf16.mxu1 %v1125_v57 }
 0x24b   :  { %990 = vmatmul.mubr.msk.f32.vlgmr.msra.gmra.mrb[0].mxu1 %vm458_vm5, %v61_v54 }
 0x24c   :  { %992 = vmatprep.mubr.msk.f32.mxu1 %vm458_vm5, %v62_v55 }
 0x24f   :  { %993 = vmatmul.mubr.msk.f32.gmra.mrb[2].mxu1 %vm458_vm5, %v63_v56 }
 0x250   :  { %1003 = vmatprep.mubr.msk.f32.mxu1 %vm1126_vm6, %v1127_v28 }
 0x31e   :  { %v991_v60 = vpop.f32.mrb[0].mxu1 }
 0x31f   :  { %v543_v61 = vadd.f32 %v991_v60, %v446_v58  ;;  %v537_v62 = vpop.f32.mrb[1].mxu1  ;;  %v68_v60 = vld [vmem:[%s1388_s8] sm:$0xf] }
 0x320   :  { %v538_v63 = vadd.f32 %v537_v62, %v441_v59 }
 0x321   :  { %v557_v0 = vmax.f32 %v543_v61, 0.0  ;;  %v70_v61 = vld [vmem:[%s1389_s10] sm:$0xf] }
 0x322   :  { %v556_v2 = vmax.f32 %v538_v63, 0.0  ;;  %v994_v3 = vpop.f32.mrb[2].mxu1 }
 0x323   :  { %v553_v5 = vadd.f32 %v994_v3, %v456_v1  ;;  %v547_v6 = vpop.f32.mrb[3].mxu1 }
 0x324   :  { %v548_v7 = vadd.f32 %v547_v6, %v451_v4  ;;  %v1075_v8 = vpack.i.bf16 %v557_v0, %v556_v2  ;;  %v1037_v9 = vpack.c.bf16 %v557_v0, %v556_v2 }
 0x325   :  { %v559_v10 = vmax.f32 %v553_v5, 0.0 }
 0x326   :  { %v558_v11 = vmax.f32 %v548_v7, 0.0  ;;  %1076 = vrot.lane.b32.xlu1 %v1075_v8, %s1121_s27  ;;  %1038 = vmatpush3.bf16.msra.mxu1 %v1037_v9 }
 0x327   :  { %1039 = vmatprep.subr.bf16.mxu1 %v1125_v57 }
 0x328   :  { %v1080_v12 = vpack.i.bf16 %v559_v10, %v558_v11  ;;  %v1040_v13 = vpack.c.bf16 %v559_v10, %v558_v11 }
 0x32a   :  { %1081 = vrot.lane.b32.xlu0 %v1080_v12, %s1121_s27  ;;  %1041 = vmatpush3.bf16.msra.mxu1 %v1040_v13  ;;  %v853_v12 = vld [vmem:[%s1390_s1] sm:$0x3] }
 0x32b   :  { %1042 = vmatprep.subr.bf16.mxu1 %v1125_v57 }
 0x32d   :  { %1004 = vmatmul.mubr.msk.f32.vlgmr.msra.gmra.mrb[4].mxu1 %vm458_vm5, %v69_v29 }
 0x32e   :  { %1014 = vmatprep.mubr.msk.f32.mxu1 %vm1126_vm6, %v1127_v28 }
 0x398   :  { %v1077_v14 = vpop.permute.xlu1 %1076 }
 0x399   :  { %v1079_v15 = vunpack.i.h.bf16 %v1077_v14  ;;  %v1078_v16 = vunpack.i.l.bf16 %v1077_v14 }
 0x39b   :  { %v562_v17 = vsel %vm87_vm2, %v1078_v16, %v556_v2  ;;  %v565_v18 = vsel %vm87_vm2, %v1079_v15, %v557_v0 }
 0x39c   :  { %v1082_v19 = vpop.permute.xlu0 %1081  ;;  %v1085_v20 = vpack.i.bf16 %v565_v18, %v562_v17 }
 0x39d   :  { %v1084_v21 = vunpack.i.h.bf16 %v1082_v19  ;;  %v1083_v23 = vunpack.i.l.bf16 %v1082_v19 }
 0x39e   :  { %1086 = vrot.lane.b32.xlu1 %v1085_v20, %s1121_s27 }
 0x39f   :  { %v568_v24 = vsel %vm87_vm2, %v1083_v23, %v558_v11  ;;  %v571_v25 = vsel %vm87_vm2, %v1084_v21, %v559_v10 }
 0x3a0   :  { %v1090_v27 = vpack.i.bf16 %v571_v25, %v568_v24 }
 0x3a2   :  { %1091 = vrot.lane.b32.xlu0 %v1090_v27, %s1121_s27 }
 0x410   :  { %v1087_v30 = vpop.permute.xlu1 %1086 }
 0x411   :  { %v1089_v31 = vunpack.i.h.bf16 %v1087_v30  ;;  %v1088_v32 = vunpack.i.l.bf16 %v1087_v30 }
 0x413   :  { %v580_v33 = vsel %vm87_vm2, %v1088_v32, %v556_v2  ;;  %v581_v34 = vsel %vm87_vm2, %v1089_v31, %v557_v0 }
 0x414   :  { %v1092_v35 = vpop.permute.xlu0 %1091  ;;  %v1100_v36 = vpack.i.bf16 %v581_v34, %v580_v33 }
 0x415   :  { %v1094_v37 = vunpack.i.h.bf16 %v1092_v35  ;;  %v1093_v38 = vunpack.i.l.bf16 %v1092_v35 }
 0x416   :  { %1101 = vrot.lane.b32.xlu0 %v1100_v36, %s1124_s3  ;;  %1096 = vrot.lane.b32.xlu1 %v1100_v36, %s1122_s20 }
 0x417   :  { %v582_v39 = vsel %vm87_vm2, %v1093_v38, %v558_v11  ;;  %v583_v40 = vsel %vm87_vm2, %v1094_v37, %v559_v10 }
 0x418   :  { %v1110_v41 = vpack.i.bf16 %v583_v40, %v582_v39 }
 0x41a   :  { %1111 = vrot.lane.b32.xlu0 %v1110_v41, %s1124_s3  ;;  %1106 = vrot.lane.b32.xlu1 %v1110_v41, %s1122_s20 }
 0x41e   :  { %842 = vperm.xlu1 %1074, %v71_v42  }
 0x488   :  { %v1102_v43 = vpop.permute.xlu0 %1101  ;;  %v1097_v44 = vpop.permute.xlu1 %1096 }
 0x489   :  { %v1104_v46 = vunpack.i.h.bf16 %v1102_v43  ;;  %v1103_v47 = vunpack.i.l.bf16 %v1102_v43  ;;  %v1099_v48 = vunpack.i.h.bf16 %v1097_v44  ;;  %v1098_v49 = vunpack.i.l.bf16 %v1097_v44 }
 0x48b   :  { %v1051_v51 = vpack.c.bf16 %v1104_v46, %v1103_v47  ;;  %v1043_v22 = vpack.c.bf16 %v1099_v48, %v1098_v49 }
 0x48c   :  { %v1112_v52 = vpop.permute.xlu0 %1111  ;;  %v1107_v53 = vpop.permute.xlu1 %1106 }
 0x48d   :  { %v1114_v26 = vunpack.i.h.bf16 %v1112_v52  ;;  %v1113_v54 = vunpack.i.l.bf16 %v1112_v52  ;;  %v1109_v55 = vunpack.i.h.bf16 %v1107_v53  ;;  %v1108_v56 = vunpack.i.l.bf16 %v1107_v53  ;;  %1045 = vmatpush3.bf16.msk.msra.mxu1 %vm1344_vm9, %v1043_v22  ;;  %1053 = vmatpush3.bf16.msk.msra.mxu0 %vm1348_vm10, %v1051_v51 }
 0x48e   :  { %1046 = vmatprep.subr.bf16.mxu1 %v1125_v57  ;;  %1054 = vmatprep.subr.bf16.mxu0 %v1125_v57  ;;  %v689_v57 = vpop.f32.mrb[4].mxu1 }
 0x48f   :  { %v1055_v58 = vpack.c.bf16 %v1114_v26, %v1113_v54  ;;  %v1047_v59 = vpack.c.bf16 %v1109_v55, %v1108_v56  ;;  %v1005_v62 = vpop.f32.mrb[5].mxu1 }
 0x491   :  { %1049 = vmatpush3.bf16.msk.msra.mxu1 %vm1344_vm9, %v1047_v59  ;;  %1057 = vmatpush3.bf16.msk.msra.mxu0 %vm1348_vm10, %v1055_v58 }
 0x494   :  { %1015 = vmatmul.mubr.msk.f32.vlgmr.msra.gmra.mrb[6].mxu1 %vm458_vm5, %v68_v60  ;;  %1026 = vmatmul.mubr.msk.f32.vlgmr.msra.gmra.mrb[4].mxu0 %vm458_vm5, %v70_v61 }
 0x49d   :  { %v843_v5 = vpop.permute.xlu1 %842 }
 0x567   :  { %v762_v63 = vpop.f32.mrb[6].mxu1  ;;  %v835_v0 = vpop.f32.mrb[4].mxu0 }
 0x568   :  { %v763_v1 = vadd.f32 %v762_v63, %v689_v57  ;;  %v1016_v2 = vpop.f32.mrb[7].mxu1  ;;  %v1027_v3 = vpop.f32.mrb[5].mxu0 }
 0x56a   :  { %v839_v4 = vadd.f32 %v835_v0, %v763_v1 }
 0x56c   :  { %v845_v6 = vadd.f32 %v843_v5, %v839_v4 }
 0x56e   :  { %v846_v7 = vadd.f32 2.0, %v845_v6  ;;  %v855_v11 = vrot.slane %v845_v6, 2 }
 0x570   :  { %v918_v8 = vmul.f32 -1.442695, %v846_v7  ;;  %v857_v13 = vadd.f32 %v855_v11, %v853_v12 }
 0x572   :  { %1115 = vpow2.f32 %v918_v8 }
 0x57c   :  { %v1116_v9 = vpop.eup %1115 }
 0x57d   :  { %v850_v10 = vadd.f32 1.0, %v1116_v9 }
 0x57f   :  { %1117 = vrcp.f32 %v850_v10 }
 0x589   :  { %v1118_v14 = vpop.eup %1117 }
 0x58a   :  { %v858_v15 = vmul.f32 %v1118_v14, %v857_v13  ;;  %1119 = vlog2.f32 %v1118_v14 }
 0x58c   :  { %860 = vst.msk [vmem:[%s1391_s12] sm:$0x3] %vm859_vm11, %v858_v15 }
 0x594   :  { %v1120_v16 = vpop.eup %1119 }
 0x595   :  { %v862_v17 = vmul.f32 0.6931472, %v1120_v16 }
 0x597   :  { %v863_v18 = vsel %vm859_vm11, %v862_v17, 0.0 }
 0x598   :  { %v864_v19 = vrot.slane %v863_v18, 4 }
 0x59a   :  { %v865_v20 = vadd.f32 %v864_v19, %v863_v18 }
 0x59c   :  { %v866_v21 = vrot.slane %v865_v20, 2 }
 0x59e   :  { %v867_v23 = vadd.f32 %v866_v21, %v865_v20 }
 0x5a0   :  { %v868_v24 = vrot.slane %v867_v23, 1 }
 0x5a2   :  { %v869_v25 = vadd.f32 %v868_v24, %v867_v23 }
 0x5a4   :  { %871 = vst.msk [vmem:[%s1392_s13] sm:$0x1] %vm870_vm12, %v869_v25 }

// kernel: ecg_norm_flow_forward.5
= control target key start
LH: loop header
LB: loop body
LE: loop exit
PB: predicated region body
PF: predicated region fallthrough
CT: control target
= control target key end

     0   :  { %v1499_v0 = vmov 0.0   ;;  %vm1500_vm0 = vmmov 0   ;;  %vm84_vm1 = vcmask 1041408   ;;  %vm80_vm2 = vcmask 15360   ;;  %s1865_s1 = inlined_call_operand.vmem [shape: f32[2,64], index: 1, kind: input, shape index: {}]   ;;  %s1866_s4 = inlined_call_operand.vmem [shape: f32[2,64], index: 4, kind: input, shape index: {}]   ;;  %s1867_s5 = inlined_call_operand.vmem [shape: f32[2,64], index: 5, kind: input, shape index: {}]   ;;  %s1868_s0 = inlined_call_operand.vmem [shape: f32[2,64], index: 0, kind: input, shape index: {}]   ;;  %s1869_s2 = inlined_call_operand.vmem [shape: f32[2,64], index: 2, kind: input, shape index: {}]   ;;  %s1870_s3 = inlined_call_operand.vmem [shape: f32[2,64], index: 3, kind: input, shape index: {}]   ;;  %s1871_s7 = inlined_call_operand.vmem [shape: f32[2,2], index: 7, kind: input, shape index: {}]   ;;  %s1872_s6 = inlined_call_operand.vmem [shape: f32[2,2], index: 6, kind: input, shape index: {}]   ;;  %s1873_s20 = inlined_call_operand.vmem [shape: f32[2,64], index: 20, kind: output, shape index: {0}]   ;;  %s1874_s11 = inlined_call_operand.vmem [shape: f32[32,2], index: 11, kind: input, shape index: {}]   ;;  %s1875_s10 = inlined_call_operand.vmem [shape: f32[32,2], index: 10, kind: input, shape index: {}]   ;;  %s1876_s13 = inlined_call_operand.vmem [shape: f32[32,1], index: 13, kind: input, shape index: {}]   ;;  %s1877_s15 = inlined_call_operand.vmem [shape: f32[32,1], index: 15, kind: input, shape index: {}]   ;;  %s1878_s12 = inlined_call_operand.vmem [shape: f32[32,2], index: 12, kind: input, shape index: {}]   ;;  %s1879_s9 = inlined_call_operand.vmem [shape: f32[2,2], index: 9, kind: input, shape index: {}]   ;;  %s1880_s8 = inlined_call_operand.vmem [shape: f32[2,2], index: 8, kind: input, shape index: {}]   ;;  %s1881_s14 = inlined_call_operand.vmem [shape: f32[32,32], index: 14, kind: input, shape index: {}]   ;;  %s1882_s17 = inlined_call_operand.vmem [shape: f32[4,32], index: 17, kind: input, shape index: {}]   ;;  %s1883_s19 = inlined_call_operand.vmem [shape: f32[4,1], index: 19, kind: input, shape index: {}]   ;;  %s1884_s16 = inlined_call_operand.vmem [shape: f32[4,32], index: 16, kind: input, shape index: {}]   ;;  %s1885_s18 = inlined_call_operand.vmem [shape: f32[4,32], index: 18, kind: input, shape index: {}]   ;;  %s1886_s21 = inlined_call_operand.vmem [shape: f32[2,64], index: 21, kind: output, shape index: {1}]   ;;  %s1887_s22 = inlined_call_operand.vmem [shape: f32[1,64], index: 22, kind: output, shape index: {2}]  }
   0x1   :  { %1888 = sst [smem:[#allocation2_spill]] %s1865_s1  ;;  %1313 = vmatprep.subr.mxu0 %v1499_v0  ;;  %1315 = vmatprep.mubr.msk.f32.mxu0 %vm1500_vm0, %v1499_v0  ;;  %v78_v12 = vld [vmem:[%s1872_s6] sm:$0x3]  ;;  %vm1194_vm3 = vcmask 517120   ;;  %v387_v16 = vld [vmem:[%s1874_s11 + $0x8] sm:$0xff]  ;;  %v388_v17 = vld [vmem:[%s1874_s11 + $0x10] sm:$0xff]  ;;  %v410_v33 = vlaneseq }
   0x2   :  { %1889 = sst [smem:[#allocation3_spill]] %s1866_s4  ;;  %s1896_s1 = sld [smem:[#allocation2_spill]]  ;;  %1323 = vmatprep.subr.mxu1 %v1499_v0  ;;  %1325 = vmatprep.mubr.msk.f32.mxu1 %vm1500_vm0, %v1499_v0  ;;  %v386_v15 = vld [vmem:[%s1874_s11] sm:$0xff]  ;;  %vm425_vm4 = vcmask 1048064   ;;  %v389_v20 = vld [vmem:[%s1874_s11 + $0x18] sm:$0xff]  ;;  %v1503_v24 = vmov 0  }
   0x3   :  { %1890 = sst [smem:[#allocation4_spill]] %s1867_s5  ;;  %s1895_s29 = sld [smem:[#allocation3_spill]]  ;;  %v382_v21 = vld [vmem:[%s1875_s10] sm:$0xff]  ;;  %1452 = vset.pattern.permute.xlu1 %v1503_v24  ;;  %1451 = vset.pattern.permute.xlu0 %v1503_v24  ;;  %v395_v26 = vld [vmem:[%s1876_s13 + $0x8] sm:$0xff]  ;;  %v397_v27 = vld [vmem:[%s1876_s13 + $0x18] sm:$0xff]  ;;  %v411_v34 = vand.u32 127, %v410_v33 }
   0x4   :  { %1891 = sst [smem:[#allocation5_spill]] %s1868_s0  ;;  %s1897_s4 = sld [smem:[#allocation4_spill]]  ;;  %v394_v25 = vld [vmem:[%s1876_s13] sm:$0xff]  ;;  %v396_v28 = vld [vmem:[%s1876_s13 + $0x10] sm:$0xff]  ;;  %v403_v29 = vld [vmem:[%s1877_s15 + $0x8] sm:$0xff]  ;;  %vm794_vm7 = vcmask 261120  }
   0x5   :  { %1892 = sst [smem:[#allocation6_spill]] %s1869_s2  ;;  %s1898_s25 = sld [smem:[#allocation5_spill]]  ;;  %v402_v30 = vld [vmem:[%s1877_s15] sm:$0xff]  ;;  %v405_v31 = vld [vmem:[%s1877_s15 + $0x18] sm:$0xff]  ;;  %v404_v32 = vld [vmem:[%s1877_s15 + $0x10] sm:$0xff]  ;;  %v416_v35 = vand.u32 31, %v411_v34 }
   0x6   :  { %1893 = sst [smem:[#allocation7_spill]] %s1870_s3  ;;  %s1899_s27 = sld [smem:[#allocation6_spill]]  ;;  %v383_v39 = vld [vmem:[%s1875_s10 + $0x8] sm:$0xff]  ;;  %v384_v41 = vld [vmem:[%s1875_s10 + $0x10] sm:$0xff]  ;;  %v385_v44 = vld [vmem:[%s1875_s10 + $0x18] sm:$0xff]  ;;  %vm1206_vm12 = vcmask 516096  }
   0x7   :  { %1894 = sst [smem:[#allocation8_spill]] %s1871_s7  ;;  %s1501_s7 = smov 64   ;;  %vm1719_vm5 = vcmp.eq.s32.totalorder %v416_v35, 0  ;;  %vm1729_vm6 = vcmp.eq.s32.totalorder %v416_v35, 31  ;;  %v390_v45 = vld [vmem:[%s1878_s12] sm:$0xff]  ;;  %v391_v46 = vld [vmem:[%s1878_s12 + $0x8] sm:$0xff] }
   0x8   :  { %v74_v2 = vld [vmem:[%s1896_s1] sm:$0x3]  ;;  %s1901_s1 = sld [smem:[#allocation8_spill]]  ;;  %s1502_s2 = smov 65   ;;  %v392_v47 = vld [vmem:[%s1878_s12 + $0x10] sm:$0xff]  ;;  %v393_v48 = vld [vmem:[%s1878_s12 + $0x18] sm:$0xff] }
   0x9   :  { %v73_v1 = vld [vmem:[%s1895_s29] sm:$0x3]  ;;  %s1900_s29 = sld [smem:[#allocation7_spill]]  ;;  %s1504_s11 = smov 127   ;;  %vm1248_vm8 = vmneg %vm1719_vm5 }
   0xa   :  { %v75_v3 = vld [vmem:[%s1897_s4] sm:$0x3]  ;;  %vm1257_vm9 = vmneg %vm1729_vm6 }
   0xb   :  { %v76_v4 = vadd.f32 %v75_v3, %v74_v2  ;;  %v69_v5 = vld [vmem:[%s1898_s25] sm:$0x3]  ;;  %vm1830_vm10 = vmpackc.low %vm1248_vm8, %vm1248_vm8 }
   0xc   :  { %v68_v6 = vld [vmem:[%s1899_s27] sm:$0x3]  ;;  %vm1834_vm11 = vmpackc.low %vm1257_vm9, %vm1257_vm9 }
   0xd   :  { %v77_v8 = vmul.f32 %v76_v4, %v73_v1  ;;  %v235_v49 = vld [vmem:[%s1879_s9] sm:$0x3] }
   0xe   :  { %v79_v9 = vld [vmem:[%s1901_s1] sm:$0x3] }
   0xf   :  { %v70_v7 = vld [vmem:[%s1900_s29] sm:$0x3]  ;;  %1314 = vmatpush3.msk.msra.mxu0 %vm84_vm1, %v77_v8  ;;  %1324 = vmatpush3.msk.msra.mxu1 %vm84_vm1, %v77_v8  ;;  %v400_v8 = vld [vmem:[%s1881_s14 + $0x10] sm:$0xff] }
  0x10   :  { %v71_v10 = vadd.f32 %v70_v7, %v69_v5  ;;  %1316 = vmatmul.mubr.msk.f32.vlgmr.msra.gmra.mrb[0].mxu0 %vm80_vm2, %v79_v9  ;;  %1318 = vmatprep.subr.mxu0 %v1499_v0  ;;  %v234_v50 = vld [vmem:[%s1880_s8] sm:$0x3]  ;;  %v399_v7 = vld [vmem:[%s1881_s14 + $0x8] sm:$0xff]  ;;  %v401_v9 = vld [vmem:[%s1881_s14 + $0x18] sm:$0xff] }
  0x11   :  { %1320 = vmatprep.mubr.msk.f32.mxu0 %vm1500_vm0, %v1499_v0  ;;  %1328 = vmatprep.subr.mxu1 %v1499_v0  ;;  %v398_v51 = vld [vmem:[%s1881_s14] sm:$0xff] }
  0x12   :  { %v1649_v11 = vmul.f32 %v71_v10, %v68_v6  ;;  %1326 = vmatmul.mubr.msk.f32.vlgmr.msra.gmra.mrb[0].mxu1 %vm80_vm2, %v235_v49 }
  0x13   :  { %1330 = vmatprep.mubr.msk.f32.mxu1 %vm1500_vm0, %v1499_v0 }
  0x14   :  { %1319 = vmatpush3.msk.msra.mxu0 %vm84_vm1, %v1649_v11  ;;  %1329 = vmatpush3.msk.msra.mxu1 %vm84_vm1, %v1649_v11 }
  0x16   :  { %1331 = vmatmul.mubr.msk.f32.vlgmr.msra.gmra.mrb[2].mxu1 %vm80_vm2, %v234_v50  ;;  %v407_v50 = vld [vmem:[%s1882_s17] sm:$0xf] }
  0x17   :  { %1365 = vmatprep.mubr.msk.f32.mxu1 %vm794_vm7, %v398_v51 }
  0x18   :  { %1321 = vmatmul.mubr.msk.f32.vlgmr.msra.gmra.mrb[0].mxu0 %vm80_vm2, %v78_v12 }
  0x19   :  { %1335 = vmatprep.mubr.msk.f32.mxu0 %vm80_vm2, %v386_v15  ;;  %v1505_v15 = vmov 0.0|0.0  }
  0xe5   :  { %v305_v10 = vpop.f32.mrb[0].mxu1 }
  0xe6   :  { %v1327_v11 = vpop.f32.mrb[1].mxu1 }
  0xe9   :  { %v378_v12 = vpop.f32.mrb[2].mxu1 }
  0xeb   :  { %v230_v13 = vpop.f32.mrb[0].mxu0 }
  0xec   :  { %1195 = vst.msk [vmem:[%s1873_s20] sm:$0x3] %vm1194_vm3, %v230_v13  ;;  %426 = vrot.lane.b32.xlu0 %v230_v13, %s1501_s7  ;;  %v1322_v14 = vpop.f32.mrb[1].mxu0  ;;  %1333 = vmatprep.subr.msk.mxu0 %vm84_vm1, %v230_v13 }
  0xed   :  { %1334 = vmatpush3.msk.msra.mxu0 %vm84_vm1, %v230_v13  ;;  %v1332_v14 = vpop.f32.mrb[3].mxu1 }
  0xee   :  { %1336 = vmatmul.mubr.msk.f32.vlgmr.msra.gmra.mrb[2].mxu0 %vm80_vm2, %v387_v16 }
  0xef   :  { %1338 = vmatprep.mubr.msk.f32.mxu0 %vm80_vm2, %v388_v17 }
  0xf2   :  { %1339 = vmatmul.mubr.msk.f32.gmra.mrb[4].mxu0 %vm80_vm2, %v389_v20 }
  0xf3   :  { %1343 = vmatprep.mubr.msk.f32.mxu0 %vm80_vm2, %v382_v21 }
 0x15e   :  { %v427_v18 = vpop.permute.xlu0 %426 }
 0x15f   :  { %v428_v19 = vsel %vm425_vm4, %v427_v18, %v230_v13 }
 0x160   :  { %429 = vrot.lane.b32.xlu0 %v428_v19, %s1501_s7 }
 0x164   :  { %748 = vperm.xlu0 %1451, %v394_v25  }
 0x168   :  { %763 = vperm.xlu0 %1451, %v397_v27  }
 0x16c   :  { %781 = vperm.xlu0 %1451, %v403_v29  }
 0x170   :  { %791 = vperm.xlu0 %1451, %v405_v31  }
 0x1d2   :  { %v430_v22 = vpop.permute.xlu0 %429 }
 0x1d3   :  { %v431_v23 = vsel %vm425_vm4, %v430_v22, %v230_v13  ;;  %v1795_v13 = vadd.f32 %v378_v12, %v305_v10 }
 0x1d4   :  { %433 = vrot.lane.b32.xlu1 %v431_v23, %s1502_s2 }
 0x1d8   :  { %438 = vrot.lane.b32.xlu1 %v431_v23, %s1504_s11 }
 0x1dc   :  { %753 = vperm.xlu1 %1452, %v395_v26  }
 0x1e0   :  { %758 = vperm.xlu1 %1452, %v396_v28  }
 0x1e3   :  { %v749_v52 = vpop.permute.xlu0 %748 }
 0x1e4   :  { %776 = vperm.xlu1 %1452, %v402_v30  }
 0x1e7   :  { %v764_v59 = vpop.permute.xlu0 %763 }
 0x1e8   :  { %786 = vperm.xlu1 %1452, %v404_v32  }
 0x1eb   :  { %v782_v16 = vpop.permute.xlu0 %781 }
 0x1ef   :  { %v792_v23 = vpop.permute.xlu0 %791 }
 0x246   :  { %v434_v37 = vpop.permute.xlu1 %433 }
 0x247   :  { %v436_v38 = vsel %vm1719_vm5, 0.0, %v434_v37 }
 0x248   :  { %1341 = vmatprep.subr.msk.mxu0 %vm84_vm1, %v436_v38 }
 0x249   :  { %1342 = vmatpush3.msk.msra.mxu0 %vm84_vm1, %v436_v38 }
 0x24a   :  { %v439_v42 = vpop.permute.xlu1 %438  ;;  %1344 = vmatmul.mubr.msk.f32.vlgmr.msra.gmra.mrb[2].mxu0 %vm80_vm2, %v383_v39 }
 0x24b   :  { %v441_v43 = vsel %vm1729_vm6, 0.0, %v439_v42  ;;  %1346 = vmatprep.mubr.msk.f32.mxu0 %vm80_vm2, %v384_v41 }
 0x24c   :  { %1349 = vmatprep.subr.msk.mxu0 %vm84_vm1, %v441_v43 }
 0x24d   :  { %1350 = vmatpush3.msk.msra.mxu0 %vm84_vm1, %v441_v43 }
 0x24e   :  { %1347 = vmatmul.mubr.msk.f32.gmra.mrb[4].mxu0 %vm80_vm2, %v385_v44  ;;  %1426 = vmatprep.subr.bf16.mxu0 %v1505_v15 }
 0x24f   :  { %1351 = vmatprep.mubr.msk.f32.mxu0 %vm80_vm2, %v390_v45 }
 0x252   :  { %1352 = vmatmul.mubr.msk.f32.vlgmr.msra.gmra.mrb[2].mxu0 %vm80_vm2, %v391_v46 }
 0x253   :  { %1354 = vmatprep.mubr.msk.f32.mxu0 %vm80_vm2, %v392_v47 }
 0x256   :  { %1355 = vmatmul.mubr.msk.f32.gmra.mrb[4].mxu0 %vm80_vm2, %v393_v48 }
 0x257   :  { %1401 = vmatprep.mubr.msk.f32.mxu0 %vm1500_vm0, %v1499_v0 }
 0x25b   :  { %v754_v53 = vpop.permute.xlu1 %753 }
 0x25f   :  { %v759_v62 = vpop.permute.xlu1 %758 }
 0x263   :  { %v777_v17 = vpop.permute.xlu1 %776 }
 0x267   :  { %v787_v26 = vpop.permute.xlu1 %786 }
 0x325   :  { %v1353_v54 = vpop.f32.mrb[2].mxu0 }
 0x326   :  { %v767_v55 = vadd.f32 %v1353_v54, %v754_v53  ;;  %v723_v56 = vpop.f32.mrb[3].mxu0 }
 0x327   :  { %v766_v57 = vadd.f32 %v749_v52, %v723_v56 }
 0x328   :  { %v771_v58 = vmax.f32 %v767_v55, 0.0 }
 0x329   :  { %v770_v60 = vmax.f32 %v766_v57, 0.0  ;;  %v1356_v61 = vpop.f32.mrb[4].mxu0 }
 0x32a   :  { %v769_v63 = vadd.f32 %v1356_v61, %v764_v59  ;;  %v733_v1 = vpop.f32.mrb[5].mxu0 }
 0x32b   :  { %v1404_v2 = vpack.c.bf16 %v771_v58, %v770_v60  ;;  %v768_v3 = vadd.f32 %v759_v62, %v733_v1  ;;  %v409_v62 = vld [vmem:[%s1883_s19] sm:$0xf] }
 0x32c   :  { %v773_v4 = vmax.f32 %v769_v63, 0.0 }
 0x32d   :  { %v772_v5 = vmax.f32 %v768_v3, 0.0  ;;  %1405 = vmatprep.subr.bf16.mxu1 %v1404_v2 }
 0x32e   :  { %1407 = vmatpush3.bf16.msra.mxu1 %v1404_v2 }
 0x32f   :  { %v1408_v6 = vpack.c.bf16 %v773_v4, %v772_v5 }
 0x331   :  { %1409 = vmatprep.subr.bf16.mxu1 %v1408_v6 }
 0x332   :  { %1411 = vmatpush3.bf16.msra.mxu1 %v1408_v6 }
 0x333   :  { %1412 = vmatprep.subr.bf16.mxu1 %v1505_v15 }
 0x335   :  { %1366 = vmatmul.mubr.msk.f32.vlgmr.msra.gmra.mrb[4].mxu1 %vm794_vm7, %v399_v7 }
 0x336   :  { %1368 = vmatprep.mubr.msk.f32.mxu1 %vm794_vm7, %v400_v8 }
 0x339   :  { %1369 = vmatmul.mubr.msk.f32.gmra.mrb[6].mxu1 %vm794_vm7, %v401_v9 }
 0x33a   :  { %1379 = vmatprep.mubr.msk.f32.mxu1 %vm1500_vm0, %v1499_v0 }
 0x408   :  { %v1367_v18 = vpop.f32.mrb[4].mxu1 }
 0x409   :  { %v879_v19 = vadd.f32 %v1367_v18, %v782_v16  ;;  %v873_v20 = vpop.f32.mrb[5].mxu1  ;;  %v406_v18 = vld [vmem:[%s1884_s16] sm:$0xf] }
 0x40a   :  { %v874_v21 = vadd.f32 %v873_v20, %v777_v17 }
 0x40b   :  { %v893_v22 = vmax.f32 %v879_v19, 0.0  ;;  %v408_v19 = vld [vmem:[%s1885_s18] sm:$0xf] }
 0x40c   :  { %v892_v24 = vmax.f32 %v874_v21, 0.0  ;;  %v1370_v25 = vpop.f32.mrb[6].mxu1 }
 0x40d   :  { %v889_v27 = vadd.f32 %v1370_v25, %v792_v23  ;;  %v883_v28 = vpop.f32.mrb[7].mxu1 }
 0x40e   :  { %v884_v29 = vadd.f32 %v883_v28, %v787_v26  ;;  %v1453_v30 = vpack.i.bf16 %v893_v22, %v892_v24  ;;  %v1413_v31 = vpack.c.bf16 %v893_v22, %v892_v24 }
 0x40f   :  { %v895_v32 = vmax.f32 %v889_v27, 0.0 }
 0x410   :  { %v894_v33 = vmax.f32 %v884_v29, 0.0  ;;  %1454 = vrot.lane.b32.xlu1 %v1453_v30, %s1501_s7  ;;  %1414 = vmatpush3.bf16.msra.mxu1 %v1413_v31 }
 0x411   :  { %1415 = vmatprep.subr.bf16.mxu1 %v1505_v15 }
 0x412   :  { %v1458_v34 = vpack.i.bf16 %v895_v32, %v894_v33  ;;  %v1416_v35 = vpack.c.bf16 %v895_v32, %v894_v33 }
 0x414   :  { %1459 = vrot.lane.b32.xlu0 %v1458_v34, %s1501_s7  ;;  %1417 = vmatpush3.bf16.msra.mxu1 %v1416_v35 }
 0x415   :  { %1418 = vmatprep.subr.bf16.mxu1 %v1505_v15 }
 0x417   :  { %1380 = vmatmul.mubr.msk.f32.vlgmr.msra.gmra.mrb[8].mxu1 %vm794_vm7, %v407_v50 }
 0x418   :  { %1390 = vmatprep.mubr.msk.f32.mxu1 %vm1500_vm0, %v1499_v0 }
 0x482   :  { %v1455_v37 = vpop.permute.xlu1 %1454 }
 0x483   :  { %v1457_v38 = vunpack.i.h.bf16 %v1455_v37  ;;  %v1456_v39 = vunpack.i.l.bf16 %v1455_v37 }
 0x485   :  { %v898_v41 = vsel %vm425_vm4, %v1456_v39, %v892_v24  ;;  %v901_v42 = vsel %vm425_vm4, %v1457_v38, %v893_v22 }
 0x486   :  { %v1460_v43 = vpop.permute.xlu0 %1459  ;;  %v1463_v44 = vpack.i.bf16 %v901_v42, %v898_v41 }
 0x487   :  { %v1462_v45 = vunpack.i.h.bf16 %v1460_v43  ;;  %v1461_v46 = vunpack.i.l.bf16 %v1460_v43 }
 0x488   :  { %1464 = vrot.lane.b32.xlu1 %v1463_v44, %s1501_s7 }
 0x489   :  { %v904_v47 = vsel %vm425_vm4, %v1461_v46, %v894_v33  ;;  %v907_v48 = vsel %vm425_vm4, %v1462_v45, %v895_v32 }
 0x48a   :  { %v1468_v49 = vpack.i.bf16 %v907_v48, %v904_v47 }
 0x48c   :  { %1469 = vrot.lane.b32.xlu0 %v1468_v49, %s1501_s7 }
 0x4fa   :  { %v1465_v51 = vpop.permute.xlu1 %1464 }
 0x4fb   :  { %v1467_v52 = vunpack.i.h.bf16 %v1465_v51  ;;  %v1466_v53 = vunpack.i.l.bf16 %v1465_v51 }
 0x4fd   :  { %v916_v54 = vsel %vm425_vm4, %v1466_v53, %v892_v24  ;;  %v917_v55 = vsel %vm425_vm4, %v1467_v52, %v893_v22 }
 0x4fe   :  { %v1470_v56 = vpop.permute.xlu0 %1469  ;;  %v1478_v57 = vpack.i.bf16 %v917_v55, %v916_v54 }
 0x4ff   :  { %v1472_v58 = vunpack.i.h.bf16 %v1470_v56  ;;  %v1471_v59 = vunpack.i.l.bf16 %v1470_v56 }
 0x500   :  { %1479 = vrot.lane.b32.xlu0 %v1478_v57, %s1504_s11  ;;  %1474 = vrot.lane.b32.xlu1 %v1478_v57, %s1502_s2 }
 0x501   :  { %v918_v60 = vsel %vm425_vm4, %v1471_v59, %v894_v33  ;;  %v919_v61 = vsel %vm425_vm4, %v1472_v58, %v895_v32 }
 0x502   :  { %v1488_v0 = vpack.i.bf16 %v919_v61, %v918_v60 }
 0x504   :  { %1489 = vrot.lane.b32.xlu0 %v1488_v0, %s1504_s11  ;;  %1484 = vrot.lane.b32.xlu1 %v1488_v0, %s1502_s2 }
 0x508   :  { %1178 = vperm.xlu1 %1452, %v409_v62  }
 0x572   :  { %v1480_v63 = vpop.permute.xlu0 %1479  ;;  %v1475_v1 = vpop.permute.xlu1 %1474 }
 0x573   :  { %v1482_v3 = vunpack.i.h.bf16 %v1480_v63  ;;  %v1481_v4 = vunpack.i.l.bf16 %v1480_v63  ;;  %v1477_v5 = vunpack.i.h.bf16 %v1475_v1  ;;  %v1476_v6 = vunpack.i.l.bf16 %v1475_v1 }
 0x575   :  { %v1427_v8 = vpack.c.bf16 %v1482_v3, %v1481_v4  ;;  %v1419_v36 = vpack.c.bf16 %v1477_v5, %v1476_v6 }
 0x576   :  { %v1490_v9 = vpop.permute.xlu0 %1489  ;;  %v1485_v10 = vpop.permute.xlu1 %1484 }
 0x577   :  { %v1492_v40 = vunpack.i.h.bf16 %v1490_v9  ;;  %v1491_v11 = vunpack.i.l.bf16 %v1490_v9  ;;  %v1487_v12 = vunpack.i.h.bf16 %v1485_v10  ;;  %v1486_v14 = vunpack.i.l.bf16 %v1485_v10  ;;  %1421 = vmatpush3.bf16.msk.msra.mxu1 %vm1830_vm10, %v1419_v36  ;;  %1429 = vmatpush3.bf16.msk.msra.mxu0 %vm1834_vm11, %v1427_v8 }
 0x578   :  { %1422 = vmatprep.subr.bf16.mxu1 %v1505_v15  ;;  %1430 = vmatprep.subr.bf16.mxu0 %v1505_v15  ;;  %v1025_v15 = vpop.f32.mrb[8].mxu1 }
 0x579   :  { %v1431_v16 = vpack.c.bf16 %v1492_v40, %v1491_v11  ;;  %v1423_v17 = vpack.c.bf16 %v1487_v12, %v1486_v14  ;;  %v1381_v20 = vpop.f32.mrb[9].mxu1 }
 0x57b   :  { %1425 = vmatpush3.bf16.msk.msra.mxu1 %vm1830_vm10, %v1423_v17  ;;  %1433 = vmatpush3.bf16.msk.msra.mxu0 %vm1834_vm11, %v1431_v16 }
 0x57e   :  { %1391 = vmatmul.mubr.msk.f32.vlgmr.msra.gmra.mrb[10].mxu1 %vm794_vm7, %v406_v18  ;;  %1402 = vmatmul.mubr.msk.f32.vlgmr.msra.gmra.mrb[6].mxu0 %vm794_vm7, %v408_v19 }
 0x587   :  { %v1179_v27 = vpop.permute.xlu1 %1178 }
 0x651   :  { %v1098_v21 = vpop.f32.mrb[10].mxu1  ;;  %v1171_v22 = vpop.f32.mrb[6].mxu0 }
 0x652   :  { %v1099_v23 = vadd.f32 %v1098_v21, %v1025_v15  ;;  %v1392_v24 = vpop.f32.mrb[11].mxu1  ;;  %v1403_v25 = vpop.f32.mrb[7].mxu0 }
 0x654   :  { %v1175_v26 = vadd.f32 %v1171_v22, %v1099_v23 }
 0x656   :  { %v1181_v28 = vadd.f32 %v1179_v27, %v1175_v26 }
 0x658   :  { %v1182_v29 = vadd.f32 2.0, %v1181_v28  ;;  %v1190_v30 = vrot.slane %v1181_v28, 2 }
 0x65a   :  { %v1266_v31 = vmul.f32 -1.442695, %v1182_v29  ;;  %v1192_v32 = vadd.f32 %v1190_v30, %v1795_v13 }
 0x65c   :  { %1493 = vpow2.f32 %v1266_v31 }
 0x666   :  { %v1494_v33 = vpop.eup %1493 }
 0x667   :  { %v1186_v34 = vadd.f32 1.0, %v1494_v33 }
 0x669   :  { %1495 = vrcp.f32 %v1186_v34 }
 0x673   :  { %v1496_v35 = vpop.eup %1495 }
 0x674   :  { %v1193_v37 = vmul.f32 %v1496_v35, %v1192_v32  ;;  %1497 = vlog2.f32 %v1496_v35 }
 0x676   :  { %1196 = vst.msk [vmem:[%s1886_s21] sm:$0x3] %vm1194_vm3, %v1193_v37 }
 0x67e   :  { %v1498_v38 = vpop.eup %1497 }
 0x67f   :  { %v1198_v39 = vmul.f32 0.6931472, %v1498_v38 }
 0x681   :  { %v1199_v41 = vsel %vm1194_vm3, %v1198_v39, 0.0 }
 0x682   :  { %v1200_v42 = vrot.slane %v1199_v41, 4 }
 0x684   :  { %v1201_v43 = vadd.f32 %v1200_v42, %v1199_v41 }
 0x686   :  { %v1202_v44 = vrot.slane %v1201_v43, 2 }
 0x688   :  { %v1203_v13 = vadd.f32 %v1202_v44, %v1201_v43 }
 0x68a   :  { %v1204_v45 = vrot.slane %v1203_v13, 1 }
 0x68c   :  { %v1205_v46 = vadd.f32 %v1204_v45, %v1203_v13 }
 0x68e   :  { %1207 = vst.msk [vmem:[%s1887_s22] sm:$0x1] %vm1206_vm12, %v1205_v46 }

// kernel: ecg_norm_flow_forward.6
= control target key start
LH: loop header
LB: loop body
LE: loop exit
PB: predicated region body
PF: predicated region fallthrough
CT: control target
= control target key end

     0   :  { %v1499_v0 = vmov 0.0   ;;  %vm1500_vm0 = vmmov 0   ;;  %vm84_vm1 = vcmask 1041408   ;;  %vm80_vm2 = vcmask 15360   ;;  %s1501_s26 = smov 64   ;;  %s1861_s1 = inlined_call_operand.vmem [shape: f32[2,64], index: 1, kind: input, shape index: {}]   ;;  %s1862_s4 = inlined_call_operand.vmem [shape: f32[2,64], index: 4, kind: input, shape index: {}]   ;;  %s1863_s5 = inlined_call_operand.vmem [shape: f32[2,64], index: 5, kind: input, shape index: {}]   ;;  %s1864_s0 = inlined_call_operand.vmem [shape: f32[2,64], index: 0, kind: input, shape index: {}]   ;;  %s1865_s2 = inlined_call_operand.vmem [shape: f32[2,64], index: 2, kind: input, shape index: {}]   ;;  %s1866_s3 = inlined_call_operand.vmem [shape: f32[2,64], index: 3, kind: input, shape index: {}]   ;;  %s1867_s7 = inlined_call_operand.vmem [shape: f32[2,2], index: 7, kind: input, shape index: {}]   ;;  %s1868_s6 = inlined_call_operand.vmem [shape: f32[2,2], index: 6, kind: input, shape index: {}]   ;;  %s1869_s9 = inlined_call_operand.vmem [shape: f32[2,2], index: 9, kind: input, shape index: {}]   ;;  %s1870_s8 = inlined_call_operand.vmem [shape: f32[2,2], index: 8, kind: input, shape index: {}]   ;;  %s1871_s21 = inlined_call_operand.vmem [shape: f32[2,64], index: 21, kind: output, shape index: {1}]   ;;  %s1872_s11 = inlined_call_operand.vmem [shape: f32[32,2], index: 11, kind: input, shape index: {}]   ;;  %s1873_s10 = inlined_call_operand.vmem [shape: f32[32,2], index: 10, kind: input, shape index: {}]   ;;  %s1874_s13 = inlined_call_operand.vmem [shape: f32[32,1], index: 13, kind: input, shape index: {}]   ;;  %s1875_s15 = inlined_call_operand.vmem [shape: f32[32,1], index: 15, kind: input, shape index: {}]   ;;  %s1876_s12 = inlined_call_operand.vmem [shape: f32[32,2], index: 12, kind: input, shape index: {}]   ;;  %s1877_s14 = inlined_call_operand.vmem [shape: f32[32,32], index: 14, kind: input, shape index: {}]   ;;  %s1878_s17 = inlined_call_operand.vmem [shape: f32[4,32], index: 17, kind: input, shape index: {}]   ;;  %s1879_s19 = inlined_call_operand.vmem [shape: f32[4,1], index: 19, kind: input, shape index: {}]   ;;  %s1880_s16 = inlined_call_operand.vmem [shape: f32[4,32], index: 16, kind: input, shape index: {}]   ;;  %s1881_s18 = inlined_call_operand.vmem [shape: f32[4,32], index: 18, kind: input, shape index: {}]   ;;  %s1882_s20 = inlined_call_operand.vmem [shape: f32[2,64], index: 20, kind: output, shape index: {0}]   ;;  %s1883_s22 = inlined_call_operand.vmem [shape: f32[1,64], index: 22, kind: output, shape index: {2}]  }
   0x1   :  { %1884 = sst [smem:[#allocation2_spill]] %s1861_s1  ;;  %1313 = vmatprep.subr.mxu0 %v1499_v0  ;;  %1318 = vmatprep.subr.mxu1 %v1499_v0  ;;  %v78_v12 = vld [vmem:[%s1868_s6] sm:$0x3]  ;;  %vm1194_vm3 = vcmask 517120   ;;  %v387_v23 = vld [vmem:[%s1872_s11 + $0x8] sm:$0xff]  ;;  %v388_v24 = vld [vmem:[%s1872_s11 + $0x10] sm:$0xff]  ;;  %v410_v40 = vlaneseq }
   0x2   :  { %1885 = sst [smem:[#allocation3_spill]] %s1862_s4  ;;  %s1892_s1 = sld [smem:[#allocation2_spill]]  ;;  %1315 = vmatprep.mubr.msk.f32.mxu0 %vm1500_vm0, %v1499_v0  ;;  %1320 = vmatprep.mubr.msk.f32.mxu1 %vm1500_vm0, %v1499_v0  ;;  %v235_v13 = vld [vmem:[%s1869_s9] sm:$0x3]  ;;  %vm425_vm4 = vcmask 1048064   ;;  %v389_v27 = vld [vmem:[%s1872_s11 + $0x18] sm:$0xff] }
   0x3   :  { %1886 = sst [smem:[#allocation4_spill]] %s1863_s5  ;;  %s1891_s29 = sld [smem:[#allocation3_spill]]  ;;  %v234_v14 = vld [vmem:[%s1870_s8] sm:$0x3]  ;;  %v1503_v31 = vmov 0   ;;  %v395_v33 = vld [vmem:[%s1874_s13 + $0x8] sm:$0xff] }
   0x4   :  { %1887 = sst [smem:[#allocation5_spill]] %s1864_s0  ;;  %s1893_s4 = sld [smem:[#allocation4_spill]]  ;;  %v386_v22 = vld [vmem:[%s1872_s11] sm:$0xff]  ;;  %1452 = vset.pattern.permute.xlu1 %v1503_v31  ;;  %1451 = vset.pattern.permute.xlu0 %v1503_v31  ;;  %v397_v34 = vld [vmem:[%s1874_s13 + $0x18] sm:$0xff]  ;;  %v396_v35 = vld [vmem:[%s1874_s13 + $0x10] sm:$0xff]  ;;  %v411_v41 = vand.u32 127, %v410_v40 }
   0x5   :  { %1888 = sst [smem:[#allocation6_spill]] %s1865_s2  ;;  %s1895_s27 = sld [smem:[#allocation5_spill]]  ;;  %v382_v28 = vld [vmem:[%s1873_s10] sm:$0xff]  ;;  %v403_v36 = vld [vmem:[%s1875_s15 + $0x8] sm:$0xff]  ;;  %v405_v38 = vld [vmem:[%s1875_s15 + $0x18] sm:$0xff]  ;;  %vm794_vm7 = vcmask 261120  }
   0x6   :  { %1889 = sst [smem:[#allocation7_spill]] %s1866_s3  ;;  %s1894_s25 = sld [smem:[#allocation6_spill]]  ;;  %v394_v32 = vld [vmem:[%s1874_s13] sm:$0xff]  ;;  %v404_v39 = vld [vmem:[%s1875_s15 + $0x10] sm:$0xff]  ;;  %v416_v42 = vand.u32 31, %v411_v41  ;;  %v383_v46 = vld [vmem:[%s1873_s10 + $0x8] sm:$0xff] }
   0x7   :  { %1890 = sst [smem:[#allocation8_spill]] %s1867_s7  ;;  %s1502_s3 = smov 65   ;;  %v402_v37 = vld [vmem:[%s1875_s15] sm:$0xff]  ;;  %v384_v48 = vld [vmem:[%s1873_s10 + $0x10] sm:$0xff]  ;;  %v385_v51 = vld [vmem:[%s1873_s10 + $0x18] sm:$0xff]  ;;  %vm1206_vm12 = vcmask 516096  }
   0x8   :  { %v74_v2 = vld [vmem:[%s1892_s1] sm:$0x3]  ;;  %s1897_s1 = sld [smem:[#allocation8_spill]]  ;;  %s1504_s11 = smov 127   ;;  %vm1729_vm5 = vcmp.eq.s32.totalorder %v416_v42, 0  ;;  %vm1739_vm6 = vcmp.eq.s32.totalorder %v416_v42, 31 }
   0x9   :  { %v73_v1 = vld [vmem:[%s1891_s29] sm:$0x3]  ;;  %s1896_s29 = sld [smem:[#allocation7_spill]]  ;;  %v391_v53 = vld [vmem:[%s1876_s12 + $0x8] sm:$0xff]  ;;  %v392_v54 = vld [vmem:[%s1876_s12 + $0x10] sm:$0xff] }
   0xa   :  { %v75_v3 = vld [vmem:[%s1893_s4] sm:$0x3]  ;;  %v393_v55 = vld [vmem:[%s1876_s12 + $0x18] sm:$0xff]  ;;  %vm1248_vm8 = vmneg %vm1729_vm5 }
   0xb   :  { %v76_v4 = vadd.f32 %v75_v3, %v74_v2  ;;  %v69_v6 = vld [vmem:[%s1895_s27] sm:$0x3]  ;;  %vm1257_vm9 = vmneg %vm1739_vm6 }
   0xc   :  { %v68_v5 = vld [vmem:[%s1894_s25] sm:$0x3]  ;;  %vm1826_vm10 = vmpackc.low %vm1248_vm8, %vm1248_vm8 }
   0xd   :  { %v77_v9 = vmul.f32 %v76_v4, %v73_v1  ;;  %v390_v52 = vld [vmem:[%s1876_s12] sm:$0xff]  ;;  %vm1830_vm11 = vmpackc.low %vm1257_vm9, %vm1257_vm9 }
   0xe   :  { %v79_v10 = vld [vmem:[%s1897_s1] sm:$0x3] }
   0xf   :  { %v70_v7 = vld [vmem:[%s1896_s29] sm:$0x3]  ;;  %1314 = vmatpush3.msk.msra.mxu0 %vm84_vm1, %v77_v9 }
  0x10   :  { %v71_v8 = vadd.f32 %v70_v7, %v69_v6  ;;  %1316 = vmatmul.mubr.msk.f32.vlgmr.msra.gmra.mrb[0].mxu0 %vm80_vm2, %v79_v10  ;;  %1323 = vmatprep.subr.mxu0 %v1499_v0  ;;  %v398_v56 = vld [vmem:[%s1877_s14] sm:$0xff] }
  0x11   :  { %1324 = vmatpush3.msk.msra.mxu0 %vm84_vm1, %v77_v9  ;;  %1325 = vmatprep.mubr.msk.f32.mxu0 %vm1500_vm0, %v1499_v0 }
  0x12   :  { %v72_v11 = vmul.f32 %v71_v8, %v68_v5  ;;  %1328 = vmatprep.subr.mxu0 %v1499_v0 }
  0x14   :  { %1319 = vmatpush3.msk.msra.mxu1 %vm84_vm1, %v72_v11  ;;  %1326 = vmatmul.mubr.msk.f32.vlgmr.msra.gmra.mrb[2].mxu0 %vm80_vm2, %v235_v13  ;;  %v400_v13 = vld [vmem:[%s1877_s14 + $0x10] sm:$0xff] }
  0x15   :  { %1321 = vmatmul.mubr.msk.f32.vlgmr.msra.gmra.mrb[0].mxu1 %vm80_vm2, %v78_v12  ;;  %1329 = vmatpush3.msk.msra.mxu0 %vm84_vm1, %v72_v11  ;;  %v399_v12 = vld [vmem:[%s1877_s14 + $0x8] sm:$0xff] }
  0x16   :  { %1330 = vmatprep.mubr.msk.f32.mxu0 %vm1500_vm0, %v1499_v0  ;;  %1335 = vmatprep.mubr.msk.f32.mxu1 %vm80_vm2, %v386_v22 }
  0x1c   :  { %1331 = vmatmul.mubr.msk.f32.vlgmr.msra.gmra.mrb[2].mxu0 %vm80_vm2, %v234_v14  ;;  %v401_v14 = vld [vmem:[%s1877_s14 + $0x18] sm:$0xff] }
  0x1d   :  { %1365 = vmatprep.mubr.msk.f32.mxu0 %vm794_vm7, %v398_v56 }
  0xe3   :  { %v154_v15 = vpop.f32.mrb[0].mxu0 }
  0xe4   :  { %v1317_v17 = vpop.f32.mrb[1].mxu0 }
  0xe8   :  { %v230_v16 = vpop.f32.mrb[0].mxu1 }
  0xe9   :  { %v1671_v18 = vadd.f32 %v230_v16, %v154_v15  ;;  %v1322_v19 = vpop.f32.mrb[1].mxu1  ;;  %v1505_v15 = vmov 0.0|0.0  }
  0xef   :  { %v378_v20 = vpop.f32.mrb[2].mxu0 }
  0xf0   :  { %1196 = vst.msk [vmem:[%s1871_s21] sm:$0x3] %vm1194_vm3, %v378_v20  ;;  %426 = vrot.lane.b32.xlu0 %v378_v20, %s1501_s26  ;;  %v1332_v21 = vpop.f32.mrb[3].mxu0  ;;  %1333 = vmatprep.subr.msk.mxu1 %vm84_vm1, %v378_v20 }
  0xf1   :  { %1334 = vmatpush3.msk.msra.mxu1 %vm84_vm1, %v378_v20 }
  0xf2   :  { %1336 = vmatmul.mubr.msk.f32.vlgmr.msra.gmra.mrb[2].mxu1 %vm80_vm2, %v387_v23 }
  0xf3   :  { %1338 = vmatprep.mubr.msk.f32.mxu1 %vm80_vm2, %v388_v24 }
  0xf6   :  { %1339 = vmatmul.mubr.msk.f32.gmra.mrb[4].mxu1 %vm80_vm2, %v389_v27 }
  0xf7   :  { %1343 = vmatprep.mubr.msk.f32.mxu1 %vm80_vm2, %v382_v28 }
 0x162   :  { %v427_v25 = vpop.permute.xlu0 %426 }
 0x163   :  { %v428_v26 = vsel %vm425_vm4, %v427_v25, %v378_v20 }
 0x164   :  { %429 = vrot.lane.b32.xlu0 %v428_v26, %s1501_s26 }
 0x168   :  { %748 = vperm.xlu0 %1451, %v394_v32  }
 0x16c   :  { %763 = vperm.xlu0 %1451, %v397_v34  }
 0x170   :  { %781 = vperm.xlu0 %1451, %v403_v36  }
 0x174   :  { %791 = vperm.xlu0 %1451, %v405_v38  }
 0x1d6   :  { %v430_v29 = vpop.permute.xlu0 %429 }
 0x1d7   :  { %v431_v30 = vsel %vm425_vm4, %v430_v29, %v378_v20 }
 0x1d8   :  { %433 = vrot.lane.b32.xlu1 %v431_v30, %s1502_s3 }
 0x1dc   :  { %438 = vrot.lane.b32.xlu1 %v431_v30, %s1504_s11 }
 0x1e0   :  { %753 = vperm.xlu1 %1452, %v395_v33  }
 0x1e4   :  { %758 = vperm.xlu1 %1452, %v396_v35  }
 0x1e7   :  { %v749_v57 = vpop.permute.xlu0 %748 }
 0x1e8   :  { %776 = vperm.xlu1 %1452, %v402_v37  }
 0x1eb   :  { %v764_v1 = vpop.permute.xlu0 %763 }
 0x1ec   :  { %786 = vperm.xlu1 %1452, %v404_v39  }
 0x1ef   :  { %v782_v16 = vpop.permute.xlu0 %781 }
 0x1f3   :  { %v792_v24 = vpop.permute.xlu0 %791 }
 0x24a   :  { %v434_v44 = vpop.permute.xlu1 %433 }
 0x24b   :  { %v436_v45 = vsel %vm1729_vm5, 0.0, %v434_v44 }
 0x24c   :  { %1341 = vmatprep.subr.msk.mxu1 %vm84_vm1, %v436_v45 }
 0x24d   :  { %1342 = vmatpush3.msk.msra.mxu1 %vm84_vm1, %v436_v45 }
 0x24e   :  { %v439_v49 = vpop.permute.xlu1 %438  ;;  %1344 = vmatmul.mubr.msk.f32.vlgmr.msra.gmra.mrb[2].mxu1 %vm80_vm2, %v383_v46 }
 0x24f   :  { %v441_v50 = vsel %vm1739_vm6, 0.0, %v439_v49  ;;  %1346 = vmatprep.mubr.msk.f32.mxu1 %vm80_vm2, %v384_v48 }
 0x250   :  { %1349 = vmatprep.subr.msk.mxu1 %vm84_vm1, %v441_v50 }
 0x251   :  { %1350 = vmatpush3.msk.msra.mxu1 %vm84_vm1, %v441_v50 }
 0x252   :  { %1347 = vmatmul.mubr.msk.f32.gmra.mrb[4].mxu1 %vm80_vm2, %v385_v51  ;;  %1418 = vmatprep.subr.bf16.mxu1 %v1505_v15  ;;  %v407_v51 = vld [vmem:[%s1878_s17] sm:$0xf] }
 0x253   :  { %1351 = vmatprep.mubr.msk.f32.mxu1 %vm80_vm2, %v390_v52 }
 0x256   :  { %1352 = vmatmul.mubr.msk.f32.vlgmr.msra.gmra.mrb[2].mxu1 %vm80_vm2, %v391_v53 }
 0x257   :  { %1354 = vmatprep.mubr.msk.f32.mxu1 %vm80_vm2, %v392_v54 }
 0x25a   :  { %1355 = vmatmul.mubr.msk.f32.gmra.mrb[4].mxu1 %vm80_vm2, %v393_v55 }
 0x25b   :  { %1390 = vmatprep.mubr.msk.f32.mxu1 %vm1500_vm0, %v1499_v0 }
 0x25f   :  { %v754_v58 = vpop.permute.xlu1 %753 }
 0x263   :  { %v759_v4 = vpop.permute.xlu1 %758 }
 0x267   :  { %v777_v17 = vpop.permute.xlu1 %776 }
 0x26b   :  { %v787_v27 = vpop.permute.xlu1 %786 }
 0x329   :  { %v1353_v59 = vpop.f32.mrb[2].mxu1 }
 0x32a   :  { %v767_v60 = vadd.f32 %v1353_v59, %v754_v58  ;;  %v723_v61 = vpop.f32.mrb[3].mxu1 }
 0x32b   :  { %v766_v62 = vadd.f32 %v749_v57, %v723_v61 }
 0x32c   :  { %v771_v63 = vmax.f32 %v767_v60, 0.0 }
 0x32d   :  { %v770_v2 = vmax.f32 %v766_v62, 0.0  ;;  %v1356_v3 = vpop.f32.mrb[4].mxu1 }
 0x32e   :  { %v769_v5 = vadd.f32 %v1356_v3, %v764_v1  ;;  %v733_v6 = vpop.f32.mrb[5].mxu1 }
 0x32f   :  { %v1404_v7 = vpack.c.bf16 %v771_v63, %v770_v2  ;;  %v768_v8 = vadd.f32 %v759_v4, %v733_v6  ;;  %v409_v63 = vld [vmem:[%s1879_s19] sm:$0xf] }
 0x330   :  { %v773_v9 = vmax.f32 %v769_v5, 0.0 }
 0x331   :  { %v772_v10 = vmax.f32 %v768_v8, 0.0  ;;  %1405 = vmatprep.subr.bf16.mxu0 %v1404_v7 }
 0x332   :  { %1407 = vmatpush3.bf16.msra.mxu0 %v1404_v7 }
 0x333   :  { %v1408_v11 = vpack.c.bf16 %v773_v9, %v772_v10 }
 0x335   :  { %1409 = vmatprep.subr.bf16.mxu0 %v1408_v11 }
 0x336   :  { %1411 = vmatpush3.bf16.msra.mxu0 %v1408_v11 }
 0x337   :  { %1412 = vmatprep.subr.bf16.mxu0 %v1505_v15 }
 0x339   :  { %1366 = vmatmul.mubr.msk.f32.vlgmr.msra.gmra.mrb[4].mxu0 %vm794_vm7, %v399_v12 }
 0x33a   :  { %1368 = vmatprep.mubr.msk.f32.mxu0 %vm794_vm7, %v400_v13 }
 0x33d   :  { %1369 = vmatmul.mubr.msk.f32.gmra.mrb[6].mxu0 %vm794_vm7, %v401_v14 }
 0x33e   :  { %1379 = vmatprep.mubr.msk.f32.mxu0 %vm1500_vm0, %v1499_v0 }
 0x40c   :  { %v1367_v19 = vpop.f32.mrb[4].mxu0 }
 0x40d   :  { %v879_v20 = vadd.f32 %v1367_v19, %v782_v16  ;;  %v873_v21 = vpop.f32.mrb[5].mxu0  ;;  %v406_v19 = vld [vmem:[%s1880_s16] sm:$0xf] }
 0x40e   :  { %v874_v22 = vadd.f32 %v873_v21, %v777_v17 }
 0x40f   :  { %v893_v23 = vmax.f32 %v879_v20, 0.0  ;;  %v408_v20 = vld [vmem:[%s1881_s18] sm:$0xf] }
 0x410   :  { %v892_v25 = vmax.f32 %v874_v22, 0.0  ;;  %v1370_v26 = vpop.f32.mrb[6].mxu0 }
 0x411   :  { %v889_v28 = vadd.f32 %v1370_v26, %v792_v24  ;;  %v883_v29 = vpop.f32.mrb[7].mxu0 }
 0x412   :  { %v884_v30 = vadd.f32 %v883_v29, %v787_v27  ;;  %v1453_v31 = vpack.i.bf16 %v893_v23, %v892_v25  ;;  %v1413_v32 = vpack.c.bf16 %v893_v23, %v892_v25 }
 0x413   :  { %v895_v33 = vmax.f32 %v889_v28, 0.0 }
 0x414   :  { %v894_v34 = vmax.f32 %v884_v30, 0.0  ;;  %1454 = vrot.lane.b32.xlu1 %v1453_v31, %s1501_s26  ;;  %1414 = vmatpush3.bf16.msra.mxu0 %v1413_v32 }
 0x415   :  { %1415 = vmatprep.subr.bf16.mxu0 %v1505_v15 }
 0x416   :  { %v1458_v35 = vpack.i.bf16 %v895_v33, %v894_v34  ;;  %v1416_v36 = vpack.c.bf16 %v895_v33, %v894_v34 }
 0x418   :  { %1459 = vrot.lane.b32.xlu0 %v1458_v35, %s1501_s26  ;;  %1417 = vmatpush3.bf16.msra.mxu0 %v1416_v36 }
 0x419   :  { %1426 = vmatprep.subr.bf16.mxu0 %v1505_v15 }
 0x41b   :  { %1380 = vmatmul.mubr.msk.f32.vlgmr.msra.gmra.mrb[8].mxu0 %vm794_vm7, %v407_v51 }
 0x41c   :  { %1401 = vmatprep.mubr.msk.f32.mxu0 %vm1500_vm0, %v1499_v0 }
 0x486   :  { %v1455_v37 = vpop.permute.xlu1 %1454 }
 0x487   :  { %v1457_v38 = vunpack.i.h.bf16 %v1455_v37  ;;  %v1456_v39 = vunpack.i.l.bf16 %v1455_v37 }
 0x489   :  { %v898_v40 = vsel %vm425_vm4, %v1456_v39, %v892_v25  ;;  %v901_v41 = vsel %vm425_vm4, %v1457_v38, %v893_v23 }
 0x48a   :  { %v1460_v42 = vpop.permute.xlu0 %1459  ;;  %v1463_v44 = vpack.i.bf16 %v901_v41, %v898_v40 }
 0x48b   :  { %v1462_v45 = vunpack.i.h.bf16 %v1460_v42  ;;  %v1461_v46 = vunpack.i.l.bf16 %v1460_v42 }
 0x48c   :  { %1464 = vrot.lane.b32.xlu1 %v1463_v44, %s1501_s26 }
 0x48d   :  { %v904_v48 = vsel %vm425_vm4, %v1461_v46, %v894_v34  ;;  %v907_v49 = vsel %vm425_vm4, %v1462_v45, %v895_v33 }
 0x48e   :  { %v1468_v50 = vpack.i.bf16 %v907_v49, %v904_v48 }
 0x490   :  { %1469 = vrot.lane.b32.xlu0 %v1468_v50, %s1501_s26 }
 0x4fe   :  { %v1465_v52 = vpop.permute.xlu1 %1464 }
 0x4ff   :  { %v1467_v53 = vunpack.i.h.bf16 %v1465_v52  ;;  %v1466_v54 = vunpack.i.l.bf16 %v1465_v52 }
 0x501   :  { %v916_v55 = vsel %vm425_vm4, %v1466_v54, %v892_v25  ;;  %v917_v56 = vsel %vm425_vm4, %v1467_v53, %v893_v23 }
 0x502   :  { %v1470_v57 = vpop.permute.xlu0 %1469  ;;  %v1478_v58 = vpack.i.bf16 %v917_v56, %v916_v55 }
 0x503   :  { %v1472_v59 = vunpack.i.h.bf16 %v1470_v57  ;;  %v1471_v60 = vunpack.i.l.bf16 %v1470_v57 }
 0x504   :  { %1479 = vrot.lane.b32.xlu0 %v1478_v58, %s1504_s11  ;;  %1474 = vrot.lane.b32.xlu1 %v1478_v58, %s1502_s3 }
 0x505   :  { %v918_v61 = vsel %vm425_vm4, %v1471_v60, %v894_v34  ;;  %v919_v62 = vsel %vm425_vm4, %v1472_v59, %v895_v33 }
 0x506   :  { %v1488_v0 = vpack.i.bf16 %v919_v62, %v918_v61 }
 0x508   :  { %1489 = vrot.lane.b32.xlu0 %v1488_v0, %s1504_s11  ;;  %1484 = vrot.lane.b32.xlu1 %v1488_v0, %s1502_s3 }
 0x50c   :  { %1178 = vperm.xlu1 %1452, %v409_v63  }
 0x576   :  { %v1480_v1 = vpop.permute.xlu0 %1479  ;;  %v1475_v2 = vpop.permute.xlu1 %1474 }
 0x577   :  { %v1482_v4 = vunpack.i.h.bf16 %v1480_v1  ;;  %v1481_v5 = vunpack.i.l.bf16 %v1480_v1  ;;  %v1477_v6 = vunpack.i.h.bf16 %v1475_v2  ;;  %v1476_v7 = vunpack.i.l.bf16 %v1475_v2 }
 0x579   :  { %v1427_v9 = vpack.c.bf16 %v1482_v4, %v1481_v5  ;;  %v1419_v43 = vpack.c.bf16 %v1477_v6, %v1476_v7 }
 0x57a   :  { %v1490_v10 = vpop.permute.xlu0 %1489  ;;  %v1485_v11 = vpop.permute.xlu1 %1484 }
 0x57b   :  { %v1492_v47 = vunpack.i.h.bf16 %v1490_v10  ;;  %v1491_v12 = vunpack.i.l.bf16 %v1490_v10  ;;  %v1487_v13 = vunpack.i.h.bf16 %v1485_v11  ;;  %v1486_v14 = vunpack.i.l.bf16 %v1485_v11  ;;  %1421 = vmatpush3.bf16.msk.msra.mxu1 %vm1826_vm10, %v1419_v43  ;;  %1429 = vmatpush3.bf16.msk.msra.mxu0 %vm1830_vm11, %v1427_v9 }
 0x57c   :  { %1422 = vmatprep.subr.bf16.mxu1 %v1505_v15  ;;  %1430 = vmatprep.subr.bf16.mxu0 %v1505_v15  ;;  %v1025_v15 = vpop.f32.mrb[8].mxu0 }
 0x57d   :  { %v1431_v16 = vpack.c.bf16 %v1492_v47, %v1491_v12  ;;  %v1423_v17 = vpack.c.bf16 %v1487_v13, %v1486_v14  ;;  %v1381_v21 = vpop.f32.mrb[9].mxu0 }
 0x57f   :  { %1425 = vmatpush3.bf16.msk.msra.mxu1 %vm1826_vm10, %v1423_v17  ;;  %1433 = vmatpush3.bf16.msk.msra.mxu0 %vm1830_vm11, %v1431_v16 }
 0x582   :  { %1391 = vmatmul.mubr.msk.f32.vlgmr.msra.gmra.mrb[6].mxu1 %vm794_vm7, %v406_v19  ;;  %1402 = vmatmul.mubr.msk.f32.vlgmr.msra.gmra.mrb[10].mxu0 %vm794_vm7, %v408_v20 }
 0x58b   :  { %v1179_v28 = vpop.permute.xlu1 %1178 }
 0x655   :  { %v1098_v22 = vpop.f32.mrb[6].mxu1  ;;  %v1171_v23 = vpop.f32.mrb[10].mxu0 }
 0x656   :  { %v1099_v24 = vadd.f32 %v1098_v22, %v1025_v15  ;;  %v1392_v25 = vpop.f32.mrb[7].mxu1  ;;  %v1403_v26 = vpop.f32.mrb[11].mxu0 }
 0x658   :  { %v1175_v27 = vadd.f32 %v1171_v23, %v1099_v24 }
 0x65a   :  { %v1181_v29 = vadd.f32 %v1179_v28, %v1175_v27 }
 0x65c   :  { %v1182_v30 = vadd.f32 2.0, %v1181_v29  ;;  %v1190_v31 = vrot.slane %v1181_v29, 2 }
 0x65e   :  { %v1266_v32 = vmul.f32 -1.442695, %v1182_v30  ;;  %v1192_v33 = vadd.f32 %v1190_v31, %v1671_v18 }
 0x660   :  { %1493 = vpow2.f32 %v1266_v32 }
 0x66a   :  { %v1494_v34 = vpop.eup %1493 }
 0x66b   :  { %v1186_v35 = vadd.f32 1.0, %v1494_v34 }
 0x66d   :  { %1495 = vrcp.f32 %v1186_v35 }
 0x677   :  { %v1496_v36 = vpop.eup %1495 }
 0x678   :  { %v1193_v37 = vmul.f32 %v1496_v36, %v1192_v33  ;;  %1497 = vlog2.f32 %v1496_v36 }
 0x67a   :  { %1195 = vst.msk [vmem:[%s1882_s20] sm:$0x3] %vm1194_vm3, %v1193_v37 }
 0x682   :  { %v1498_v38 = vpop.eup %1497 }
 0x683   :  { %v1198_v39 = vmul.f32 0.6931472, %v1498_v38 }
 0x685   :  { %v1199_v40 = vsel %vm1194_vm3, %v1198_v39, 0.0 }
 0x686   :  { %v1200_v41 = vrot.slane %v1199_v40, 4 }
 0x688   :  { %v1201_v42 = vadd.f32 %v1200_v41, %v1199_v40 }
 0x68a   :  { %v1202_v44 = vrot.slane %v1201_v42, 2 }
 0x68c   :  { %v1203_v18 = vadd.f32 %v1202_v44, %v1201_v42 }
 0x68e   :  { %v1204_v45 = vrot.slane %v1203_v18, 1 }
 0x690   :  { %v1205_v46 = vadd.f32 %v1204_v45, %v1203_v18 }
 0x692   :  { %1207 = vst.msk [vmem:[%s1883_s22] sm:$0x1] %vm1206_vm12, %v1205_v46 }

// kernel: ecg_norm_flow_forward.9
= control target key start
LH: loop header
LB: loop body
LE: loop exit
PB: predicated region body
PF: predicated region fallthrough
CT: control target
= control target key end

     0   :  { %v1499_v0 = vmov 0.0   ;;  %vm1500_vm0 = vmmov 0   ;;  %vm84_vm1 = vcmask 1043456   ;;  %vm80_vm2 = vcmask 31744   ;;  %s1501_s26 = smov 16   ;;  %s1861_s1 = inlined_call_operand.vmem [shape: f32[4,16], index: 1, kind: input, shape index: {}]   ;;  %s1862_s4 = inlined_call_operand.vmem [shape: f32[4,16], index: 4, kind: input, shape index: {}]   ;;  %s1863_s5 = inlined_call_operand.vmem [shape: f32[4,16], index: 5, kind: input, shape index: {}]   ;;  %s1864_s0 = inlined_call_operand.vmem [shape: f32[4,16], index: 0, kind: input, shape index: {}]   ;;  %s1865_s2 = inlined_call_operand.vmem [shape: f32[4,16], index: 2, kind: input, shape index: {}]   ;;  %s1866_s3 = inlined_call_operand.vmem [shape: f32[4,16], index: 3, kind: input, shape index: {}]   ;;  %s1867_s7 = inlined_call_operand.vmem [shape: f32[4,4], index: 7, kind: input, shape index: {}]   ;;  %s1868_s6 = inlined_call_operand.vmem [shape: f32[4,4], index: 6, kind: input, shape index: {}]   ;;  %s1869_s9 = inlined_call_operand.vmem [shape: f32[4,4], index: 9, kind: input, shape index: {}]   ;;  %s1870_s8 = inlined_call_operand.vmem [shape: f32[4,4], index: 8, kind: input, shape index: {}]   ;;  %s1871_s21 = inlined_call_operand.vmem [shape: f32[4,16], index: 21, kind: output, shape index: {1}]   ;;  %s1872_s11 = inlined_call_operand.vmem [shape: f32[32,4], index: 11, kind: input, shape index: {}]   ;;  %s1873_s10 = inlined_call_operand.vmem [shape: f32[32,4], index: 10, kind: input, shape index: {}]   ;;  %s1874_s13 = inlined_call_operand.vmem [shape: f32[32,1], index: 13, kind: input, shape index: {}]   ;;  %s1875_s15 = inlined_call_operand.vmem [shape: f32[32,1], index: 15, kind: input, shape index: {}]   ;;  %s1876_s12 = inlined_call_operand.vmem [shape: f32[32,4], index: 12, kind: input, shape index: {}]   ;;  %s1877_s14 = inlined_call_operand.vmem [shape: f32[32,32], index: 14, kind: input, shape index: {}]   ;;  %s1878_s17 = inlined_call_operand.vmem [shape: f32[8,32], index: 17, kind: input, shape index: {}]   ;;  %s1879_s19 = inlined_call_operand.vmem [shape: f32[8,1], index: 19, kind: input, shape index: {}]   ;;  %s1880_s16 = inlined_call_operand.vmem [shape: f32[8,32], index: 16, kind: input, shape index: {}]   ;;  %s1881_s18 = inlined_call_operand.vmem [shape: f32[8,32], index: 18, kind: input, shape index: {}]   ;;  %s1882_s20 = inlined_call_operand.vmem [shape: f32[4,16], index: 20, kind: output, shape index: {0}]   ;;  %s1883_s22 = inlined_call_operand.vmem [shape: f32[1,16], index: 22, kind: output, shape index: {2}]  }
   0x1   :  { %1884 = sst [smem:[#allocation2_spill]] %s1861_s1  ;;  %1313 = vmatprep.subr.mxu0 %v1499_v0  ;;  %1318 = vmatprep.subr.mxu1 %v1499_v0  ;;  %v78_v12 = vld [vmem:[%s1868_s6] sm:$0xf]  ;;  %vm1194_vm3 = vcmask 125952   ;;  %v387_v23 = vld [vmem:[%s1872_s11 + $0x8] sm:$0xff]  ;;  %v388_v24 = vld [vmem:[%s1872_s11 + $0x10] sm:$0xff]  ;;  %v410_v40 = vlaneseq }
   0x2   :  { %1885 = sst [smem:[#allocation3_spill]] %s1862_s4  ;;  %s1892_s1 = sld [smem:[#allocation2_spill]]  ;;  %1315 = vmatprep.mubr.msk.f32.mxu0 %vm1500_vm0, %v1499_v0  ;;  %1320 = vmatprep.mubr.msk.f32.mxu1 %vm1500_vm0, %v1499_v0  ;;  %v235_v13 = vld [vmem:[%s1869_s9] sm:$0xf]  ;;  %vm425_vm4 = vcmask 1047680   ;;  %v389_v27 = vld [vmem:[%s1872_s11 + $0x18] sm:$0xff] }
   0x3   :  { %1886 = sst [smem:[#allocation4_spill]] %s1863_s5  ;;  %s1891_s29 = sld [smem:[#allocation3_spill]]  ;;  %v234_v14 = vld [vmem:[%s1870_s8] sm:$0xf]  ;;  %v1503_v31 = vmov 0   ;;  %v395_v33 = vld [vmem:[%s1874_s13 + $0x8] sm:$0xff] }
   0x4   :  { %1887 = sst [smem:[#allocation5_spill]] %s1864_s0  ;;  %s1893_s4 = sld [smem:[#allocation4_spill]]  ;;  %v386_v22 = vld [vmem:[%s1872_s11] sm:$0xff]  ;;  %1452 = vset.pattern.permute.xlu1 %v1503_v31  ;;  %1451 = vset.pattern.permute.xlu0 %v1503_v31  ;;  %v397_v34 = vld [vmem:[%s1874_s13 + $0x18] sm:$0xff]  ;;  %v396_v35 = vld [vmem:[%s1874_s13 + $0x10] sm:$0xff]  ;;  %v411_v41 = vand.u32 127, %v410_v40 }
   0x5   :  { %1888 = sst [smem:[#allocation6_spill]] %s1865_s2  ;;  %s1895_s27 = sld [smem:[#allocation5_spill]]  ;;  %v382_v28 = vld [vmem:[%s1873_s10] sm:$0xff]  ;;  %v403_v36 = vld [vmem:[%s1875_s15 + $0x8] sm:$0xff]  ;;  %v405_v38 = vld [vmem:[%s1875_s15 + $0x18] sm:$0xff]  ;;  %vm794_vm7 = vcmask 261120  }
   0x6   :  { %1889 = sst [smem:[#allocation7_spill]] %s1866_s3  ;;  %s1894_s25 = sld [smem:[#allocation6_spill]]  ;;  %v394_v32 = vld [vmem:[%s1874_s13] sm:$0xff]  ;;  %v404_v39 = vld [vmem:[%s1875_s15 + $0x10] sm:$0xff]  ;;  %v416_v42 = vand.u32 7, %v411_v41  ;;  %v383_v46 = vld [vmem:[%s1873_s10 + $0x8] sm:$0xff] }
   0x7   :  { %1890 = sst [smem:[#allocation8_spill]] %s1867_s7  ;;  %s1502_s3 = smov 113   ;;  %v402_v37 = vld [vmem:[%s1875_s15] sm:$0xff]  ;;  %v384_v48 = vld [vmem:[%s1873_s10 + $0x10] sm:$0xff]  ;;  %v385_v51 = vld [vmem:[%s1873_s10 + $0x18] sm:$0xff]  ;;  %vm1206_vm12 = vcmask 122880  }
   0x8   :  { %v74_v2 = vld [vmem:[%s1892_s1] sm:$0xf]  ;;  %s1897_s1 = sld [smem:[#allocation8_spill]]  ;;  %s1504_s11 = smov 127   ;;  %vm1729_vm5 = vcmp.eq.s32.totalorder %v416_v42, 0  ;;  %vm1739_vm6 = vcmp.eq.s32.totalorder %v416_v42, 7 }
   0x9   :  { %v73_v1 = vld [vmem:[%s1891_s29] sm:$0xf]  ;;  %s1896_s29 = sld [smem:[#allocation7_spill]]  ;;  %v391_v53 = vld [vmem:[%s1876_s12 + $0x8] sm:$0xff]  ;;  %v392_v54 = vld [vmem:[%s1876_s12 + $0x10] sm:$0xff] }
   0xa   :  { %v75_v3 = vld [vmem:[%s1893_s4] sm:$0xf]  ;;  %v393_v55 = vld [vmem:[%s1876_s12 + $0x18] sm:$0xff]  ;;  %vm1248_vm8 = vmneg %vm1729_vm5 }
   0xb   :  { %v76_v4 = vadd.f32 %v75_v3, %v74_v2  ;;  %v69_v6 = vld [vmem:[%s1895_s27] sm:$0xf]  ;;  %vm1257_vm9 = vmneg %vm1739_vm6 }
   0xc   :  { %v68_v5 = vld [vmem:[%s1894_s25] sm:$0xf]  ;;  %vm1826_vm10 = vmpackc.low %vm1248_vm8, %vm1248_vm8 }
   0xd   :  { %v77_v9 = vmul.f32 %v76_v4, %v73_v1  ;;  %v390_v52 = vld [vmem:[%s1876_s12] sm:$0xff]  ;;  %vm1830_vm11 = vmpackc.low %vm1257_vm9, %vm1257_vm9 }
   0xe   :  { %v79_v10 = vld [vmem:[%s1897_s1] sm:$0xf] }
   0xf   :  { %v70_v7 = vld [vmem:[%s1896_s29] sm:$0xf]  ;;  %1314 = vmatpush3.msk.msra.mxu0 %vm84_vm1, %v77_v9 }
  0x10   :  { %v71_v8 = vadd.f32 %v70_v7, %v69_v6  ;;  %1316 = vmatmul.mubr.msk.f32.vlgmr.msra.gmra.mrb[0].mxu0 %vm80_vm2, %v79_v10  ;;  %1323 = vmatprep.subr.mxu0 %v1499_v0  ;;  %v398_v56 = vld [vmem:[%s1877_s14] sm:$0xff] }
  0x11   :  { %1324 = vmatpush3.msk.msra.mxu0 %vm84_vm1, %v77_v9  ;;  %1325 = vmatprep.mubr.msk.f32.mxu0 %vm1500_vm0, %v1499_v0 }
  0x12   :  { %v72_v11 = vmul.f32 %v71_v8, %v68_v5  ;;  %1328 = vmatprep.subr.mxu0 %v1499_v0 }
  0x14   :  { %1319 = vmatpush3.msk.msra.mxu1 %vm84_vm1, %v72_v11  ;;  %1326 = vmatmul.mubr.msk.f32.vlgmr.msra.gmra.mrb[2].mxu0 %vm80_vm2, %v235_v13  ;;  %v400_v13 = vld [vmem:[%s1877_s14 + $0x10] sm:$0xff] }
  0x15   :  { %1321 = vmatmul.mubr.msk.f32.vlgmr.msra.gmra.mrb[0].mxu1 %vm80_vm2, %v78_v12  ;;  %1329 = vmatpush3.msk.msra.mxu0 %vm84_vm1, %v72_v11  ;;  %v399_v12 = vld [vmem:[%s1877_s14 + $0x8] sm:$0xff] }
  0x16   :  { %1330 = vmatprep.mubr.msk.f32.mxu0 %vm1500_vm0, %v1499_v0  ;;  %1335 = vmatprep.mubr.msk.f32.mxu1 %vm80_vm2, %v386_v22 }
  0x1c   :  { %1331 = vmatmul.mubr.msk.f32.vlgmr.msra.gmra.mrb[2].mxu0 %vm80_vm2, %v234_v14  ;;  %v401_v14 = vld [vmem:[%s1877_s14 + $0x18] sm:$0xff] }
  0x1d   :  { %1365 = vmatprep.mubr.msk.f32.mxu0 %vm794_vm7, %v398_v56 }
  0xe3   :  { %v154_v15 = vpop.f32.mrb[0].mxu0 }
  0xe4   :  { %v1317_v17 = vpop.f32.mrb[1].mxu0 }
  0xe8   :  { %v230_v16 = vpop.f32.mrb[0].mxu1 }
  0xe9   :  { %v1671_v18 = vadd.f32 %v230_v16, %v154_v15  ;;  %v1322_v19 = vpop.f32.mrb[1].mxu1  ;;  %v1505_v15 = vmov 0.0|0.0  }
  0xef   :  { %v378_v20 = vpop.f32.mrb[2].mxu0 }
  0xf0   :  { %1196 = vst.msk [vmem:[%s1871_s21] sm:$0xf] %vm1194_vm3, %v378_v20  ;;  %426 = vrot.lane.b32.xlu0 %v378_v20, %s1501_s26  ;;  %v1332_v21 = vpop.f32.mrb[3].mxu0  ;;  %1333 = vmatprep.subr.msk.mxu1 %vm84_vm1, %v378_v20 }
  0xf1   :  { %1334 = vmatpush3.msk.msra.mxu1 %vm84_vm1, %v378_v20 }
  0xf2   :  { %1336 = vmatmul.mubr.msk.f32.vlgmr.msra.gmra.mrb[2].mxu1 %vm80_vm2, %v387_v23 }
  0xf3   :  { %1338 = vmatprep.mubr.msk.f32.mxu1 %vm80_vm2, %v388_v24 }
  0xf6   :  { %1339 = vmatmul.mubr.msk.f32.gmra.mrb[4].mxu1 %vm80_vm2, %v389_v27 }
  0xf7   :  { %1343 = vmatprep.mubr.msk.f32.mxu1 %vm80_vm2, %v382_v28 }
 0x162   :  { %v427_v25 = vpop.permute.xlu0 %426 }
 0x163   :  { %v428_v26 = vsel %vm425_vm4, %v427_v25, %v378_v20 }
 0x164   :  { %429 = vrot.lane.b32.xlu0 %v428_v26, %s1501_s26 }
 0x168   :  { %748 = vperm.xlu0 %1451, %v394_v32  }
 0x16c   :  { %763 = vperm.xlu0 %1451, %v397_v34  }
 0x170   :  { %781 = vperm.xlu0 %1451, %v403_v36  }
 0x174   :  { %791 = vperm.xlu0 %1451, %v405_v38  }
 0x1d6   :  { %v430_v29 = vpop.permute.xlu0 %429 }
 0x1d7   :  { %v431_v30 = vsel %vm425_vm4, %v430_v29, %v378_v20 }
 0x1d8   :  { %433 = vrot.lane.b32.xlu1 %v431_v30, %s1502_s3 }
 0x1dc   :  { %438 = vrot.lane.b32.xlu1 %v431_v30, %s1504_s11 }
 0x1e0   :  { %753 = vperm.xlu1 %1452, %v395_v33  }
 0x1e4   :  { %758 = vperm.xlu1 %1452, %v396_v35  }
 0x1e7   :  { %v749_v57 = vpop.permute.xlu0 %748 }
 0x1e8   :  { %776 = vperm.xlu1 %1452, %v402_v37  }
 0x1eb   :  { %v764_v1 = vpop.permute.xlu0 %763 }
 0x1ec   :  { %786 = vperm.xlu1 %1452, %v404_v39  }
 0x1ef   :  { %v782_v16 = vpop.permute.xlu0 %781 }
 0x1f3   :  { %v792_v24 = vpop.permute.xlu0 %791 }
 0x24a   :  { %v434_v44 = vpop.permute.xlu1 %433 }
 0x24b   :  { %v436_v45 = vsel %vm1729_vm5, 0.0, %v434_v44 }
 0x24c   :  { %1341 = vmatprep.subr.msk.mxu1 %vm84_vm1, %v436_v45 }
 0x24d   :  { %1342 = vmatpush3.msk.msra.mxu1 %vm84_vm1, %v436_v45 }
 0x24e   :  { %v439_v49 = vpop.permute.xlu1 %438  ;;  %1344 = vmatmul.mubr.msk.f32.vlgmr.msra.gmra.mrb[2].mxu1 %vm80_vm2, %v383_v46 }
 0x24f   :  { %v441_v50 = vsel %vm1739_vm6, 0.0, %v439_v49  ;;  %1346 = vmatprep.mubr.msk.f32.mxu1 %vm80_vm2, %v384_v48 }
 0x250   :  { %1349 = vmatprep.subr.msk.mxu1 %vm84_vm1, %v441_v50 }
 0x251   :  { %1350 = vmatpush3.msk.msra.mxu1 %vm84_vm1, %v441_v50 }
 0x252   :  { %1347 = vmatmul.mubr.msk.f32.gmra.mrb[4].mxu1 %vm80_vm2, %v385_v51  ;;  %1418 = vmatprep.subr.bf16.mxu1 %v1505_v15  ;;  %v407_v51 = vld [vmem:[%s1878_s17] sm:$0xff] }
 0x253   :  { %1351 = vmatprep.mubr.msk.f32.mxu1 %vm80_vm2, %v390_v52 }
 0x256   :  { %1352 = vmatmul.mubr.msk.f32.vlgmr.msra.gmra.mrb[2].mxu1 %vm80_vm2, %v391_v53 }
 0x257   :  { %1354 = vmatprep.mubr.msk.f32.mxu1 %vm80_vm2, %v392_v54 }
 0x25a   :  { %1355 = vmatmul.mubr.msk.f32.gmra.mrb[4].mxu1 %vm80_vm2, %v393_v55 }
 0x25b   :  { %1390 = vmatprep.mubr.msk.f32.mxu1 %vm1500_vm0, %v1499_v0 }
 0x25f   :  { %v754_v58 = vpop.permute.xlu1 %753 }
 0x263   :  { %v759_v4 = vpop.permute.xlu1 %758 }
 0x267   :  { %v777_v17 = vpop.permute.xlu1 %776 }
 0x26b   :  { %v787_v27 = vpop.permute.xlu1 %786 }
 0x329   :  { %v1353_v59 = vpop.f32.mrb[2].mxu1 }
 0x32a   :  { %v767_v60 = vadd.f32 %v1353_v59, %v754_v58  ;;  %v723_v61 = vpop.f32.mrb[3].mxu1 }
 0x32b   :  { %v766_v62 = vadd.f32 %v749_v57, %v723_v61 }
 0x32c   :  { %v771_v63 = vmax.f32 %v767_v60, 0.0 }
 0x32d   :  { %v770_v2 = vmax.f32 %v766_v62, 0.0  ;;  %v1356_v3 = vpop.f32.mrb[4].mxu1 }
 0x32e   :  { %v769_v5 = vadd.f32 %v1356_v3, %v764_v1  ;;  %v733_v6 = vpop.f32.mrb[5].mxu1 }
 0x32f   :  { %v1404_v7 = vpack.c.bf16 %v771_v63, %v770_v2  ;;  %v768_v8 = vadd.f32 %v759_v4, %v733_v6  ;;  %v409_v63 = vld [vmem:[%s1879_s19] sm:$0xff] }
 0x330   :  { %v773_v9 = vmax.f32 %v769_v5, 0.0 }
 0x331   :  { %v772_v10 = vmax.f32 %v768_v8, 0.0  ;;  %1405 = vmatprep.subr.bf16.mxu0 %v1404_v7 }
 0x332   :  { %1407 = vmatpush3.bf16.msra.mxu0 %v1404_v7 }
 0x333   :  { %v1408_v11 = vpack.c.bf16 %v773_v9, %v772_v10 }
 0x335   :  { %1409 = vmatprep.subr.bf16.mxu0 %v1408_v11 }
 0x336   :  { %1411 = vmatpush3.bf16.msra.mxu0 %v1408_v11 }
 0x337   :  { %1412 = vmatprep.subr.bf16.mxu0 %v1505_v15 }
 0x339   :  { %1366 = vmatmul.mubr.msk.f32.vlgmr.msra.gmra.mrb[4].mxu0 %vm794_vm7, %v399_v12 }
 0x33a   :  { %1368 = vmatprep.mubr.msk.f32.mxu0 %vm794_vm7, %v400_v13 }
 0x33d   :  { %1369 = vmatmul.mubr.msk.f32.gmra.mrb[6].mxu0 %vm794_vm7, %v401_v14 }
 0x33e   :  { %1379 = vmatprep.mubr.msk.f32.mxu0 %vm1500_vm0, %v1499_v0 }
 0x40c   :  { %v1367_v19 = vpop.f32.mrb[4].mxu0 }
 0x40d   :  { %v879_v20 = vadd.f32 %v1367_v19, %v782_v16  ;;  %v873_v21 = vpop.f32.mrb[5].mxu0  ;;  %v406_v19 = vld [vmem:[%s1880_s16] sm:$0xff] }
 0x40e   :  { %v874_v22 = vadd.f32 %v873_v21, %v777_v17 }
 0x40f   :  { %v893_v23 = vmax.f32 %v879_v20, 0.0  ;;  %v408_v20 = vld [vmem:[%s1881_s18] sm:$0xff] }
 0x410   :  { %v892_v25 = vmax.f32 %v874_v22, 0.0  ;;  %v1370_v26 = vpop.f32.mrb[6].mxu0 }
 0x411   :  { %v889_v28 = vadd.f32 %v1370_v26, %v792_v24  ;;  %v883_v29 = vpop.f32.mrb[7].mxu0 }
 0x412   :  { %v884_v30 = vadd.f32 %v883_v29, %v787_v27  ;;  %v1453_v31 = vpack.i.bf16 %v893_v23, %v892_v25  ;;  %v1413_v32 = vpack.c.bf16 %v893_v23, %v892_v25 }
 0x413   :  { %v895_v33 = vmax.f32 %v889_v28, 0.0 }
 0x414   :  { %v894_v34 = vmax.f32 %v884_v30, 0.0  ;;  %1454 = vrot.lane.b32.xlu1 %v1453_v31, %s1501_s26  ;;  %1414 = vmatpush3.bf16.msra.mxu0 %v1413_v32 }
 0x415   :  { %1415 = vmatprep.subr.bf16.mxu0 %v1505_v15 }
 0x416   :  { %v1458_v35 = vpack.i.bf16 %v895_v33, %v894_v34  ;;  %v1416_v36 = vpack.c.bf16 %v895_v33, %v894_v34 }
 0x418   :  { %1459 = vrot.lane.b32.xlu0 %v1458_v35, %s1501_s26  ;;  %1417 = vmatpush3.bf16.msra.mxu0 %v1416_v36 }
 0x419   :  { %1426 = vmatprep.subr.bf16.mxu0 %v1505_v15 }
 0x41b   :  { %1380 = vmatmul.mubr.msk.f32.vlgmr.msra.gmra.mrb[8].mxu0 %vm794_vm7, %v407_v51 }
 0x41c   :  { %1401 = vmatprep.mubr.msk.f32.mxu0 %vm1500_vm0, %v1499_v0 }
 0x486   :  { %v1455_v37 = vpop.permute.xlu1 %1454 }
 0x487   :  { %v1457_v38 = vunpack.i.h.bf16 %v1455_v37  ;;  %v1456_v39 = vunpack.i.l.bf16 %v1455_v37 }
 0x489   :  { %v898_v40 = vsel %vm425_vm4, %v1456_v39, %v892_v25  ;;  %v901_v41 = vsel %vm425_vm4, %v1457_v38, %v893_v23 }
 0x48a   :  { %v1460_v42 = vpop.permute.xlu0 %1459  ;;  %v1463_v44 = vpack.i.bf16 %v901_v41, %v898_v40 }
 0x48b   :  { %v1462_v45 = vunpack.i.h.bf16 %v1460_v42  ;;  %v1461_v46 = vunpack.i.l.bf16 %v1460_v42 }
 0x48c   :  { %1464 = vrot.lane.b32.xlu1 %v1463_v44, %s1501_s26 }
 0x48d   :  { %v904_v48 = vsel %vm425_vm4, %v1461_v46, %v894_v34  ;;  %v907_v49 = vsel %vm425_vm4, %v1462_v45, %v895_v33 }
 0x48e   :  { %v1468_v50 = vpack.i.bf16 %v907_v49, %v904_v48 }
 0x490   :  { %1469 = vrot.lane.b32.xlu0 %v1468_v50, %s1501_s26 }
 0x4fe   :  { %v1465_v52 = vpop.permute.xlu1 %1464 }
 0x4ff   :  { %v1467_v53 = vunpack.i.h.bf16 %v1465_v52  ;;  %v1466_v54 = vunpack.i.l.bf16 %v1465_v52 }
 0x501   :  { %v916_v55 = vsel %vm425_vm4, %v1466_v54, %v892_v25  ;;  %v917_v56 = vsel %vm425_vm4, %v1467_v53, %v893_v23 }
 0x502   :  { %v1470_v57 = vpop.permute.xlu0 %1469  ;;  %v1478_v58 = vpack.i.bf16 %v917_v56, %v916_v55 }
 0x503   :  { %v1472_v59 = vunpack.i.h.bf16 %v1470_v57  ;;  %v1471_v60 = vunpack.i.l.bf16 %v1470_v57 }
 0x504   :  { %1479 = vrot.lane.b32.xlu0 %v1478_v58, %s1504_s11  ;;  %1474 = vrot.lane.b32.xlu1 %v1478_v58, %s1502_s3 }
 0x505   :  { %v918_v61 = vsel %vm425_vm4, %v1471_v60, %v894_v34  ;;  %v919_v62 = vsel %vm425_vm4, %v1472_v59, %v895_v33 }
 0x506   :  { %v1488_v0 = vpack.i.bf16 %v919_v62, %v918_v61 }
 0x508   :  { %1489 = vrot.lane.b32.xlu0 %v1488_v0, %s1504_s11  ;;  %1484 = vrot.lane.b32.xlu1 %v1488_v0, %s1502_s3 }
 0x50c   :  { %1178 = vperm.xlu1 %1452, %v409_v63  }
 0x576   :  { %v1480_v1 = vpop.permute.xlu0 %1479  ;;  %v1475_v2 = vpop.permute.xlu1 %1474 }
 0x577   :  { %v1482_v4 = vunpack.i.h.bf16 %v1480_v1  ;;  %v1481_v5 = vunpack.i.l.bf16 %v1480_v1  ;;  %v1477_v6 = vunpack.i.h.bf16 %v1475_v2  ;;  %v1476_v7 = vunpack.i.l.bf16 %v1475_v2 }
 0x579   :  { %v1427_v9 = vpack.c.bf16 %v1482_v4, %v1481_v5  ;;  %v1419_v43 = vpack.c.bf16 %v1477_v6, %v1476_v7 }
 0x57a   :  { %v1490_v10 = vpop.permute.xlu0 %1489  ;;  %v1485_v11 = vpop.permute.xlu1 %1484 }
 0x57b   :  { %v1492_v47 = vunpack.i.h.bf16 %v1490_v10  ;;  %v1491_v12 = vunpack.i.l.bf16 %v1490_v10  ;;  %v1487_v13 = vunpack.i.h.bf16 %v1485_v11  ;;  %v1486_v14 = vunpack.i.l.bf16 %v1485_v11  ;;  %1421 = vmatpush3.bf16.msk.msra.mxu1 %vm1826_vm10, %v1419_v43  ;;  %1429 = vmatpush3.bf16.msk.msra.mxu0 %vm1830_vm11, %v1427_v9 }
 0x57c   :  { %1422 = vmatprep.subr.bf16.mxu1 %v1505_v15  ;;  %1430 = vmatprep.subr.bf16.mxu0 %v1505_v15  ;;  %v1025_v15 = vpop.f32.mrb[8].mxu0 }
 0x57d   :  { %v1431_v16 = vpack.c.bf16 %v1492_v47, %v1491_v12  ;;  %v1423_v17 = vpack.c.bf16 %v1487_v13, %v1486_v14  ;;  %v1381_v21 = vpop.f32.mrb[9].mxu0 }
 0x57f   :  { %1425 = vmatpush3.bf16.msk.msra.mxu1 %vm1826_vm10, %v1423_v17  ;;  %1433 = vmatpush3.bf16.msk.msra.mxu0 %vm1830_vm11, %v1431_v16 }
 0x582   :  { %1391 = vmatmul.mubr.msk.f32.vlgmr.msra.gmra.mrb[6].mxu1 %vm794_vm7, %v406_v19  ;;  %1402 = vmatmul.mubr.msk.f32.vlgmr.msra.gmra.mrb[10].mxu0 %vm794_vm7, %v408_v20 }
 0x58b   :  { %v1179_v28 = vpop.permute.xlu1 %1178 }
 0x655   :  { %v1098_v22 = vpop.f32.mrb[6].mxu1  ;;  %v1171_v23 = vpop.f32.mrb[10].mxu0 }
 0x656   :  { %v1099_v24 = vadd.f32 %v1098_v22, %v1025_v15  ;;  %v1392_v25 = vpop.f32.mrb[7].mxu1  ;;  %v1403_v26 = vpop.f32.mrb[11].mxu0 }
 0x658   :  { %v1175_v27 = vadd.f32 %v1171_v23, %v1099_v24 }
 0x65a   :  { %v1181_v29 = vadd.f32 %v1179_v28, %v1175_v27 }
 0x65c   :  { %v1182_v30 = vadd.f32 2.0, %v1181_v29  ;;  %v1190_v31 = vrot.slane %v1181_v29, 4 }
 0x65e   :  { %v1266_v32 = vmul.f32 -1.442695, %v1182_v30  ;;  %v1192_v33 = vadd.f32 %v1190_v31, %v1671_v18 }
 0x660   :  { %1493 = vpow2.f32 %v1266_v32 }
 0x66a   :  { %v1494_v34 = vpop.eup %1493 }
 0x66b   :  { %v1186_v35 = vadd.f32 1.0, %v1494_v34 }
 0x66d   :  { %1495 = vrcp.f32 %v1186_v35 }
 0x677   :  { %v1496_v36 = vpop.eup %1495 }
 0x678   :  { %v1193_v37 = vmul.f32 %v1496_v36, %v1192_v33  ;;  %1497 = vlog2.f32 %v1496_v36 }
 0x67a   :  { %1195 = vst.msk [vmem:[%s1882_s20] sm:$0xf] %vm1194_vm3, %v1193_v37 }
 0x682   :  { %v1498_v38 = vpop.eup %1497 }
 0x683   :  { %v1198_v39 = vmul.f32 0.6931472, %v1498_v38 }
 0x685   :  { %v1199_v40 = vsel %vm1194_vm3, %v1198_v39, 0.0 }
 0x686   :  { %v1200_v41 = vrot.slane %v1199_v40, 4 }
 0x688   :  { %v1201_v42 = vadd.f32 %v1200_v41, %v1199_v40 }
 0x68a   :  { %v1202_v44 = vrot.slane %v1201_v42, 2 }
 0x68c   :  { %v1203_v18 = vadd.f32 %v1202_v44, %v1201_v42 }
 0x68e   :  { %v1204_v45 = vrot.slane %v1203_v18, 1 }
 0x690   :  { %v1205_v46 = vadd.f32 %v1204_v45, %v1203_v18 }
 0x692   :  { %1207 = vst.msk [vmem:[%s1883_s22] sm:$0x1] %vm1206_vm12, %v1205_v46 }

// kernel: ecg_norm_flow_forward.8
= control target key start
LH: loop header
LB: loop body
LE: loop exit
PB: predicated region body
PF: predicated region fallthrough
CT: control target
= control target key end

     0   :  { %v1499_v0 = vmov 0.0   ;;  %vm1500_vm0 = vmmov 0   ;;  %vm84_vm1 = vcmask 1043456   ;;  %vm80_vm2 = vcmask 31744   ;;  %s1865_s1 = inlined_call_operand.vmem [shape: f32[4,16], index: 1, kind: input, shape index: {}]   ;;  %s1866_s4 = inlined_call_operand.vmem [shape: f32[4,16], index: 4, kind: input, shape index: {}]   ;;  %s1867_s5 = inlined_call_operand.vmem [shape: f32[4,16], index: 5, kind: input, shape index: {}]   ;;  %s1868_s0 = inlined_call_operand.vmem [shape: f32[4,16], index: 0, kind: input, shape index: {}]   ;;  %s1869_s2 = inlined_call_operand.vmem [shape: f32[4,16], index: 2, kind: input, shape index: {}]   ;;  %s1870_s3 = inlined_call_operand.vmem [shape: f32[4,16], index: 3, kind: input, shape index: {}]   ;;  %s1871_s7 = inlined_call_operand.vmem [shape: f32[4,4], index: 7, kind: input, shape index: {}]   ;;  %s1872_s6 = inlined_call_operand.vmem [shape: f32[4,4], index: 6, kind: input, shape index: {}]   ;;  %s1873_s20 = inlined_call_operand.vmem [shape: f32[4,16], index: 20, kind: output, shape index: {0}]   ;;  %s1874_s11 = inlined_call_operand.vmem [shape: f32[32,4], index: 11, kind: input, shape index: {}]   ;;  %s1875_s10 = inlined_call_operand.vmem [shape: f32[32,4], index: 10, kind: input, shape index: {}]   ;;  %s1876_s13 = inlined_call_operand.vmem [shape: f32[32,1], index: 13, kind: input, shape index: {}]   ;;  %s1877_s15 = inlined_call_operand.vmem [shape: f32[32,1], index: 15, kind: input, shape index: {}]   ;;  %s1878_s12 = inlined_call_operand.vmem [shape: f32[32,4], index: 12, kind: input, shape index: {}]   ;;  %s1879_s9 = inlined_call_operand.vmem [shape: f32[4,4], index: 9, kind: input, shape index: {}]   ;;  %s1880_s8 = inlined_call_operand.vmem [shape: f32[4,4], index: 8, kind: input, shape index: {}]   ;;  %s1881_s14 = inlined_call_operand.vmem [shape: f32[32,32], index: 14, kind: input, shape index: {}]   ;;  %s1882_s17 = inlined_call_operand.vmem [shape: f32[8,32], index: 17, kind: input, shape index: {}]   ;;  %s1883_s19 = inlined_call_operand.vmem [shape: f32[8,1], index: 19, kind: input, shape index: {}]   ;;  %s1884_s16 = inlined_call_operand.vmem [shape: f32[8,32], index: 16, kind: input, shape index: {}]   ;;  %s1885_s18 = inlined_call_operand.vmem [shape: f32[8,32], index: 18, kind: input, shape index: {}]   ;;  %s1886_s21 = inlined_call_operand.vmem [shape: f32[4,16], index: 21, kind: output, shape index: {1}]   ;;  %s1887_s22 = inlined_call_operand.vmem [shape: f32[1,16], index: 22, kind: output, shape index: {2}]  }
   0x1   :  { %1888 = sst [smem:[#allocation2_spill]] %s1865_s1  ;;  %1313 = vmatprep.subr.mxu0 %v1499_v0  ;;  %1315 = vmatprep.mubr.msk.f32.mxu0 %vm1500_vm0, %v1499_v0  ;;  %v78_v12 = vld [vmem:[%s1872_s6] sm:$0xf]  ;;  %vm1194_vm3 = vcmask 125952   ;;  %v387_v16 = vld [vmem:[%s1874_s11 + $0x8] sm:$0xff]  ;;  %v388_v17 = vld [vmem:[%s1874_s11 + $0x10] sm:$0xff]  ;;  %v410_v33 = vlaneseq }
   0x2   :  { %1889 = sst [smem:[#allocation3_spill]] %s1866_s4  ;;  %s1896_s1 = sld [smem:[#allocation2_spill]]  ;;  %1323 = vmatprep.subr.mxu1 %v1499_v0  ;;  %1325 = vmatprep.mubr.msk.f32.mxu1 %vm1500_vm0, %v1499_v0  ;;  %v386_v15 = vld [vmem:[%s1874_s11] sm:$0xff]  ;;  %vm425_vm4 = vcmask 1047680   ;;  %v389_v20 = vld [vmem:[%s1874_s11 + $0x18] sm:$0xff]  ;;  %v1503_v24 = vmov 0  }
   0x3   :  { %1890 = sst [smem:[#allocation4_spill]] %s1867_s5  ;;  %s1895_s29 = sld [smem:[#allocation3_spill]]  ;;  %v382_v21 = vld [vmem:[%s1875_s10] sm:$0xff]  ;;  %1452 = vset.pattern.permute.xlu1 %v1503_v24  ;;  %1451 = vset.pattern.permute.xlu0 %v1503_v24  ;;  %v395_v26 = vld [vmem:[%s1876_s13 + $0x8] sm:$0xff]  ;;  %v397_v27 = vld [vmem:[%s1876_s13 + $0x18] sm:$0xff]  ;;  %v411_v34 = vand.u32 127, %v410_v33 }
   0x4   :  { %1891 = sst [smem:[#allocation5_spill]] %s1868_s0  ;;  %s1897_s4 = sld [smem:[#allocation4_spill]]  ;;  %v394_v25 = vld [vmem:[%s1876_s13] sm:$0xff]  ;;  %v396_v28 = vld [vmem:[%s1876_s13 + $0x10] sm:$0xff]  ;;  %v403_v29 = vld [vmem:[%s1877_s15 + $0x8] sm:$0xff]  ;;  %vm794_vm7 = vcmask 261120  }
   0x5   :  { %1892 = sst [smem:[#allocation6_spill]] %s1869_s2  ;;  %s1898_s25 = sld [smem:[#allocation5_spill]]  ;;  %v402_v30 = vld [vmem:[%s1877_s15] sm:$0xff]  ;;  %v405_v31 = vld [vmem:[%s1877_s15 + $0x18] sm:$0xff]  ;;  %v404_v32 = vld [vmem:[%s1877_s15 + $0x10] sm:$0xff]  ;;  %v416_v35 = vand.u32 7, %v411_v34 }
   0x6   :  { %1893 = sst [smem:[#allocation7_spill]] %s1870_s3  ;;  %s1899_s27 = sld [smem:[#allocation6_spill]]  ;;  %v383_v39 = vld [vmem:[%s1875_s10 + $0x8] sm:$0xff]  ;;  %v384_v41 = vld [vmem:[%s1875_s10 + $0x10] sm:$0xff]  ;;  %v385_v44 = vld [vmem:[%s1875_s10 + $0x18] sm:$0xff]  ;;  %vm1206_vm12 = vcmask 122880  }
   0x7   :  { %1894 = sst [smem:[#allocation8_spill]] %s1871_s7  ;;  %s1501_s7 = smov 16   ;;  %vm1719_vm5 = vcmp.eq.s32.totalorder %v416_v35, 0  ;;  %vm1729_vm6 = vcmp.eq.s32.totalorder %v416_v35, 7  ;;  %v390_v45 = vld [vmem:[%s1878_s12] sm:$0xff]  ;;  %v391_v46 = vld [vmem:[%s1878_s12 + $0x8] sm:$0xff] }
   0x8   :  { %v74_v2 = vld [vmem:[%s1896_s1] sm:$0xf]  ;;  %s1901_s1 = sld [smem:[#allocation8_spill]]  ;;  %s1502_s2 = smov 113   ;;  %v392_v47 = vld [vmem:[%s1878_s12 + $0x10] sm:$0xff]  ;;  %v393_v48 = vld [vmem:[%s1878_s12 + $0x18] sm:$0xff] }
   0x9   :  { %v73_v1 = vld [vmem:[%s1895_s29] sm:$0xf]  ;;  %s1900_s29 = sld [smem:[#allocation7_spill]]  ;;  %s1504_s11 = smov 127   ;;  %vm1248_vm8 = vmneg %vm1719_vm5 }
   0xa   :  { %v75_v3 = vld [vmem:[%s1897_s4] sm:$0xf]  ;;  %vm1257_vm9 = vmneg %vm1729_vm6 }
   0xb   :  { %v76_v4 = vadd.f32 %v75_v3, %v74_v2  ;;  %v69_v5 = vld [vmem:[%s1898_s25] sm:$0xf]  ;;  %vm1830_vm10 = vmpackc.low %vm1248_vm8, %vm1248_vm8 }
   0xc   :  { %v68_v6 = vld [vmem:[%s1899_s27] sm:$0xf]  ;;  %vm1834_vm11 = vmpackc.low %vm1257_vm9, %vm1257_vm9 }
   0xd   :  { %v77_v8 = vmul.f32 %v76_v4, %v73_v1  ;;  %v235_v49 = vld [vmem:[%s1879_s9] sm:$0xf] }
   0xe   :  { %v79_v9 = vld [vmem:[%s1901_s1] sm:$0xf] }
   0xf   :  { %v70_v7 = vld [vmem:[%s1900_s29] sm:$0xf]  ;;  %1314 = vmatpush3.msk.msra.mxu0 %vm84_vm1, %v77_v8  ;;  %1324 = vmatpush3.msk.msra.mxu1 %vm84_vm1, %v77_v8  ;;  %v400_v8 = vld [vmem:[%s1881_s14 + $0x10] sm:$0xff] }
  0x10   :  { %v71_v10 = vadd.f32 %v70_v7, %v69_v5  ;;  %1316 = vmatmul.mubr.msk.f32.vlgmr.msra.gmra.mrb[0].mxu0 %vm80_vm2, %v79_v9  ;;  %1318 = vmatprep.subr.mxu0 %v1499_v0  ;;  %v234_v50 = vld [vmem:[%s1880_s8] sm:$0xf]  ;;  %v399_v7 = vld [vmem:[%s1881_s14 + $0x8] sm:$0xff]  ;;  %v401_v9 = vld [vmem:[%s1881_s14 + $0x18] sm:$0xff] }
  0x11   :  { %1320 = vmatprep.mubr.msk.f32.mxu0 %vm1500_vm0, %v1499_v0  ;;  %1328 = vmatprep.subr.mxu1 %v1499_v0  ;;  %v398_v51 = vld [vmem:[%s1881_s14] sm:$0xff] }
  0x12   :  { %v1649_v11 = vmul.f32 %v71_v10, %v68_v6  ;;  %1326 = vmatmul.mubr.msk.f32.vlgmr.msra.gmra.mrb[0].mxu1 %vm80_vm2, %v235_v49 }
  0x13   :  { %1330 = vmatprep.mubr.msk.f32.mxu1 %vm1500_vm0, %v1499_v0 }
  0x14   :  { %1319 = vmatpush3.msk.msra.mxu0 %vm84_vm1, %v1649_v11  ;;  %1329 = vmatpush3.msk.msra.mxu1 %vm84_vm1, %v1649_v11 }
  0x16   :  { %1331 = vmatmul.mubr.msk.f32.vlgmr.msra.gmra.mrb[2].mxu1 %vm80_vm2, %v234_v50  ;;  %v407_v50 = vld [vmem:[%s1882_s17] sm:$0xff] }
  0x17   :  { %1365 = vmatprep.mubr.msk.f32.mxu1 %vm794_vm7, %v398_v51 }
  0x18   :  { %1321 = vmatmul.mubr.msk.f32.vlgmr.msra.gmra.mrb[0].mxu0 %vm80_vm2, %v78_v12 }
  0x19   :  { %1335 = vmatprep.mubr.msk.f32.mxu0 %vm80_vm2, %v386_v15  ;;  %v1505_v15 = vmov 0.0|0.0  }
  0xe5   :  { %v305_v10 = vpop.f32.mrb[0].mxu1 }
  0xe6   :  { %v1327_v11 = vpop.f32.mrb[1].mxu1 }
  0xe9   :  { %v378_v12 = vpop.f32.mrb[2].mxu1 }
  0xeb   :  { %v230_v13 = vpop.f32.mrb[0].mxu0 }
  0xec   :  { %1195 = vst.msk [vmem:[%s1873_s20] sm:$0xf] %vm1194_vm3, %v230_v13  ;;  %426 = vrot.lane.b32.xlu0 %v230_v13, %s1501_s7  ;;  %v1322_v14 = vpop.f32.mrb[1].mxu0  ;;  %1333 = vmatprep.subr.msk.mxu0 %vm84_vm1, %v230_v13 }
  0xed   :  { %1334 = vmatpush3.msk.msra.mxu0 %vm84_vm1, %v230_v13  ;;  %v1332_v14 = vpop.f32.mrb[3].mxu1 }
  0xee   :  { %1336 = vmatmul.mubr.msk.f32.vlgmr.msra.gmra.mrb[2].mxu0 %vm80_vm2, %v387_v16 }
  0xef   :  { %1338 = vmatprep.mubr.msk.f32.mxu0 %vm80_vm2, %v388_v17 }
  0xf2   :  { %1339 = vmatmul.mubr.msk.f32.gmra.mrb[4].mxu0 %vm80_vm2, %v389_v20 }
  0xf3   :  { %1343 = vmatprep.mubr.msk.f32.mxu0 %vm80_vm2, %v382_v21 }
 0x15e   :  { %v427_v18 = vpop.permute.xlu0 %426 }
 0x15f   :  { %v428_v19 = vsel %vm425_vm4, %v427_v18, %v230_v13 }
 0x160   :  { %429 = vrot.lane.b32.xlu0 %v428_v19, %s1501_s7 }
 0x164   :  { %748 = vperm.xlu0 %1451, %v394_v25  }
 0x168   :  { %763 = vperm.xlu0 %1451, %v397_v27  }
 0x16c   :  { %781 = vperm.xlu0 %1451, %v403_v29  }
 0x170   :  { %791 = vperm.xlu0 %1451, %v405_v31  }
 0x1d2   :  { %v430_v22 = vpop.permute.xlu0 %429 }
 0x1d3   :  { %v431_v23 = vsel %vm425_vm4, %v430_v22, %v230_v13  ;;  %v1795_v13 = vadd.f32 %v378_v12, %v305_v10 }
 0x1d4   :  { %433 = vrot.lane.b32.xlu1 %v431_v23, %s1502_s2 }
 0x1d8   :  { %438 = vrot.lane.b32.xlu1 %v431_v23, %s1504_s11 }
 0x1dc   :  { %753 = vperm.xlu1 %1452, %v395_v26  }
 0x1e0   :  { %758 = vperm.xlu1 %1452, %v396_v28  }
 0x1e3   :  { %v749_v52 = vpop.permute.xlu0 %748 }
 0x1e4   :  { %776 = vperm.xlu1 %1452, %v402_v30  }
 0x1e7   :  { %v764_v59 = vpop.permute.xlu0 %763 }
 0x1e8   :  { %786 = vperm.xlu1 %1452, %v404_v32  }
 0x1eb   :  { %v782_v16 = vpop.permute.xlu0 %781 }
 0x1ef   :  { %v792_v23 = vpop.permute.xlu0 %791 }
 0x246   :  { %v434_v37 = vpop.permute.xlu1 %433 }
 0x247   :  { %v436_v38 = vsel %vm1719_vm5, 0.0, %v434_v37 }
 0x248   :  { %1341 = vmatprep.subr.msk.mxu0 %vm84_vm1, %v436_v38 }
 0x249   :  { %1342 = vmatpush3.msk.msra.mxu0 %vm84_vm1, %v436_v38 }
 0x24a   :  { %v439_v42 = vpop.permute.xlu1 %438  ;;  %1344 = vmatmul.mubr.msk.f32.vlgmr.msra.gmra.mrb[2].mxu0 %vm80_vm2, %v383_v39 }
 0x24b   :  { %v441_v43 = vsel %vm1729_vm6, 0.0, %v439_v42  ;;  %1346 = vmatprep.mubr.msk.f32.mxu0 %vm80_vm2, %v384_v41 }
 0x24c   :  { %1349 = vmatprep.subr.msk.mxu0 %vm84_vm1, %v441_v43 }
 0x24d   :  { %1350 = vmatpush3.msk.msra.mxu0 %vm84_vm1, %v441_v43 }
 0x24e   :  { %1347 = vmatmul.mubr.msk.f32.gmra.mrb[4].mxu0 %vm80_vm2, %v385_v44  ;;  %1426 = vmatprep.subr.bf16.mxu0 %v1505_v15 }
 0x24f   :  { %1351 = vmatprep.mubr.msk.f32.mxu0 %vm80_vm2, %v390_v45 }
 0x252   :  { %1352 = vmatmul.mubr.msk.f32.vlgmr.msra.gmra.mrb[2].mxu0 %vm80_vm2, %v391_v46 }
 0x253   :  { %1354 = vmatprep.mubr.msk.f32.mxu0 %vm80_vm2, %v392_v47 }
 0x256   :  { %1355 = vmatmul.mubr.msk.f32.gmra.mrb[4].mxu0 %vm80_vm2, %v393_v48 }
 0x257   :  { %1401 = vmatprep.mubr.msk.f32.mxu0 %vm1500_vm0, %v1499_v0 }
 0x25b   :  { %v754_v53 = vpop.permute.xlu1 %753 }
 0x25f   :  { %v759_v62 = vpop.permute.xlu1 %758 }
 0x263   :  { %v777_v17 = vpop.permute.xlu1 %776 }
 0x267   :  { %v787_v26 = vpop.permute.xlu1 %786 }
 0x325   :  { %v1353_v54 = vpop.f32.mrb[2].mxu0 }
 0x326   :  { %v767_v55 = vadd.f32 %v1353_v54, %v754_v53  ;;  %v723_v56 = vpop.f32.mrb[3].mxu0 }
 0x327   :  { %v766_v57 = vadd.f32 %v749_v52, %v723_v56 }
 0x328   :  { %v771_v58 = vmax.f32 %v767_v55, 0.0 }
 0x329   :  { %v770_v60 = vmax.f32 %v766_v57, 0.0  ;;  %v1356_v61 = vpop.f32.mrb[4].mxu0 }
 0x32a   :  { %v769_v63 = vadd.f32 %v1356_v61, %v764_v59  ;;  %v733_v1 = vpop.f32.mrb[5].mxu0 }
 0x32b   :  { %v1404_v2 = vpack.c.bf16 %v771_v58, %v770_v60  ;;  %v768_v3 = vadd.f32 %v759_v62, %v733_v1  ;;  %v409_v62 = vld [vmem:[%s1883_s19] sm:$0xff] }
 0x32c   :  { %v773_v4 = vmax.f32 %v769_v63, 0.0 }
 0x32d   :  { %v772_v5 = vmax.f32 %v768_v3, 0.0  ;;  %1405 = vmatprep.subr.bf16.mxu1 %v1404_v2 }
 0x32e   :  { %1407 = vmatpush3.bf16.msra.mxu1 %v1404_v2 }
 0x32f   :  { %v1408_v6 = vpack.c.bf16 %v773_v4, %v772_v5 }
 0x331   :  { %1409 = vmatprep.subr.bf16.mxu1 %v1408_v6 }
 0x332   :  { %1411 = vmatpush3.bf16.msra.mxu1 %v1408_v6 }
 0x333   :  { %1412 = vmatprep.subr.bf16.mxu1 %v1505_v15 }
 0x335   :  { %1366 = vmatmul.mubr.msk.f32.vlgmr.msra.gmra.mrb[4].mxu1 %vm794_vm7, %v399_v7 }
 0x336   :  { %1368 = vmatprep.mubr.msk.f32.mxu1 %vm794_vm7, %v400_v8 }
 0x339   :  { %1369 = vmatmul.mubr.msk.f32.gmra.mrb[6].mxu1 %vm794_vm7, %v401_v9 }
 0x33a   :  { %1379 = vmatprep.mubr.msk.f32.mxu1 %vm1500_vm0, %v1499_v0 }
 0x408   :  { %v1367_v18 = vpop.f32.mrb[4].mxu1 }
 0x409   :  { %v879_v19 = vadd.f32 %v1367_v18, %v782_v16  ;;  %v873_v20 = vpop.f32.mrb[5].mxu1  ;;  %v406_v18 = vld [vmem:[%s1884_s16] sm:$0xff] }
 0x40a   :  { %v874_v21 = vadd.f32 %v873_v20, %v777_v17 }
 0x40b   :  { %v893_v22 = vmax.f32 %v879_v19, 0.0  ;;  %v408_v19 = vld [vmem:[%s1885_s18] sm:$0xff] }
 0x40c   :  { %v892_v24 = vmax.f32 %v874_v21, 0.0  ;;  %v1370_v25 = vpop.f32.mrb[6].mxu1 }
 0x40d   :  { %v889_v27 = vadd.f32 %v1370_v25, %v792_v23  ;;  %v883_v28 = vpop.f32.mrb[7].mxu1 }
 0x40e   :  { %v884_v29 = vadd.f32 %v883_v28, %v787_v26  ;;  %v1453_v30 = vpack.i.bf16 %v893_v22, %v892_v24  ;;  %v1413_v31 = vpack.c.bf16 %v893_v22, %v892_v24 }
 0x40f   :  { %v895_v32 = vmax.f32 %v889_v27, 0.0 }
 0x410   :  { %v894_v33 = vmax.f32 %v884_v29, 0.0  ;;  %1454 = vrot.lane.b32.xlu1 %v1453_v30, %s1501_s7  ;;  %1414 = vmatpush3.bf16.msra.mxu1 %v1413_v31 }
 0x411   :  { %1415 = vmatprep.subr.bf16.mxu1 %v1505_v15 }
 0x412   :  { %v1458_v34 = vpack.i.bf16 %v895_v32, %v894_v33  ;;  %v1416_v35 = vpack.c.bf16 %v895_v32, %v894_v33 }
 0x414   :  { %1459 = vrot.lane.b32.xlu0 %v1458_v34, %s1501_s7  ;;  %1417 = vmatpush3.bf16.msra.mxu1 %v1416_v35 }
 0x415   :  { %1418 = vmatprep.subr.bf16.mxu1 %v1505_v15 }
 0x417   :  { %1380 = vmatmul.mubr.msk.f32.vlgmr.msra.gmra.mrb[8].mxu1 %vm794_vm7, %v407_v50 }
 0x418   :  { %1390 = vmatprep.mubr.msk.f32.mxu1 %vm1500_vm0, %v1499_v0 }
 0x482   :  { %v1455_v37 = vpop.permute.xlu1 %1454 }
 0x483   :  { %v1457_v38 = vunpack.i.h.bf16 %v1455_v37  ;;  %v1456_v39 = vunpack.i.l.bf16 %v1455_v37 }
 0x485   :  { %v898_v41 = vsel %vm425_vm4, %v1456_v39, %v892_v24  ;;  %v901_v42 = vsel %vm425_vm4, %v1457_v38, %v893_v22 }
 0x486   :  { %v1460_v43 = vpop.permute.xlu0 %1459  ;;  %v1463_v44 = vpack.i.bf16 %v901_v42, %v898_v41 }
 0x487   :  { %v1462_v45 = vunpack.i.h.bf16 %v1460_v43  ;;  %v1461_v46 = vunpack.i.l.bf16 %v1460_v43 }
 0x488   :  { %1464 = vrot.lane.b32.xlu1 %v1463_v44, %s1501_s7 }
 0x489   :  { %v904_v47 = vsel %vm425_vm4, %v1461_v46, %v894_v33  ;;  %v907_v48 = vsel %vm425_vm4, %v1462_v45, %v895_v32 }
 0x48a   :  { %v1468_v49 = vpack.i.bf16 %v907_v48, %v904_v47 }
 0x48c   :  { %1469 = vrot.lane.b32.xlu0 %v1468_v49, %s1501_s7 }
 0x4fa   :  { %v1465_v51 = vpop.permute.xlu1 %1464 }
 0x4fb   :  { %v1467_v52 = vunpack.i.h.bf16 %v1465_v51  ;;  %v1466_v53 = vunpack.i.l.bf16 %v1465_v51 }
 0x4fd   :  { %v916_v54 = vsel %vm425_vm4, %v1466_v53, %v892_v24  ;;  %v917_v55 = vsel %vm425_vm4, %v1467_v52, %v893_v22 }
 0x4fe   :  { %v1470_v56 = vpop.permute.xlu0 %1469  ;;  %v1478_v57 = vpack.i.bf16 %v917_v55, %v916_v54 }
 0x4ff   :  { %v1472_v58 = vunpack.i.h.bf16 %v1470_v56  ;;  %v1471_v59 = vunpack.i.l.bf16 %v1470_v56 }
 0x500   :  { %1479 = vrot.lane.b32.xlu0 %v1478_v57, %s1504_s11  ;;  %1474 = vrot.lane.b32.xlu1 %v1478_v57, %s1502_s2 }
 0x501   :  { %v918_v60 = vsel %vm425_vm4, %v1471_v59, %v894_v33  ;;  %v919_v61 = vsel %vm425_vm4, %v1472_v58, %v895_v32 }
 0x502   :  { %v1488_v0 = vpack.i.bf16 %v919_v61, %v918_v60 }
 0x504   :  { %1489 = vrot.lane.b32.xlu0 %v1488_v0, %s1504_s11  ;;  %1484 = vrot.lane.b32.xlu1 %v1488_v0, %s1502_s2 }
 0x508   :  { %1178 = vperm.xlu1 %1452, %v409_v62  }
 0x572   :  { %v1480_v63 = vpop.permute.xlu0 %1479  ;;  %v1475_v1 = vpop.permute.xlu1 %1474 }
 0x573   :  { %v1482_v3 = vunpack.i.h.bf16 %v1480_v63  ;;  %v1481_v4 = vunpack.i.l.bf16 %v1480_v63  ;;  %v1477_v5 = vunpack.i.h.bf16 %v1475_v1  ;;  %v1476_v6 = vunpack.i.l.bf16 %v1475_v1 }
 0x575   :  { %v1427_v8 = vpack.c.bf16 %v1482_v3, %v1481_v4  ;;  %v1419_v36 = vpack.c.bf16 %v1477_v5, %v1476_v6 }
 0x576   :  { %v1490_v9 = vpop.permute.xlu0 %1489  ;;  %v1485_v10 = vpop.permute.xlu1 %1484 }
 0x577   :  { %v1492_v40 = vunpack.i.h.bf16 %v1490_v9  ;;  %v1491_v11 = vunpack.i.l.bf16 %v1490_v9  ;;  %v1487_v12 = vunpack.i.h.bf16 %v1485_v10  ;;  %v1486_v14 = vunpack.i.l.bf16 %v1485_v10  ;;  %1421 = vmatpush3.bf16.msk.msra.mxu1 %vm1830_vm10, %v1419_v36  ;;  %1429 = vmatpush3.bf16.msk.msra.mxu0 %vm1834_vm11, %v1427_v8 }
 0x578   :  { %1422 = vmatprep.subr.bf16.mxu1 %v1505_v15  ;;  %1430 = vmatprep.subr.bf16.mxu0 %v1505_v15  ;;  %v1025_v15 = vpop.f32.mrb[8].mxu1 }
 0x579   :  { %v1431_v16 = vpack.c.bf16 %v1492_v40, %v1491_v11  ;;  %v1423_v17 = vpack.c.bf16 %v1487_v12, %v1486_v14  ;;  %v1381_v20 = vpop.f32.mrb[9].mxu1 }
 0x57b   :  { %1425 = vmatpush3.bf16.msk.msra.mxu1 %vm1830_vm10, %v1423_v17  ;;  %1433 = vmatpush3.bf16.msk.msra.mxu0 %vm1834_vm11, %v1431_v16 }
 0x57e   :  { %1391 = vmatmul.mubr.msk.f32.vlgmr.msra.gmra.mrb[10].mxu1 %vm794_vm7, %v406_v18  ;;  %1402 = vmatmul.mubr.msk.f32.vlgmr.msra.gmra.mrb[6].mxu0 %vm794_vm7, %v408_v19 }
 0x587   :  { %v1179_v27 = vpop.permute.xlu1 %1178 }
 0x651   :  { %v1098_v21 = vpop.f32.mrb[10].mxu1  ;;  %v1171_v22 = vpop.f32.mrb[6].mxu0 }
 0x652   :  { %v1099_v23 = vadd.f32 %v1098_v21, %v1025_v15  ;;  %v1392_v24 = vpop.f32.mrb[11].mxu1  ;;  %v1403_v25 = vpop.f32.mrb[7].mxu0 }
 0x654   :  { %v1175_v26 = vadd.f32 %v1171_v22, %v1099_v23 }
 0x656   :  { %v1181_v28 = vadd.f32 %v1179_v27, %v1175_v26 }
 0x658   :  { %v1182_v29 = vadd.f32 2.0, %v1181_v28  ;;  %v1190_v30 = vrot.slane %v1181_v28, 4 }
 0x65a   :  { %v1266_v31 = vmul.f32 -1.442695, %v1182_v29  ;;  %v1192_v32 = vadd.f32 %v1190_v30, %v1795_v13 }
 0x65c   :  { %1493 = vpow2.f32 %v1266_v31 }
 0x666   :  { %v1494_v33 = vpop.eup %1493 }
 0x667   :  { %v1186_v34 = vadd.f32 1.0, %v1494_v33 }
 0x669   :  { %1495 = vrcp.f32 %v1186_v34 }
 0x673   :  { %v1496_v35 = vpop.eup %1495 }
 0x674   :  { %v1193_v37 = vmul.f32 %v1496_v35, %v1192_v32  ;;  %1497 = vlog2.f32 %v1496_v35 }
 0x676   :  { %1196 = vst.msk [vmem:[%s1886_s21] sm:$0xf] %vm1194_vm3, %v1193_v37 }
 0x67e   :  { %v1498_v38 = vpop.eup %1497 }
 0x67f   :  { %v1198_v39 = vmul.f32 0.6931472, %v1498_v38 }
 0x681   :  { %v1199_v41 = vsel %vm1194_vm3, %v1198_v39, 0.0 }
 0x682   :  { %v1200_v42 = vrot.slane %v1199_v41, 4 }
 0x684   :  { %v1201_v43 = vadd.f32 %v1200_v42, %v1199_v41 }
 0x686   :  { %v1202_v44 = vrot.slane %v1201_v43, 2 }
 0x688   :  { %v1203_v13 = vadd.f32 %v1202_v44, %v1201_v43 }
 0x68a   :  { %v1204_v45 = vrot.slane %v1203_v13, 1 }
 0x68c   :  { %v1205_v46 = vadd.f32 %v1204_v45, %v1203_v13 }
 0x68e   :  { %1207 = vst.msk [vmem:[%s1887_s22] sm:$0x1] %vm1206_vm12, %v1205_v46 }

</bundles_post_ra>
